<compile_context>
chip_gen: v7x
topology: tpu7x:2x2x1
jax: 0.10.0
libtpu: 0.0.40
codegen_flags: <defaults>
</compile_context>

<pallas_src>
import jax
import jax.numpy as jnp
from jax import lax
from jax.experimental import pallas as pl
from jax.experimental.pallas import tpu as pltpu


def _round_up(a, m):
    return (a + m - 1) // m * m


# ----------------------------------------------------------------------------
# Fused encoder kernel (4 LSTM layers + LayerNorm) over one time chunk
# ----------------------------------------------------------------------------

def _build_encoder_kernel(Tc, Bs, H1p, H2p, H2, layer_norm_flag, unroll):
    """Returns a kernel specialized on the static chunk / padded sizes."""

    def lstm_chunk(x_val, wih_ref, whh_ref, b_ref, gx_ref, out_ref, hc_ref, Hp):
        # ---- hoisted input projection: one big-M matmul for the whole chunk.
        d_in = x_val.shape[-1]
        gx = jnp.dot(x_val.reshape(Tc * Bs, d_in), wih_ref[...],
                     preferred_element_type=jnp.float32) + b_ref[...]
        gx_ref[...] = gx.reshape(Tc, Bs, 4 * Hp)

        whh = whh_ref[...]  # resident, hoisted out of the time loop

        # ---- sequential recurrence: only h @ W_hh + nonlinearities remain.
        def step(t, carry):
            h = hc_ref[0]
            c = hc_ref[1]
            gates = gx_ref[t] + jnp.dot(h, whh, preferred_element_type=jnp.float32)
            i = jax.nn.sigmoid(gates[:, 0 * Hp:1 * Hp])   # lane-aligned slices
            f = jax.nn.sigmoid(gates[:, 1 * Hp:2 * Hp])
            g = jnp.tanh(gates[:, 2 * Hp:3 * Hp])
            o = jax.nn.sigmoid(gates[:, 3 * Hp:4 * Hp])
            c_new = f * c + i * g
            h_new = o * jnp.tanh(c_new)
            hc_ref[0] = h_new
            hc_ref[1] = c_new
            out_ref[t] = h_new
            return carry

        lax.fori_loop(0, Tc, step, 0, unroll=unroll)

    def kernel(x_ref,
               wih1a, whh1a, b1a, wih1b, whh1b, b1b,
               wih2a, whh2a, b2a, wih2b, whh2b, b2b,
               gamma_ref, beta_ref,
               y_ref,
               hc1, hc2, hc3, hc4, actA, actB, gxA, gxB):
        # Reset recurrent state at the start of each (batch-shard's) sequence.
        @pl.when(pl.program_id(1) == 0)
        def _init():
            hc1[...] = jnp.zeros_like(hc1)
            hc2[...] = jnp.zeros_like(hc2)
            hc3[...] = jnp.zeros_like(hc3)
            hc4[...] = jnp.zeros_like(hc4)

        x = x_ref[...].astype(jnp.float32)
        # lstm1 (2 layers), then lstm2 (2 layers); inter-layer acts stay in VMEM.
        lstm_chunk(x,         wih1a, whh1a, b1a, gxA, actA, hc1, H1p)
        lstm_chunk(actA[...], wih1b, whh1b, b1b, gxA, actA, hc2, H1p)
        lstm_chunk(actA[...], wih2a, whh2a, b2a, gxB, actB, hc3, H2p)
        lstm_chunk(actB[...], wih2b, whh2b, b2b, gxB, actB, hc4, H2p)

        yv = actB[...]                                   # (Tc, Bs, H2p) f32
        if layer_norm_flag:
            inv_n = jnp.float32(1.0 / H2)
            if H2 == H2p:
                mean = jnp.mean(yv, axis=-1, keepdims=True)
                cen = yv - mean
            else:
                # Padded lanes are exactly zero; mask them out of mean/var.
                mask = (lax.broadcasted_iota(jnp.int32, (1, 1, H2p), 2) < H2
                        ).astype(jnp.float32)
                mean = jnp.sum(yv * mask, axis=-1, keepdims=True) * inv_n
                cen = (yv - mean) * mask
            var = jnp.sum(cen * cen, axis=-1, keepdims=True) * inv_n
            yn = cen * lax.rsqrt(var + jnp.float32(1e-5))
            y_ref[...] = (yn * gamma_ref[...] + beta_ref[...]).astype(y_ref.dtype)
        else:
            y_ref[...] = yv.astype(y_ref.dtype)

    return kernel


# ----------------------------------------------------------------------------
# Wrapper: padding, chunking, BlockSpecs, VMEM budgeting
# ----------------------------------------------------------------------------

def encoder_forward(x, packed, layer_norm_flag=True, *, t_chunk_max=128,
                    b_shards=None, vmem_budget_bytes=24 * 1024 * 1024):
    """x: (B, T, input_dim) batch_first, like the PyTorch module."""
    B, T, D = x.shape
    H1p, H2p, H2 = packed["H1p"], packed["H2p"], packed["H2"]
    layers = packed["layers"]                         # 4 x (wih_t, whh_t, b)
    flat_w = [w for layer in layers for w in layer]
    gamma, beta = packed["gamma"], packed["beta"]

    # ---- batch sharding (v7x megacore) + sublane padding
    if b_shards is None:
        b_shards = 2 if B >= 16 else 1                # keep >=8 rows per shard
    Bs = _round_up(-(-B // b_shards), 8)
    B_pad = Bs * b_shards

    # ---- explicit VMEM budgeting (sized for v7x's 64 MiB per-TC VMEM)
    itemsize = jnp.dtype(x.dtype).itemsize
    w_bytes = 2 * sum(int(a.size) * jnp.dtype(a.dtype).itemsize
                      for a in flat_w + [gamma, beta])

    def vmem_footprint(tc):
        pipe = 2 * tc * Bs * D * itemsize + 2 * tc * Bs * H2p * itemsize
        scratch = 4 * (2 * (2 * Bs * H1p + 2 * Bs * H2p)      # h/c state
                       + tc * Bs * (H1p + H2p)                # activations
                       + tc * Bs * 4 * (H1p + H2p))           # hoisted gates
        return pipe + scratch + w_bytes

    Tc = max(1, min(T, t_chunk_max))
    while Tc > 1 and vmem_footprint(Tc) > vmem_budget_bytes:
        Tc //= 2
    nT = int(pl.cdiv(T, Tc))
    T_pad = nT * Tc
    unroll = Tc if Tc <= 8 else 8                     # bounded unroll

    # ---- time-major, padded input (padding is at the *end* of time: harmless)
    x_tm = jnp.transpose(x, (1, 0, 2))
    x_tm = jnp.pad(x_tm, ((0, T_pad - T), (0, B_pad - B), (0, 0)))

    kernel = _build_encoder_kernel(Tc, Bs, H1p, H2p, H2, layer_norm_flag, unroll)

    def resident(arr):
        return pl.BlockSpec(arr.shape, lambda s, t: (0, 0))   # stays in VMEM

    out = pl.pallas_call(
        kernel,
        out_shape=jax.ShapeDtypeStruct((T_pad, B_pad, H2p), x.dtype),
        grid=(b_shards, nT),
        in_specs=[pl.BlockSpec((Tc, Bs, D), lambda s, t: (t, s, 0))]
                 + [resident(w) for w in flat_w]
                 + [resident(gamma), resident(beta)],
        out_specs=pl.BlockSpec((Tc, Bs, H2p), lambda s, t: (t, s, 0)),
        scratch_shapes=[
            pltpu.VMEM((2, Bs, H1p), jnp.float32),            # h/c layer 1
            pltpu.VMEM((2, Bs, H1p), jnp.float32),            # h/c layer 2
            pltpu.VMEM((2, Bs, H2p), jnp.float32),            # h/c layer 3
            pltpu.VMEM((2, Bs, H2p), jnp.float32),            # h/c layer 4
            pltpu.VMEM((Tc, Bs, H1p), jnp.float32),           # acts (lstm1)
            pltpu.VMEM((Tc, Bs, H2p), jnp.float32),           # acts (lstm2)
            pltpu.VMEM((Tc, Bs, 4 * H1p), jnp.float32),       # hoisted gates 1
            pltpu.VMEM((Tc, Bs, 4 * H2p), jnp.float32),       # hoisted gates 2
        ],
        compiler_params=pltpu.CompilerParams(
            dimension_semantics=("parallel", "arbitrary"),
            vmem_limit_bytes=int(min(56 << 20,
                                     max(2 * vmem_footprint(Tc), 16 << 20))),
        ),
    )(x_tm, *flat_w, gamma, beta)

    y = out[:T, :B, :H2]
    return jnp.transpose(y, (1, 0, 2))


# ----------------------------------------------------------------------------
# Parameters: raw PyTorch-layout init + padded/packed kernel layout
# ----------------------------------------------------------------------------

def init_encoder_params(key, input_dim, hidden_dim1, hidden_dim2):
    """Raw PyTorch-shaped params: per layer (w_ih (4H,Din), w_hh (4H,H), b_ih, b_hh)."""
    def make_stack(key, d_in, H):
        layers = []
        bound = 1.0 / float(H) ** 0.5
        for l in range(2):
            d = d_in if l == 0 else H
            key, k1, k2, k3, k4 = jax.random.split(key, 5)
            wih = jax.random.uniform(k1, (4 * H, d), jnp.float32, -bound, bound)
            whh = jax.random.uniform(k2, (4 * H, H), jnp.float32, -bound, bound)
            bih = jax.random.uniform(k3, (4 * H,), jnp.float32, -bound, bound)
            bhh = jax.random.uniform(k4, (4 * H,), jnp.float32, -bound, bound)
            layers.append((wih, whh, bih, bhh))
        return key, layers

    key, l1 = make_stack(key, input_dim, hidden_dim1)
    key, l2 = make_stack(key, hidden_dim1, hidden_dim2)
    return {"lstm1": l1, "lstm2": l2,
            "gamma": jnp.ones((hidden_dim2,), jnp.float32),
            "beta": jnp.zeros((hidden_dim2,), jnp.float32)}


def _pack_lstm_layer(wih, whh, bih, bhh, d_in_pad, Hp):
    """Pad each gate to a lane-aligned Hp block, pad input dim, transpose."""
    fourH, d_in = wih.shape
    H = fourH // 4

    def pad_gate_rows(w):                              # (4H, K) -> (4Hp, K)
        K = w.shape[1]
        return (jnp.zeros((4, Hp, K), w.dtype)
                .at[:, :H, :].set(w.reshape(4, H, K)).reshape(4 * Hp, K))

    def pad_cols(w, kp):                               # (G, K) -> (G, kp)
        return jnp.zeros((w.shape[0], kp), w.dtype).at[:, :w.shape[1]].set(w)

    wih_t = pad_cols(pad_gate_rows(wih), d_in_pad).T   # (d_in_pad, 4Hp)
    whh_t = pad_cols(pad_gate_rows(whh), Hp).T         # (Hp, 4Hp)
    b = bih + bhh
    b_p = (jnp.zeros((4, Hp), b.dtype).at[:, :H].set(b.reshape(4, H))
           .reshape(1, 4 * Hp))
    return wih_t, whh_t, b_p


def pack_encoder_params(raw):
    H1 = raw["lstm1"][0][1].shape[1]
    H2 = raw["lstm2"][0][1].shape[1]
    D = raw["lstm1"][0][0].shape[1]
    H1p, H2p = _round_up(H1, 128), _round_up(H2, 128)
    layers_raw = raw["lstm1"] + raw["lstm2"]
    in_pads = [D, H1p, H1p, H2p]
    hps = [H1p, H1p, H2p, H2p]
    layers = [_pack_lstm_layer(*layers_raw[k], d_in_pad=in_pads[k], Hp=hps[k])
              for k in range(4)]
    gamma = jnp.zeros((1, H2p), jnp.float32).at[0, :H2].set(raw["gamma"])
    beta = jnp.zeros((1, H2p), jnp.float32).at[0, :H2].set(raw["beta"])
    return {"H1": H1, "H2": H2, "H1p": H1p, "H2p": H2p,
            "layers": layers, "gamma": gamma, "beta": beta}


# ----------------------------------------------------------------------------
# Pure-JAX reference (uses raw PyTorch-layout weights; independent of packing)
# ----------------------------------------------------------------------------

def _lstm_stack_ref(x_tm, layers):
    for (wih, whh, bih, bhh) in layers:
        H = whh.shape[1]
        b = bih + bhh

        def step(carry, x_t, wih=wih, whh=whh, b=b, H=H):
            h, c = carry
            gates = x_t @ wih.T + h @ whh.T + b
            i = jax.nn.sigmoid(gates[:, 0 * H:1 * H])
            f = jax.nn.sigmoid(gates[:, 1 * H:2 * H])
            g = jnp.tanh(gates[:, 2 * H:3 * H])
            o = jax.nn.sigmoid(gates[:, 3 * H:4 * H])
            c = f * c + i * g
            h = o * jnp.tanh(c)
            return (h, c), h

        B = x_tm.shape[1]
        init = (jnp.zeros((B, H), jnp.float32), jnp.zeros((B, H), jnp.float32))
        _, x_tm = lax.scan(step, init, x_tm)
    return x_tm


def encoder_forward_ref(x, raw, layer_norm_flag=True):
    x_tm = jnp.transpose(x, (1, 0, 2))
    x_tm = _lstm_stack_ref(x_tm, raw["lstm1"])
    x_tm = _lstm_stack_ref(x_tm, raw["lstm2"])
    y = jnp.transpose(x_tm, (1, 0, 2))
    if layer_norm_flag:
        mean = jnp.mean(y, axis=-1, keepdims=True)
        var = jnp.mean(jnp.square(y - mean), axis=-1, keepdims=True)
        y = (y - mean) * lax.rsqrt(var + 1e-5) * raw["gamma"] + raw["beta"]
    return y


# ----------------------------------------------------------------------------

if __name__ == "__main__":
    B, T = 2, 8
    input_dim, hidden_dim1, hidden_dim2 = 16, 32, 16
    layer_norm_flag = True

    key = jax.random.PRNGKey(0)
    key, kx = jax.random.split(key)
    x = jax.random.normal(kx, (B, T, input_dim), jnp.float32)

    raw = init_encoder_params(key, input_dim, hidden_dim1, hidden_dim2)
    packed = pack_encoder_params(raw)

    # t_chunk_max=4 -> 2 time chunks: exercises the grid pipeline and the
    # persistent h/c state carry across grid steps.
    out = encoder_forward(x, packed, layer_norm_flag, t_chunk_max=4)
    out = jax.block_until_ready(out)

    ref = encoder_forward_ref(x, raw, layer_norm_flag)
    assert out.shape == (B, T, hidden_dim2), out.shape
    assert jnp.allclose(out, ref, atol=1e-4, rtol=1e-4), (
        "mismatch vs pure-JAX reference")

    print("KERNEL_OK")
</pallas_src>

<mosaic_0001>
module attributes {stable_mosaic.version = 11 : i64} {
  func.func @kernel(%arg0: i32, %arg1: i32, %arg2: memref<4x8x16xf32, #tpu.memory_space<vmem>>, %arg3: memref<16x512xf32, #tpu.memory_space<vmem>>, %arg4: memref<128x512xf32, #tpu.memory_space<vmem>>, %arg5: memref<1x512xf32, #tpu.memory_space<vmem>>, %arg6: memref<128x512xf32, #tpu.memory_space<vmem>>, %arg7: memref<128x512xf32, #tpu.memory_space<vmem>>, %arg8: memref<1x512xf32, #tpu.memory_space<vmem>>, %arg9: memref<128x512xf32, #tpu.memory_space<vmem>>, %arg10: memref<128x512xf32, #tpu.memory_space<vmem>>, %arg11: memref<1x512xf32, #tpu.memory_space<vmem>>, %arg12: memref<128x512xf32, #tpu.memory_space<vmem>>, %arg13: memref<128x512xf32, #tpu.memory_space<vmem>>, %arg14: memref<1x512xf32, #tpu.memory_space<vmem>>, %arg15: memref<1x128xf32, #tpu.memory_space<vmem>>, %arg16: memref<1x128xf32, #tpu.memory_space<vmem>>, %arg17: memref<4x8x128xf32, #tpu.memory_space<vmem>>, %arg18: memref<2x8x128xf32, #tpu.memory_space<vmem>>, %arg19: memref<2x8x128xf32, #tpu.memory_space<vmem>>, %arg20: memref<2x8x128xf32, #tpu.memory_space<vmem>>, %arg21: memref<2x8x128xf32, #tpu.memory_space<vmem>>, %arg22: memref<4x8x128xf32, #tpu.memory_space<vmem>>, %arg23: memref<4x8x128xf32, #tpu.memory_space<vmem>>, %arg24: memref<4x8x512xf32, #tpu.memory_space<vmem>>, %arg25: memref<4x8x512xf32, #tpu.memory_space<vmem>>) attributes {dimension_semantics = [#tpu.dimension_semantics<parallel>, #tpu.dimension_semantics<arbitrary>], iteration_bounds = array<i64: 1, 2>, scalar_prefetch = 0 : i64, scratch_operands = 8 : i64, tpu.core_type = #tpu.core_type<tc>, window_params = [{transform_indices = @transform_0, window_bounds = array<i64: 4, 8, 16>}, {pipeline_mode = #tpu.pipeline_mode<synchronous>, transform_indices = @transform_1, window_bounds = array<i64: 16, 512>}, {pipeline_mode = #tpu.pipeline_mode<synchronous>, transform_indices = @transform_2, window_bounds = array<i64: 128, 512>}, {pipeline_mode = #tpu.pipeline_mode<synchronous>, transform_indices = @transform_3, window_bounds = array<i64: 1, 512>}, {pipeline_mode = #tpu.pipeline_mode<synchronous>, transform_indices = @transform_4, window_bounds = array<i64: 128, 512>}, {pipeline_mode = #tpu.pipeline_mode<synchronous>, transform_indices = @transform_5, window_bounds = array<i64: 128, 512>}, {pipeline_mode = #tpu.pipeline_mode<synchronous>, transform_indices = @transform_6, window_bounds = array<i64: 1, 512>}, {pipeline_mode = #tpu.pipeline_mode<synchronous>, transform_indices = @transform_7, window_bounds = array<i64: 128, 512>}, {pipeline_mode = #tpu.pipeline_mode<synchronous>, transform_indices = @transform_8, window_bounds = array<i64: 128, 512>}, {pipeline_mode = #tpu.pipeline_mode<synchronous>, transform_indices = @transform_9, window_bounds = array<i64: 1, 512>}, {pipeline_mode = #tpu.pipeline_mode<synchronous>, transform_indices = @transform_10, window_bounds = array<i64: 128, 512>}, {pipeline_mode = #tpu.pipeline_mode<synchronous>, transform_indices = @transform_11, window_bounds = array<i64: 128, 512>}, {pipeline_mode = #tpu.pipeline_mode<synchronous>, transform_indices = @transform_12, window_bounds = array<i64: 1, 512>}, {pipeline_mode = #tpu.pipeline_mode<synchronous>, transform_indices = @transform_13, window_bounds = array<i64: 1, 128>}, {pipeline_mode = #tpu.pipeline_mode<synchronous>, transform_indices = @transform_14, window_bounds = array<i64: 1, 128>}, {transform_indices = @transform_15, window_bounds = array<i64: 4, 8, 128>}]} {
    %c0_i32 = arith.constant 0 : i32
    %0 = arith.cmpi eq, %arg1, %c0_i32 : i32
    %1 = arith.extui %0 : i1 to i32
    %c0_i32_0 = arith.constant 0 : i32
    %2 = arith.cmpi ne, %1, %c0_i32_0 : i32
    scf.if %2 {
      %cst_401 = arith.constant 0.000000e+00 : f32
      %782 = vector.broadcast %cst_401 : f32 to vector<2x8x128xf32>
      %c0_402 = arith.constant 0 : index
      %c0_403 = arith.constant 0 : index
      %c0_404 = arith.constant 0 : index
      %783 = vector.load %arg18[%c0_402, %c0_403, %c0_404] : memref<2x8x128xf32, #tpu.memory_space<vmem>>, vector<2x8x128xf32>
      tpu.vector_store %arg18[%c0_402, %c0_403, %c0_404], %782 {strides = array<i32>} : memref<2x8x128xf32, #tpu.memory_space<vmem>>, vector<2x8x128xf32>,
      %cst_405 = arith.constant 0.000000e+00 : f32
      %784 = vector.broadcast %cst_405 : f32 to vector<2x8x128xf32>
      %c0_406 = arith.constant 0 : index
      %c0_407 = arith.constant 0 : index
      %c0_408 = arith.constant 0 : index
      %785 = vector.load %arg19[%c0_406, %c0_407, %c0_408] : memref<2x8x128xf32, #tpu.memory_space<vmem>>, vector<2x8x128xf32>
      tpu.vector_store %arg19[%c0_406, %c0_407, %c0_408], %784 {strides = array<i32>} : memref<2x8x128xf32, #tpu.memory_space<vmem>>, vector<2x8x128xf32>,
      %cst_409 = arith.constant 0.000000e+00 : f32
      %786 = vector.broadcast %cst_409 : f32 to vector<2x8x128xf32>
      %c0_410 = arith.constant 0 : index
      %c0_411 = arith.constant 0 : index
      %c0_412 = arith.constant 0 : index
      %787 = vector.load %arg20[%c0_410, %c0_411, %c0_412] : memref<2x8x128xf32, #tpu.memory_space<vmem>>, vector<2x8x128xf32>
      tpu.vector_store %arg20[%c0_410, %c0_411, %c0_412], %786 {strides = array<i32>} : memref<2x8x128xf32, #tpu.memory_space<vmem>>, vector<2x8x128xf32>,
      %cst_413 = arith.constant 0.000000e+00 : f32
      %788 = vector.broadcast %cst_413 : f32 to vector<2x8x128xf32>
      %c0_414 = arith.constant 0 : index
      %c0_415 = arith.constant 0 : index
      %c0_416 = arith.constant 0 : index
      %789 = vector.load %arg21[%c0_414, %c0_415, %c0_416] : memref<2x8x128xf32, #tpu.memory_space<vmem>>, vector<2x8x128xf32>
      tpu.vector_store %arg21[%c0_414, %c0_415, %c0_416], %788 {strides = array<i32>} : memref<2x8x128xf32, #tpu.memory_space<vmem>>, vector<2x8x128xf32>,
    } else {
    }
    %c0 = arith.constant 0 : index
    %c0_1 = arith.constant 0 : index
    %c0_2 = arith.constant 0 : index
    %3 = vector.load %arg2[%c0, %c0_1, %c0_2] : memref<4x8x16xf32, #tpu.memory_space<vmem>>, vector<4x8x16xf32>
    %4 = vector.shape_cast %3 : vector<4x8x16xf32> to vector<32x16xf32>
    %c0_3 = arith.constant 0 : index
    %c0_4 = arith.constant 0 : index
    %5 = vector.load %arg3[%c0_3, %c0_4] : memref<16x512xf32, #tpu.memory_space<vmem>>, vector<16x512xf32>
    %cst = arith.constant dense<0.000000e+00> : vector<32x512xf32>
    %6 = tpu.matmul %4, %5, %cst {dimension_numbers = #tpu.dot_dimension_numbers<[1], [0], [0], [1], [0, 0, 1, 1], [], []>} : vector<32x16xf32>, vector<16x512xf32>, vector<32x512xf32> -> vector<32x512xf32>
    %c0_5 = arith.constant 0 : index
    %c0_6 = arith.constant 0 : index
    %7 = vector.load %arg5[%c0_5, %c0_6] : memref<1x512xf32, #tpu.memory_space<vmem>>, vector<1x512xf32>
    %8 = vector.broadcast %7 : vector<1x512xf32> to vector<32x512xf32>
    %9 = arith.addf %6, %8 : vector<32x512xf32>
    %10 = vector.shape_cast %9 : vector<32x512xf32> to vector<4x8x512xf32>
    %c0_7 = arith.constant 0 : index
    %c0_8 = arith.constant 0 : index
    %c0_9 = arith.constant 0 : index
    %11 = vector.load %arg24[%c0_7, %c0_8, %c0_9] : memref<4x8x512xf32, #tpu.memory_space<vmem>>, vector<4x8x512xf32>
    tpu.vector_store %arg24[%c0_7, %c0_8, %c0_9], %10 {strides = array<i32>} : memref<4x8x512xf32, #tpu.memory_space<vmem>>, vector<4x8x512xf32>,
    %c0_10 = arith.constant 0 : index
    %c0_11 = arith.constant 0 : index
    %12 = vector.load %arg4[%c0_10, %c0_11] : memref<128x512xf32, #tpu.memory_space<vmem>>, vector<128x512xf32>
    %c0_i32_12 = arith.constant 0 : i32
    %c0_13 = arith.constant 0 : index
    %c0_14 = arith.constant 0 : index
    %c0_15 = arith.constant 0 : index
    %13 = vector.load %arg18[%c0_13, %c0_14, %c0_15] : memref<2x8x128xf32, #tpu.memory_space<vmem>>, vector<1x8x128xf32>
    %14 = vector.shape_cast %13 : vector<1x8x128xf32> to vector<8x128xf32>
    %c1 = arith.constant 1 : index
    %c0_16 = arith.constant 0 : index
    %c0_17 = arith.constant 0 : index
    %15 = vector.load %arg18[%c1, %c0_16, %c0_17] : memref<2x8x128xf32, #tpu.memory_space<vmem>>, vector<1x8x128xf32>
    %16 = vector.shape_cast %15 : vector<1x8x128xf32> to vector<8x128xf32>
    %17 = arith.index_cast %c0_i32_12 : i32 to index
    %c0_18 = arith.constant 0 : index
    %c0_19 = arith.constant 0 : index
    %18 = vector.load %arg24[%17, %c0_18, %c0_19] : memref<4x8x512xf32, #tpu.memory_space<vmem>>, vector<1x8x512xf32>
    %19 = vector.shape_cast %18 : vector<1x8x512xf32> to vector<8x512xf32>
    %cst_20 = arith.constant dense<0.000000e+00> : vector<8x512xf32>
    %20 = tpu.matmul %14, %12, %cst_20 {dimension_numbers = #tpu.dot_dimension_numbers<[1], [0], [0], [1], [0, 0, 1, 1], [], []>} : vector<8x128xf32>, vector<128x512xf32>, vector<8x512xf32> -> vector<8x512xf32>
    %21 = arith.addf %19, %20 : vector<8x512xf32>
    %22 = vector.extract_strided_slice %21 {offsets = [0, 0], sizes = [8, 128], strides = [1, 1]} : vector<8x512xf32> to vector<8x128xf32>
    %23 = arith.negf %22 : vector<8x128xf32>
    %24 = math.exp %23 : vector<8x128xf32>
    %cst_21 = arith.constant 1.000000e+00 : f32
    %25 = vector.broadcast %cst_21 : f32 to vector<8x128xf32>
    %26 = arith.addf %25, %24 : vector<8x128xf32>
    %27 = arith.divf %25, %26 : vector<8x128xf32>
    %28 = vector.extract_strided_slice %21 {offsets = [0, 128], sizes = [8, 128], strides = [1, 1]} : vector<8x512xf32> to vector<8x128xf32>
    %29 = arith.negf %28 : vector<8x128xf32>
    %30 = math.exp %29 : vector<8x128xf32>
    %cst_22 = arith.constant 1.000000e+00 : f32
    %31 = vector.broadcast %cst_22 : f32 to vector<8x128xf32>
    %32 = arith.addf %31, %30 : vector<8x128xf32>
    %33 = arith.divf %31, %32 : vector<8x128xf32>
    %34 = vector.extract_strided_slice %21 {offsets = [0, 256], sizes = [8, 128], strides = [1, 1]} : vector<8x512xf32> to vector<8x128xf32>
    %35 = math.tanh %34 : vector<8x128xf32>
    %36 = vector.extract_strided_slice %21 {offsets = [0, 384], sizes = [8, 128], strides = [1, 1]} : vector<8x512xf32> to vector<8x128xf32>
    %37 = arith.negf %36 : vector<8x128xf32>
    %38 = math.exp %37 : vector<8x128xf32>
    %cst_23 = arith.constant 1.000000e+00 : f32
    %39 = vector.broadcast %cst_23 : f32 to vector<8x128xf32>
    %40 = arith.addf %39, %38 : vector<8x128xf32>
    %41 = arith.divf %39, %40 : vector<8x128xf32>
    %42 = arith.mulf %33, %16 : vector<8x128xf32>
    %43 = arith.mulf %27, %35 : vector<8x128xf32>
    %44 = arith.addf %42, %43 : vector<8x128xf32>
    %45 = math.tanh %44 : vector<8x128xf32>
    %46 = arith.mulf %41, %45 : vector<8x128xf32>
    %c0_24 = arith.constant 0 : index
    %c0_25 = arith.constant 0 : index
    %c0_26 = arith.constant 0 : index
    %47 = vector.load %arg18[%c0_24, %c0_25, %c0_26] : memref<2x8x128xf32, #tpu.memory_space<vmem>>, vector<1x8x128xf32>
    %48 = vector.shape_cast %47 : vector<1x8x128xf32> to vector<8x128xf32>
    %49 = vector.shape_cast %46 : vector<8x128xf32> to vector<1x8x128xf32>
    tpu.vector_store %arg18[%c0_24, %c0_25, %c0_26], %49 {strides = array<i32>} : memref<2x8x128xf32, #tpu.memory_space<vmem>>, vector<1x8x128xf32>,
    %c1_27 = arith.constant 1 : index
    %c0_28 = arith.constant 0 : index
    %c0_29 = arith.constant 0 : index
    %50 = vector.load %arg18[%c1_27, %c0_28, %c0_29] : memref<2x8x128xf32, #tpu.memory_space<vmem>>, vector<1x8x128xf32>
    %51 = vector.shape_cast %50 : vector<1x8x128xf32> to vector<8x128xf32>
    %52 = vector.shape_cast %44 : vector<8x128xf32> to vector<1x8x128xf32>
    tpu.vector_store %arg18[%c1_27, %c0_28, %c0_29], %52 {strides = array<i32>} : memref<2x8x128xf32, #tpu.memory_space<vmem>>, vector<1x8x128xf32>,
    %53 = arith.index_cast %c0_i32_12 : i32 to index
    %c0_30 = arith.constant 0 : index
    %c0_31 = arith.constant 0 : index
    %54 = vector.load %arg22[%53, %c0_30, %c0_31] : memref<4x8x128xf32, #tpu.memory_space<vmem>>, vector<1x8x128xf32>
    %55 = vector.shape_cast %54 : vector<1x8x128xf32> to vector<8x128xf32>
    %56 = vector.shape_cast %46 : vector<8x128xf32> to vector<1x8x128xf32>
    tpu.vector_store %arg22[%53, %c0_30, %c0_31], %56 {strides = array<i32>} : memref<4x8x128xf32, #tpu.memory_space<vmem>>, vector<1x8x128xf32>,
    %c1_i32 = arith.constant 1 : i32
    %c0_32 = arith.constant 0 : index
    %c0_33 = arith.constant 0 : index
    %c0_34 = arith.constant 0 : index
    %57 = vector.load %arg18[%c0_32, %c0_33, %c0_34] : memref<2x8x128xf32, #tpu.memory_space<vmem>>, vector<1x8x128xf32>
    %58 = vector.shape_cast %57 : vector<1x8x128xf32> to vector<8x128xf32>
    %c1_35 = arith.constant 1 : index
    %c0_36 = arith.constant 0 : index
    %c0_37 = arith.constant 0 : index
    %59 = vector.load %arg18[%c1_35, %c0_36, %c0_37] : memref<2x8x128xf32, #tpu.memory_space<vmem>>, vector<1x8x128xf32>
    %60 = vector.shape_cast %59 : vector<1x8x128xf32> to vector<8x128xf32>
    %61 = arith.index_cast %c1_i32 : i32 to index
    %c0_38 = arith.constant 0 : index
    %c0_39 = arith.constant 0 : index
    %62 = vector.load %arg24[%61, %c0_38, %c0_39] : memref<4x8x512xf32, #tpu.memory_space<vmem>>, vector<1x8x512xf32>
    %63 = vector.shape_cast %62 : vector<1x8x512xf32> to vector<8x512xf32>
    %cst_40 = arith.constant dense<0.000000e+00> : vector<8x512xf32>
    %64 = tpu.matmul %58, %12, %cst_40 {dimension_numbers = #tpu.dot_dimension_numbers<[1], [0], [0], [1], [0, 0, 1, 1], [], []>} : vector<8x128xf32>, vector<128x512xf32>, vector<8x512xf32> -> vector<8x512xf32>
    %65 = arith.addf %63, %64 : vector<8x512xf32>
    %66 = vector.extract_strided_slice %65 {offsets = [0, 0], sizes = [8, 128], strides = [1, 1]} : vector<8x512xf32> to vector<8x128xf32>
    %67 = arith.negf %66 : vector<8x128xf32>
    %68 = math.exp %67 : vector<8x128xf32>
    %cst_41 = arith.constant 1.000000e+00 : f32
    %69 = vector.broadcast %cst_41 : f32 to vector<8x128xf32>
    %70 = arith.addf %69, %68 : vector<8x128xf32>
    %71 = arith.divf %69, %70 : vector<8x128xf32>
    %72 = vector.extract_strided_slice %65 {offsets = [0, 128], sizes = [8, 128], strides = [1, 1]} : vector<8x512xf32> to vector<8x128xf32>
    %73 = arith.negf %72 : vector<8x128xf32>
    %74 = math.exp %73 : vector<8x128xf32>
    %cst_42 = arith.constant 1.000000e+00 : f32
    %75 = vector.broadcast %cst_42 : f32 to vector<8x128xf32>
    %76 = arith.addf %75, %74 : vector<8x128xf32>
    %77 = arith.divf %75, %76 : vector<8x128xf32>
    %78 = vector.extract_strided_slice %65 {offsets = [0, 256], sizes = [8, 128], strides = [1, 1]} : vector<8x512xf32> to vector<8x128xf32>
    %79 = math.tanh %78 : vector<8x128xf32>
    %80 = vector.extract_strided_slice %65 {offsets = [0, 384], sizes = [8, 128], strides = [1, 1]} : vector<8x512xf32> to vector<8x128xf32>
    %81 = arith.negf %80 : vector<8x128xf32>
    %82 = math.exp %81 : vector<8x128xf32>
    %cst_43 = arith.constant 1.000000e+00 : f32
    %83 = vector.broadcast %cst_43 : f32 to vector<8x128xf32>
    %84 = arith.addf %83, %82 : vector<8x128xf32>
    %85 = arith.divf %83, %84 : vector<8x128xf32>
    %86 = arith.mulf %77, %60 : vector<8x128xf32>
    %87 = arith.mulf %71, %79 : vector<8x128xf32>
    %88 = arith.addf %86, %87 : vector<8x128xf32>
    %89 = math.tanh %88 : vector<8x128xf32>
    %90 = arith.mulf %85, %89 : vector<8x128xf32>
    %c0_44 = arith.constant 0 : index
    %c0_45 = arith.constant 0 : index
    %c0_46 = arith.constant 0 : index
    %91 = vector.load %arg18[%c0_44, %c0_45, %c0_46] : memref<2x8x128xf32, #tpu.memory_space<vmem>>, vector<1x8x128xf32>
    %92 = vector.shape_cast %91 : vector<1x8x128xf32> to vector<8x128xf32>
    %93 = vector.shape_cast %90 : vector<8x128xf32> to vector<1x8x128xf32>
    tpu.vector_store %arg18[%c0_44, %c0_45, %c0_46], %93 {strides = array<i32>} : memref<2x8x128xf32, #tpu.memory_space<vmem>>, vector<1x8x128xf32>,
    %c1_47 = arith.constant 1 : index
    %c0_48 = arith.constant 0 : index
    %c0_49 = arith.constant 0 : index
    %94 = vector.load %arg18[%c1_47, %c0_48, %c0_49] : memref<2x8x128xf32, #tpu.memory_space<vmem>>, vector<1x8x128xf32>
    %95 = vector.shape_cast %94 : vector<1x8x128xf32> to vector<8x128xf32>
    %96 = vector.shape_cast %88 : vector<8x128xf32> to vector<1x8x128xf32>
    tpu.vector_store %arg18[%c1_47, %c0_48, %c0_49], %96 {strides = array<i32>} : memref<2x8x128xf32, #tpu.memory_space<vmem>>, vector<1x8x128xf32>,
    %97 = arith.index_cast %c1_i32 : i32 to index
    %c0_50 = arith.constant 0 : index
    %c0_51 = arith.constant 0 : index
    %98 = vector.load %arg22[%97, %c0_50, %c0_51] : memref<4x8x128xf32, #tpu.memory_space<vmem>>, vector<1x8x128xf32>
    %99 = vector.shape_cast %98 : vector<1x8x128xf32> to vector<8x128xf32>
    %100 = vector.shape_cast %90 : vector<8x128xf32> to vector<1x8x128xf32>
    tpu.vector_store %arg22[%97, %c0_50, %c0_51], %100 {strides = array<i32>} : memref<4x8x128xf32, #tpu.memory_space<vmem>>, vector<1x8x128xf32>,
    %c2_i32 = arith.constant 2 : i32
    %c0_52 = arith.constant 0 : index
    %c0_53 = arith.constant 0 : index
    %c0_54 = arith.constant 0 : index
    %101 = vector.load %arg18[%c0_52, %c0_53, %c0_54] : memref<2x8x128xf32, #tpu.memory_space<vmem>>, vector<1x8x128xf32>
    %102 = vector.shape_cast %101 : vector<1x8x128xf32> to vector<8x128xf32>
    %c1_55 = arith.constant 1 : index
    %c0_56 = arith.constant 0 : index
    %c0_57 = arith.constant 0 : index
    %103 = vector.load %arg18[%c1_55, %c0_56, %c0_57] : memref<2x8x128xf32, #tpu.memory_space<vmem>>, vector<1x8x128xf32>
    %104 = vector.shape_cast %103 : vector<1x8x128xf32> to vector<8x128xf32>
    %105 = arith.index_cast %c2_i32 : i32 to index
    %c0_58 = arith.constant 0 : index
    %c0_59 = arith.constant 0 : index
    %106 = vector.load %arg24[%105, %c0_58, %c0_59] : memref<4x8x512xf32, #tpu.memory_space<vmem>>, vector<1x8x512xf32>
    %107 = vector.shape_cast %106 : vector<1x8x512xf32> to vector<8x512xf32>
    %cst_60 = arith.constant dense<0.000000e+00> : vector<8x512xf32>
    %108 = tpu.matmul %102, %12, %cst_60 {dimension_numbers = #tpu.dot_dimension_numbers<[1], [0], [0], [1], [0, 0, 1, 1], [], []>} : vector<8x128xf32>, vector<128x512xf32>, vector<8x512xf32> -> vector<8x512xf32>
    %109 = arith.addf %107, %108 : vector<8x512xf32>
    %110 = vector.extract_strided_slice %109 {offsets = [0, 0], sizes = [8, 128], strides = [1, 1]} : vector<8x512xf32> to vector<8x128xf32>
    %111 = arith.negf %110 : vector<8x128xf32>
    %112 = math.exp %111 : vector<8x128xf32>
    %cst_61 = arith.constant 1.000000e+00 : f32
    %113 = vector.broadcast %cst_61 : f32 to vector<8x128xf32>
    %114 = arith.addf %113, %112 : vector<8x128xf32>
    %115 = arith.divf %113, %114 : vector<8x128xf32>
    %116 = vector.extract_strided_slice %109 {offsets = [0, 128], sizes = [8, 128], strides = [1, 1]} : vector<8x512xf32> to vector<8x128xf32>
    %117 = arith.negf %116 : vector<8x128xf32>
    %118 = math.exp %117 : vector<8x128xf32>
    %cst_62 = arith.constant 1.000000e+00 : f32
    %119 = vector.broadcast %cst_62 : f32 to vector<8x128xf32>
    %120 = arith.addf %119, %118 : vector<8x128xf32>
    %121 = arith.divf %119, %120 : vector<8x128xf32>
    %122 = vector.extract_strided_slice %109 {offsets = [0, 256], sizes = [8, 128], strides = [1, 1]} : vector<8x512xf32> to vector<8x128xf32>
    %123 = math.tanh %122 : vector<8x128xf32>
    %124 = vector.extract_strided_slice %109 {offsets = [0, 384], sizes = [8, 128], strides = [1, 1]} : vector<8x512xf32> to vector<8x128xf32>
    %125 = arith.negf %124 : vector<8x128xf32>
    %126 = math.exp %125 : vector<8x128xf32>
    %cst_63 = arith.constant 1.000000e+00 : f32
    %127 = vector.broadcast %cst_63 : f32 to vector<8x128xf32>
    %128 = arith.addf %127, %126 : vector<8x128xf32>
    %129 = arith.divf %127, %128 : vector<8x128xf32>
    %130 = arith.mulf %121, %104 : vector<8x128xf32>
    %131 = arith.mulf %115, %123 : vector<8x128xf32>
    %132 = arith.addf %130, %131 : vector<8x128xf32>
    %133 = math.tanh %132 : vector<8x128xf32>
    %134 = arith.mulf %129, %133 : vector<8x128xf32>
    %c0_64 = arith.constant 0 : index
    %c0_65 = arith.constant 0 : index
    %c0_66 = arith.constant 0 : index
    %135 = vector.load %arg18[%c0_64, %c0_65, %c0_66] : memref<2x8x128xf32, #tpu.memory_space<vmem>>, vector<1x8x128xf32>
    %136 = vector.shape_cast %135 : vector<1x8x128xf32> to vector<8x128xf32>
    %137 = vector.shape_cast %134 : vector<8x128xf32> to vector<1x8x128xf32>
    tpu.vector_store %arg18[%c0_64, %c0_65, %c0_66], %137 {strides = array<i32>} : memref<2x8x128xf32, #tpu.memory_space<vmem>>, vector<1x8x128xf32>,
    %c1_67 = arith.constant 1 : index
    %c0_68 = arith.constant 0 : index
    %c0_69 = arith.constant 0 : index
    %138 = vector.load %arg18[%c1_67, %c0_68, %c0_69] : memref<2x8x128xf32, #tpu.memory_space<vmem>>, vector<1x8x128xf32>
    %139 = vector.shape_cast %138 : vector<1x8x128xf32> to vector<8x128xf32>
    %140 = vector.shape_cast %132 : vector<8x128xf32> to vector<1x8x128xf32>
    tpu.vector_store %arg18[%c1_67, %c0_68, %c0_69], %140 {strides = array<i32>} : memref<2x8x128xf32, #tpu.memory_space<vmem>>, vector<1x8x128xf32>,
    %141 = arith.index_cast %c2_i32 : i32 to index
    %c0_70 = arith.constant 0 : index
    %c0_71 = arith.constant 0 : index
    %142 = vector.load %arg22[%141, %c0_70, %c0_71] : memref<4x8x128xf32, #tpu.memory_space<vmem>>, vector<1x8x128xf32>
    %143 = vector.shape_cast %142 : vector<1x8x128xf32> to vector<8x128xf32>
    %144 = vector.shape_cast %134 : vector<8x128xf32> to vector<1x8x128xf32>
    tpu.vector_store %arg22[%141, %c0_70, %c0_71], %144 {strides = array<i32>} : memref<4x8x128xf32, #tpu.memory_space<vmem>>, vector<1x8x128xf32>,
    %c3_i32 = arith.constant 3 : i32
    %c0_72 = arith.constant 0 : index
    %c0_73 = arith.constant 0 : index
    %c0_74 = arith.constant 0 : index
    %145 = vector.load %arg18[%c0_72, %c0_73, %c0_74] : memref<2x8x128xf32, #tpu.memory_space<vmem>>, vector<1x8x128xf32>
    %146 = vector.shape_cast %145 : vector<1x8x128xf32> to vector<8x128xf32>
    %c1_75 = arith.constant 1 : index
    %c0_76 = arith.constant 0 : index
    %c0_77 = arith.constant 0 : index
    %147 = vector.load %arg18[%c1_75, %c0_76, %c0_77] : memref<2x8x128xf32, #tpu.memory_space<vmem>>, vector<1x8x128xf32>
    %148 = vector.shape_cast %147 : vector<1x8x128xf32> to vector<8x128xf32>
    %149 = arith.index_cast %c3_i32 : i32 to index
    %c0_78 = arith.constant 0 : index
    %c0_79 = arith.constant 0 : index
    %150 = vector.load %arg24[%149, %c0_78, %c0_79] : memref<4x8x512xf32, #tpu.memory_space<vmem>>, vector<1x8x512xf32>
    %151 = vector.shape_cast %150 : vector<1x8x512xf32> to vector<8x512xf32>
    %cst_80 = arith.constant dense<0.000000e+00> : vector<8x512xf32>
    %152 = tpu.matmul %146, %12, %cst_80 {dimension_numbers = #tpu.dot_dimension_numbers<[1], [0], [0], [1], [0, 0, 1, 1], [], []>} : vector<8x128xf32>, vector<128x512xf32>, vector<8x512xf32> -> vector<8x512xf32>
    %153 = arith.addf %151, %152 : vector<8x512xf32>
    %154 = vector.extract_strided_slice %153 {offsets = [0, 0], sizes = [8, 128], strides = [1, 1]} : vector<8x512xf32> to vector<8x128xf32>
    %155 = arith.negf %154 : vector<8x128xf32>
    %156 = math.exp %155 : vector<8x128xf32>
    %cst_81 = arith.constant 1.000000e+00 : f32
    %157 = vector.broadcast %cst_81 : f32 to vector<8x128xf32>
    %158 = arith.addf %157, %156 : vector<8x128xf32>
    %159 = arith.divf %157, %158 : vector<8x128xf32>
    %160 = vector.extract_strided_slice %153 {offsets = [0, 128], sizes = [8, 128], strides = [1, 1]} : vector<8x512xf32> to vector<8x128xf32>
    %161 = arith.negf %160 : vector<8x128xf32>
    %162 = math.exp %161 : vector<8x128xf32>
    %cst_82 = arith.constant 1.000000e+00 : f32
    %163 = vector.broadcast %cst_82 : f32 to vector<8x128xf32>
    %164 = arith.addf %163, %162 : vector<8x128xf32>
    %165 = arith.divf %163, %164 : vector<8x128xf32>
    %166 = vector.extract_strided_slice %153 {offsets = [0, 256], sizes = [8, 128], strides = [1, 1]} : vector<8x512xf32> to vector<8x128xf32>
    %167 = math.tanh %166 : vector<8x128xf32>
    %168 = vector.extract_strided_slice %153 {offsets = [0, 384], sizes = [8, 128], strides = [1, 1]} : vector<8x512xf32> to vector<8x128xf32>
    %169 = arith.negf %168 : vector<8x128xf32>
    %170 = math.exp %169 : vector<8x128xf32>
    %cst_83 = arith.constant 1.000000e+00 : f32
    %171 = vector.broadcast %cst_83 : f32 to vector<8x128xf32>
    %172 = arith.addf %171, %170 : vector<8x128xf32>
    %173 = arith.divf %171, %172 : vector<8x128xf32>
    %174 = arith.mulf %165, %148 : vector<8x128xf32>
    %175 = arith.mulf %159, %167 : vector<8x128xf32>
    %176 = arith.addf %174, %175 : vector<8x128xf32>
    %177 = math.tanh %176 : vector<8x128xf32>
    %178 = arith.mulf %173, %177 : vector<8x128xf32>
    %c0_84 = arith.constant 0 : index
    %c0_85 = arith.constant 0 : index
    %c0_86 = arith.constant 0 : index
    %179 = vector.load %arg18[%c0_84, %c0_85, %c0_86] : memref<2x8x128xf32, #tpu.memory_space<vmem>>, vector<1x8x128xf32>
    %180 = vector.shape_cast %179 : vector<1x8x128xf32> to vector<8x128xf32>
    %181 = vector.shape_cast %178 : vector<8x128xf32> to vector<1x8x128xf32>
    tpu.vector_store %arg18[%c0_84, %c0_85, %c0_86], %181 {strides = array<i32>} : memref<2x8x128xf32, #tpu.memory_space<vmem>>, vector<1x8x128xf32>,
    %c1_87 = arith.constant 1 : index
    %c0_88 = arith.constant 0 : index
    %c0_89 = arith.constant 0 : index
    %182 = vector.load %arg18[%c1_87, %c0_88, %c0_89] : memref<2x8x128xf32, #tpu.memory_space<vmem>>, vector<1x8x128xf32>
    %183 = vector.shape_cast %182 : vector<1x8x128xf32> to vector<8x128xf32>
    %184 = vector.shape_cast %176 : vector<8x128xf32> to vector<1x8x128xf32>
    tpu.vector_store %arg18[%c1_87, %c0_88, %c0_89], %184 {strides = array<i32>} : memref<2x8x128xf32, #tpu.memory_space<vmem>>, vector<1x8x128xf32>,
    %185 = arith.index_cast %c3_i32 : i32 to index
    %c0_90 = arith.constant 0 : index
    %c0_91 = arith.constant 0 : index
    %186 = vector.load %arg22[%185, %c0_90, %c0_91] : memref<4x8x128xf32, #tpu.memory_space<vmem>>, vector<1x8x128xf32>
    %187 = vector.shape_cast %186 : vector<1x8x128xf32> to vector<8x128xf32>
    %188 = vector.shape_cast %178 : vector<8x128xf32> to vector<1x8x128xf32>
    tpu.vector_store %arg22[%185, %c0_90, %c0_91], %188 {strides = array<i32>} : memref<4x8x128xf32, #tpu.memory_space<vmem>>, vector<1x8x128xf32>,
    %c4_i32 = arith.constant 4 : i32
    %c0_92 = arith.constant 0 : index
    %c0_93 = arith.constant 0 : index
    %c0_94 = arith.constant 0 : index
    %189 = vector.load %arg22[%c0_92, %c0_93, %c0_94] : memref<4x8x128xf32, #tpu.memory_space<vmem>>, vector<4x8x128xf32>
    %190 = vector.shape_cast %189 : vector<4x8x128xf32> to vector<32x128xf32>
    %c0_95 = arith.constant 0 : index
    %c0_96 = arith.constant 0 : index
    %191 = vector.load %arg6[%c0_95, %c0_96] : memref<128x512xf32, #tpu.memory_space<vmem>>, vector<128x512xf32>
    %cst_97 = arith.constant dense<0.000000e+00> : vector<32x512xf32>
    %192 = tpu.matmul %190, %191, %cst_97 {dimension_numbers = #tpu.dot_dimension_numbers<[1], [0], [0], [1], [0, 0, 1, 1], [], []>} : vector<32x128xf32>, vector<128x512xf32>, vector<32x512xf32> -> vector<32x512xf32>
    %c0_98 = arith.constant 0 : index
    %c0_99 = arith.constant 0 : index
    %193 = vector.load %arg8[%c0_98, %c0_99] : memref<1x512xf32, #tpu.memory_space<vmem>>, vector<1x512xf32>
    %194 = vector.broadcast %193 : vector<1x512xf32> to vector<32x512xf32>
    %195 = arith.addf %192, %194 : vector<32x512xf32>
    %196 = vector.shape_cast %195 : vector<32x512xf32> to vector<4x8x512xf32>
    %c0_100 = arith.constant 0 : index
    %c0_101 = arith.constant 0 : index
    %c0_102 = arith.constant 0 : index
    %197 = vector.load %arg24[%c0_100, %c0_101, %c0_102] : memref<4x8x512xf32, #tpu.memory_space<vmem>>, vector<4x8x512xf32>
    tpu.vector_store %arg24[%c0_100, %c0_101, %c0_102], %196 {strides = array<i32>} : memref<4x8x512xf32, #tpu.memory_space<vmem>>, vector<4x8x512xf32>,
    %c0_103 = arith.constant 0 : index
    %c0_104 = arith.constant 0 : index
    %198 = vector.load %arg7[%c0_103, %c0_104] : memref<128x512xf32, #tpu.memory_space<vmem>>, vector<128x512xf32>
    %c0_i32_105 = arith.constant 0 : i32
    %c0_106 = arith.constant 0 : index
    %c0_107 = arith.constant 0 : index
    %c0_108 = arith.constant 0 : index
    %199 = vector.load %arg19[%c0_106, %c0_107, %c0_108] : memref<2x8x128xf32, #tpu.memory_space<vmem>>, vector<1x8x128xf32>
    %200 = vector.shape_cast %199 : vector<1x8x128xf32> to vector<8x128xf32>
    %c1_109 = arith.constant 1 : index
    %c0_110 = arith.constant 0 : index
    %c0_111 = arith.constant 0 : index
    %201 = vector.load %arg19[%c1_109, %c0_110, %c0_111] : memref<2x8x128xf32, #tpu.memory_space<vmem>>, vector<1x8x128xf32>
    %202 = vector.shape_cast %201 : vector<1x8x128xf32> to vector<8x128xf32>
    %203 = arith.index_cast %c0_i32_105 : i32 to index
    %c0_112 = arith.constant 0 : index
    %c0_113 = arith.constant 0 : index
    %204 = vector.load %arg24[%203, %c0_112, %c0_113] : memref<4x8x512xf32, #tpu.memory_space<vmem>>, vector<1x8x512xf32>
    %205 = vector.shape_cast %204 : vector<1x8x512xf32> to vector<8x512xf32>
    %cst_114 = arith.constant dense<0.000000e+00> : vector<8x512xf32>
    %206 = tpu.matmul %200, %198, %cst_114 {dimension_numbers = #tpu.dot_dimension_numbers<[1], [0], [0], [1], [0, 0, 1, 1], [], []>} : vector<8x128xf32>, vector<128x512xf32>, vector<8x512xf32> -> vector<8x512xf32>
    %207 = arith.addf %205, %206 : vector<8x512xf32>
    %208 = vector.extract_strided_slice %207 {offsets = [0, 0], sizes = [8, 128], strides = [1, 1]} : vector<8x512xf32> to vector<8x128xf32>
    %209 = arith.negf %208 : vector<8x128xf32>
    %210 = math.exp %209 : vector<8x128xf32>
    %cst_115 = arith.constant 1.000000e+00 : f32
    %211 = vector.broadcast %cst_115 : f32 to vector<8x128xf32>
    %212 = arith.addf %211, %210 : vector<8x128xf32>
    %213 = arith.divf %211, %212 : vector<8x128xf32>
    %214 = vector.extract_strided_slice %207 {offsets = [0, 128], sizes = [8, 128], strides = [1, 1]} : vector<8x512xf32> to vector<8x128xf32>
    %215 = arith.negf %214 : vector<8x128xf32>
    %216 = math.exp %215 : vector<8x128xf32>
    %cst_116 = arith.constant 1.000000e+00 : f32
    %217 = vector.broadcast %cst_116 : f32 to vector<8x128xf32>
    %218 = arith.addf %217, %216 : vector<8x128xf32>
    %219 = arith.divf %217, %218 : vector<8x128xf32>
    %220 = vector.extract_strided_slice %207 {offsets = [0, 256], sizes = [8, 128], strides = [1, 1]} : vector<8x512xf32> to vector<8x128xf32>
    %221 = math.tanh %220 : vector<8x128xf32>
    %222 = vector.extract_strided_slice %207 {offsets = [0, 384], sizes = [8, 128], strides = [1, 1]} : vector<8x512xf32> to vector<8x128xf32>
    %223 = arith.negf %222 : vector<8x128xf32>
    %224 = math.exp %223 : vector<8x128xf32>
    %cst_117 = arith.constant 1.000000e+00 : f32
    %225 = vector.broadcast %cst_117 : f32 to vector<8x128xf32>
    %226 = arith.addf %225, %224 : vector<8x128xf32>
    %227 = arith.divf %225, %226 : vector<8x128xf32>
    %228 = arith.mulf %219, %202 : vector<8x128xf32>
    %229 = arith.mulf %213, %221 : vector<8x128xf32>
    %230 = arith.addf %228, %229 : vector<8x128xf32>
    %231 = math.tanh %230 : vector<8x128xf32>
    %232 = arith.mulf %227, %231 : vector<8x128xf32>
    %c0_118 = arith.constant 0 : index
    %c0_119 = arith.constant 0 : index
    %c0_120 = arith.constant 0 : index
    %233 = vector.load %arg19[%c0_118, %c0_119, %c0_120] : memref<2x8x128xf32, #tpu.memory_space<vmem>>, vector<1x8x128xf32>
    %234 = vector.shape_cast %233 : vector<1x8x128xf32> to vector<8x128xf32>
    %235 = vector.shape_cast %232 : vector<8x128xf32> to vector<1x8x128xf32>
    tpu.vector_store %arg19[%c0_118, %c0_119, %c0_120], %235 {strides = array<i32>} : memref<2x8x128xf32, #tpu.memory_space<vmem>>, vector<1x8x128xf32>,
    %c1_121 = arith.constant 1 : index
    %c0_122 = arith.constant 0 : index
    %c0_123 = arith.constant 0 : index
    %236 = vector.load %arg19[%c1_121, %c0_122, %c0_123] : memref<2x8x128xf32, #tpu.memory_space<vmem>>, vector<1x8x128xf32>
    %237 = vector.shape_cast %236 : vector<1x8x128xf32> to vector<8x128xf32>
    %238 = vector.shape_cast %230 : vector<8x128xf32> to vector<1x8x128xf32>
    tpu.vector_store %arg19[%c1_121, %c0_122, %c0_123], %238 {strides = array<i32>} : memref<2x8x128xf32, #tpu.memory_space<vmem>>, vector<1x8x128xf32>,
    %239 = arith.index_cast %c0_i32_105 : i32 to index
    %c0_124 = arith.constant 0 : index
    %c0_125 = arith.constant 0 : index
    %240 = vector.load %arg22[%239, %c0_124, %c0_125] : memref<4x8x128xf32, #tpu.memory_space<vmem>>, vector<1x8x128xf32>
    %241 = vector.shape_cast %240 : vector<1x8x128xf32> to vector<8x128xf32>
    %242 = vector.shape_cast %232 : vector<8x128xf32> to vector<1x8x128xf32>
    tpu.vector_store %arg22[%239, %c0_124, %c0_125], %242 {strides = array<i32>} : memref<4x8x128xf32, #tpu.memory_space<vmem>>, vector<1x8x128xf32>,
    %c1_i32_126 = arith.constant 1 : i32
    %c0_127 = arith.constant 0 : index
    %c0_128 = arith.constant 0 : index
    %c0_129 = arith.constant 0 : index
    %243 = vector.load %arg19[%c0_127, %c0_128, %c0_129] : memref<2x8x128xf32, #tpu.memory_space<vmem>>, vector<1x8x128xf32>
    %244 = vector.shape_cast %243 : vector<1x8x128xf32> to vector<8x128xf32>
    %c1_130 = arith.constant 1 : index
    %c0_131 = arith.constant 0 : index
    %c0_132 = arith.constant 0 : index
    %245 = vector.load %arg19[%c1_130, %c0_131, %c0_132] : memref<2x8x128xf32, #tpu.memory_space<vmem>>, vector<1x8x128xf32>
    %246 = vector.shape_cast %245 : vector<1x8x128xf32> to vector<8x128xf32>
    %247 = arith.index_cast %c1_i32_126 : i32 to index
    %c0_133 = arith.constant 0 : index
    %c0_134 = arith.constant 0 : index
    %248 = vector.load %arg24[%247, %c0_133, %c0_134] : memref<4x8x512xf32, #tpu.memory_space<vmem>>, vector<1x8x512xf32>
    %249 = vector.shape_cast %248 : vector<1x8x512xf32> to vector<8x512xf32>
    %cst_135 = arith.constant dense<0.000000e+00> : vector<8x512xf32>
    %250 = tpu.matmul %244, %198, %cst_135 {dimension_numbers = #tpu.dot_dimension_numbers<[1], [0], [0], [1], [0, 0, 1, 1], [], []>} : vector<8x128xf32>, vector<128x512xf32>, vector<8x512xf32> -> vector<8x512xf32>
    %251 = arith.addf %249, %250 : vector<8x512xf32>
    %252 = vector.extract_strided_slice %251 {offsets = [0, 0], sizes = [8, 128], strides = [1, 1]} : vector<8x512xf32> to vector<8x128xf32>
    %253 = arith.negf %252 : vector<8x128xf32>
    %254 = math.exp %253 : vector<8x128xf32>
    %cst_136 = arith.constant 1.000000e+00 : f32
    %255 = vector.broadcast %cst_136 : f32 to vector<8x128xf32>
    %256 = arith.addf %255, %254 : vector<8x128xf32>
    %257 = arith.divf %255, %256 : vector<8x128xf32>
    %258 = vector.extract_strided_slice %251 {offsets = [0, 128], sizes = [8, 128], strides = [1, 1]} : vector<8x512xf32> to vector<8x128xf32>
    %259 = arith.negf %258 : vector<8x128xf32>
    %260 = math.exp %259 : vector<8x128xf32>
    %cst_137 = arith.constant 1.000000e+00 : f32
    %261 = vector.broadcast %cst_137 : f32 to vector<8x128xf32>
    %262 = arith.addf %261, %260 : vector<8x128xf32>
    %263 = arith.divf %261, %262 : vector<8x128xf32>
    %264 = vector.extract_strided_slice %251 {offsets = [0, 256], sizes = [8, 128], strides = [1, 1]} : vector<8x512xf32> to vector<8x128xf32>
    %265 = math.tanh %264 : vector<8x128xf32>
    %266 = vector.extract_strided_slice %251 {offsets = [0, 384], sizes = [8, 128], strides = [1, 1]} : vector<8x512xf32> to vector<8x128xf32>
    %267 = arith.negf %266 : vector<8x128xf32>
    %268 = math.exp %267 : vector<8x128xf32>
    %cst_138 = arith.constant 1.000000e+00 : f32
    %269 = vector.broadcast %cst_138 : f32 to vector<8x128xf32>
    %270 = arith.addf %269, %268 : vector<8x128xf32>
    %271 = arith.divf %269, %270 : vector<8x128xf32>
    %272 = arith.mulf %263, %246 : vector<8x128xf32>
    %273 = arith.mulf %257, %265 : vector<8x128xf32>
    %274 = arith.addf %272, %273 : vector<8x128xf32>
    %275 = math.tanh %274 : vector<8x128xf32>
    %276 = arith.mulf %271, %275 : vector<8x128xf32>
    %c0_139 = arith.constant 0 : index
    %c0_140 = arith.constant 0 : index
    %c0_141 = arith.constant 0 : index
    %277 = vector.load %arg19[%c0_139, %c0_140, %c0_141] : memref<2x8x128xf32, #tpu.memory_space<vmem>>, vector<1x8x128xf32>
    %278 = vector.shape_cast %277 : vector<1x8x128xf32> to vector<8x128xf32>
    %279 = vector.shape_cast %276 : vector<8x128xf32> to vector<1x8x128xf32>
    tpu.vector_store %arg19[%c0_139, %c0_140, %c0_141], %279 {strides = array<i32>} : memref<2x8x128xf32, #tpu.memory_space<vmem>>, vector<1x8x128xf32>,
    %c1_142 = arith.constant 1 : index
    %c0_143 = arith.constant 0 : index
    %c0_144 = arith.constant 0 : index
    %280 = vector.load %arg19[%c1_142, %c0_143, %c0_144] : memref<2x8x128xf32, #tpu.memory_space<vmem>>, vector<1x8x128xf32>
    %281 = vector.shape_cast %280 : vector<1x8x128xf32> to vector<8x128xf32>
    %282 = vector.shape_cast %274 : vector<8x128xf32> to vector<1x8x128xf32>
    tpu.vector_store %arg19[%c1_142, %c0_143, %c0_144], %282 {strides = array<i32>} : memref<2x8x128xf32, #tpu.memory_space<vmem>>, vector<1x8x128xf32>,
    %283 = arith.index_cast %c1_i32_126 : i32 to index
    %c0_145 = arith.constant 0 : index
    %c0_146 = arith.constant 0 : index
    %284 = vector.load %arg22[%283, %c0_145, %c0_146] : memref<4x8x128xf32, #tpu.memory_space<vmem>>, vector<1x8x128xf32>
    %285 = vector.shape_cast %284 : vector<1x8x128xf32> to vector<8x128xf32>
    %286 = vector.shape_cast %276 : vector<8x128xf32> to vector<1x8x128xf32>
    tpu.vector_store %arg22[%283, %c0_145, %c0_146], %286 {strides = array<i32>} : memref<4x8x128xf32, #tpu.memory_space<vmem>>, vector<1x8x128xf32>,
    %c2_i32_147 = arith.constant 2 : i32
    %c0_148 = arith.constant 0 : index
    %c0_149 = arith.constant 0 : index
    %c0_150 = arith.constant 0 : index
    %287 = vector.load %arg19[%c0_148, %c0_149, %c0_150] : memref<2x8x128xf32, #tpu.memory_space<vmem>>, vector<1x8x128xf32>
    %288 = vector.shape_cast %287 : vector<1x8x128xf32> to vector<8x128xf32>
    %c1_151 = arith.constant 1 : index
    %c0_152 = arith.constant 0 : index
    %c0_153 = arith.constant 0 : index
    %289 = vector.load %arg19[%c1_151, %c0_152, %c0_153] : memref<2x8x128xf32, #tpu.memory_space<vmem>>, vector<1x8x128xf32>
    %290 = vector.shape_cast %289 : vector<1x8x128xf32> to vector<8x128xf32>
    %291 = arith.index_cast %c2_i32_147 : i32 to index
    %c0_154 = arith.constant 0 : index
    %c0_155 = arith.constant 0 : index
    %292 = vector.load %arg24[%291, %c0_154, %c0_155] : memref<4x8x512xf32, #tpu.memory_space<vmem>>, vector<1x8x512xf32>
    %293 = vector.shape_cast %292 : vector<1x8x512xf32> to vector<8x512xf32>
    %cst_156 = arith.constant dense<0.000000e+00> : vector<8x512xf32>
    %294 = tpu.matmul %288, %198, %cst_156 {dimension_numbers = #tpu.dot_dimension_numbers<[1], [0], [0], [1], [0, 0, 1, 1], [], []>} : vector<8x128xf32>, vector<128x512xf32>, vector<8x512xf32> -> vector<8x512xf32>
    %295 = arith.addf %293, %294 : vector<8x512xf32>
    %296 = vector.extract_strided_slice %295 {offsets = [0, 0], sizes = [8, 128], strides = [1, 1]} : vector<8x512xf32> to vector<8x128xf32>
    %297 = arith.negf %296 : vector<8x128xf32>
    %298 = math.exp %297 : vector<8x128xf32>
    %cst_157 = arith.constant 1.000000e+00 : f32
    %299 = vector.broadcast %cst_157 : f32 to vector<8x128xf32>
    %300 = arith.addf %299, %298 : vector<8x128xf32>
    %301 = arith.divf %299, %300 : vector<8x128xf32>
    %302 = vector.extract_strided_slice %295 {offsets = [0, 128], sizes = [8, 128], strides = [1, 1]} : vector<8x512xf32> to vector<8x128xf32>
    %303 = arith.negf %302 : vector<8x128xf32>
    %304 = math.exp %303 : vector<8x128xf32>
    %cst_158 = arith.constant 1.000000e+00 : f32
    %305 = vector.broadcast %cst_158 : f32 to vector<8x128xf32>
    %306 = arith.addf %305, %304 : vector<8x128xf32>
    %307 = arith.divf %305, %306 : vector<8x128xf32>
    %308 = vector.extract_strided_slice %295 {offsets = [0, 256], sizes = [8, 128], strides = [1, 1]} : vector<8x512xf32> to vector<8x128xf32>
    %309 = math.tanh %308 : vector<8x128xf32>
    %310 = vector.extract_strided_slice %295 {offsets = [0, 384], sizes = [8, 128], strides = [1, 1]} : vector<8x512xf32> to vector<8x128xf32>
    %311 = arith.negf %310 : vector<8x128xf32>
    %312 = math.exp %311 : vector<8x128xf32>
    %cst_159 = arith.constant 1.000000e+00 : f32
    %313 = vector.broadcast %cst_159 : f32 to vector<8x128xf32>
    %314 = arith.addf %313, %312 : vector<8x128xf32>
    %315 = arith.divf %313, %314 : vector<8x128xf32>
    %316 = arith.mulf %307, %290 : vector<8x128xf32>
    %317 = arith.mulf %301, %309 : vector<8x128xf32>
    %318 = arith.addf %316, %317 : vector<8x128xf32>
    %319 = math.tanh %318 : vector<8x128xf32>
    %320 = arith.mulf %315, %319 : vector<8x128xf32>
    %c0_160 = arith.constant 0 : index
    %c0_161 = arith.constant 0 : index
    %c0_162 = arith.constant 0 : index
    %321 = vector.load %arg19[%c0_160, %c0_161, %c0_162] : memref<2x8x128xf32, #tpu.memory_space<vmem>>, vector<1x8x128xf32>
    %322 = vector.shape_cast %321 : vector<1x8x128xf32> to vector<8x128xf32>
    %323 = vector.shape_cast %320 : vector<8x128xf32> to vector<1x8x128xf32>
    tpu.vector_store %arg19[%c0_160, %c0_161, %c0_162], %323 {strides = array<i32>} : memref<2x8x128xf32, #tpu.memory_space<vmem>>, vector<1x8x128xf32>,
    %c1_163 = arith.constant 1 : index
    %c0_164 = arith.constant 0 : index
    %c0_165 = arith.constant 0 : index
    %324 = vector.load %arg19[%c1_163, %c0_164, %c0_165] : memref<2x8x128xf32, #tpu.memory_space<vmem>>, vector<1x8x128xf32>
    %325 = vector.shape_cast %324 : vector<1x8x128xf32> to vector<8x128xf32>
    %326 = vector.shape_cast %318 : vector<8x128xf32> to vector<1x8x128xf32>
    tpu.vector_store %arg19[%c1_163, %c0_164, %c0_165], %326 {strides = array<i32>} : memref<2x8x128xf32, #tpu.memory_space<vmem>>, vector<1x8x128xf32>,
    %327 = arith.index_cast %c2_i32_147 : i32 to index
    %c0_166 = arith.constant 0 : index
    %c0_167 = arith.constant 0 : index
    %328 = vector.load %arg22[%327, %c0_166, %c0_167] : memref<4x8x128xf32, #tpu.memory_space<vmem>>, vector<1x8x128xf32>
    %329 = vector.shape_cast %328 : vector<1x8x128xf32> to vector<8x128xf32>
    %330 = vector.shape_cast %320 : vector<8x128xf32> to vector<1x8x128xf32>
    tpu.vector_store %arg22[%327, %c0_166, %c0_167], %330 {strides = array<i32>} : memref<4x8x128xf32, #tpu.memory_space<vmem>>, vector<1x8x128xf32>,
    %c3_i32_168 = arith.constant 3 : i32
    %c0_169 = arith.constant 0 : index
    %c0_170 = arith.constant 0 : index
    %c0_171 = arith.constant 0 : index
    %331 = vector.load %arg19[%c0_169, %c0_170, %c0_171] : memref<2x8x128xf32, #tpu.memory_space<vmem>>, vector<1x8x128xf32>
    %332 = vector.shape_cast %331 : vector<1x8x128xf32> to vector<8x128xf32>
    %c1_172 = arith.constant 1 : index
    %c0_173 = arith.constant 0 : index
    %c0_174 = arith.constant 0 : index
    %333 = vector.load %arg19[%c1_172, %c0_173, %c0_174] : memref<2x8x128xf32, #tpu.memory_space<vmem>>, vector<1x8x128xf32>
    %334 = vector.shape_cast %333 : vector<1x8x128xf32> to vector<8x128xf32>
    %335 = arith.index_cast %c3_i32_168 : i32 to index
    %c0_175 = arith.constant 0 : index
    %c0_176 = arith.constant 0 : index
    %336 = vector.load %arg24[%335, %c0_175, %c0_176] : memref<4x8x512xf32, #tpu.memory_space<vmem>>, vector<1x8x512xf32>
    %337 = vector.shape_cast %336 : vector<1x8x512xf32> to vector<8x512xf32>
    %cst_177 = arith.constant dense<0.000000e+00> : vector<8x512xf32>
    %338 = tpu.matmul %332, %198, %cst_177 {dimension_numbers = #tpu.dot_dimension_numbers<[1], [0], [0], [1], [0, 0, 1, 1], [], []>} : vector<8x128xf32>, vector<128x512xf32>, vector<8x512xf32> -> vector<8x512xf32>
    %339 = arith.addf %337, %338 : vector<8x512xf32>
    %340 = vector.extract_strided_slice %339 {offsets = [0, 0], sizes = [8, 128], strides = [1, 1]} : vector<8x512xf32> to vector<8x128xf32>
    %341 = arith.negf %340 : vector<8x128xf32>
    %342 = math.exp %341 : vector<8x128xf32>
    %cst_178 = arith.constant 1.000000e+00 : f32
    %343 = vector.broadcast %cst_178 : f32 to vector<8x128xf32>
    %344 = arith.addf %343, %342 : vector<8x128xf32>
    %345 = arith.divf %343, %344 : vector<8x128xf32>
    %346 = vector.extract_strided_slice %339 {offsets = [0, 128], sizes = [8, 128], strides = [1, 1]} : vector<8x512xf32> to vector<8x128xf32>
    %347 = arith.negf %346 : vector<8x128xf32>
    %348 = math.exp %347 : vector<8x128xf32>
    %cst_179 = arith.constant 1.000000e+00 : f32
    %349 = vector.broadcast %cst_179 : f32 to vector<8x128xf32>
    %350 = arith.addf %349, %348 : vector<8x128xf32>
    %351 = arith.divf %349, %350 : vector<8x128xf32>
    %352 = vector.extract_strided_slice %339 {offsets = [0, 256], sizes = [8, 128], strides = [1, 1]} : vector<8x512xf32> to vector<8x128xf32>
    %353 = math.tanh %352 : vector<8x128xf32>
    %354 = vector.extract_strided_slice %339 {offsets = [0, 384], sizes = [8, 128], strides = [1, 1]} : vector<8x512xf32> to vector<8x128xf32>
    %355 = arith.negf %354 : vector<8x128xf32>
    %356 = math.exp %355 : vector<8x128xf32>
    %cst_180 = arith.constant 1.000000e+00 : f32
    %357 = vector.broadcast %cst_180 : f32 to vector<8x128xf32>
    %358 = arith.addf %357, %356 : vector<8x128xf32>
    %359 = arith.divf %357, %358 : vector<8x128xf32>
    %360 = arith.mulf %351, %334 : vector<8x128xf32>
    %361 = arith.mulf %345, %353 : vector<8x128xf32>
    %362 = arith.addf %360, %361 : vector<8x128xf32>
    %363 = math.tanh %362 : vector<8x128xf32>
    %364 = arith.mulf %359, %363 : vector<8x128xf32>
    %c0_181 = arith.constant 0 : index
    %c0_182 = arith.constant 0 : index
    %c0_183 = arith.constant 0 : index
    %365 = vector.load %arg19[%c0_181, %c0_182, %c0_183] : memref<2x8x128xf32, #tpu.memory_space<vmem>>, vector<1x8x128xf32>
    %366 = vector.shape_cast %365 : vector<1x8x128xf32> to vector<8x128xf32>
    %367 = vector.shape_cast %364 : vector<8x128xf32> to vector<1x8x128xf32>
    tpu.vector_store %arg19[%c0_181, %c0_182, %c0_183], %367 {strides = array<i32>} : memref<2x8x128xf32, #tpu.memory_space<vmem>>, vector<1x8x128xf32>,
    %c1_184 = arith.constant 1 : index
    %c0_185 = arith.constant 0 : index
    %c0_186 = arith.constant 0 : index
    %368 = vector.load %arg19[%c1_184, %c0_185, %c0_186] : memref<2x8x128xf32, #tpu.memory_space<vmem>>, vector<1x8x128xf32>
    %369 = vector.shape_cast %368 : vector<1x8x128xf32> to vector<8x128xf32>
    %370 = vector.shape_cast %362 : vector<8x128xf32> to vector<1x8x128xf32>
    tpu.vector_store %arg19[%c1_184, %c0_185, %c0_186], %370 {strides = array<i32>} : memref<2x8x128xf32, #tpu.memory_space<vmem>>, vector<1x8x128xf32>,
    %371 = arith.index_cast %c3_i32_168 : i32 to index
    %c0_187 = arith.constant 0 : index
    %c0_188 = arith.constant 0 : index
    %372 = vector.load %arg22[%371, %c0_187, %c0_188] : memref<4x8x128xf32, #tpu.memory_space<vmem>>, vector<1x8x128xf32>
    %373 = vector.shape_cast %372 : vector<1x8x128xf32> to vector<8x128xf32>
    %374 = vector.shape_cast %364 : vector<8x128xf32> to vector<1x8x128xf32>
    tpu.vector_store %arg22[%371, %c0_187, %c0_188], %374 {strides = array<i32>} : memref<4x8x128xf32, #tpu.memory_space<vmem>>, vector<1x8x128xf32>,
    %c4_i32_189 = arith.constant 4 : i32
    %c0_190 = arith.constant 0 : index
    %c0_191 = arith.constant 0 : index
    %c0_192 = arith.constant 0 : index
    %375 = vector.load %arg22[%c0_190, %c0_191, %c0_192] : memref<4x8x128xf32, #tpu.memory_space<vmem>>, vector<4x8x128xf32>
    %376 = vector.shape_cast %375 : vector<4x8x128xf32> to vector<32x128xf32>
    %c0_193 = arith.constant 0 : index
    %c0_194 = arith.constant 0 : index
    %377 = vector.load %arg9[%c0_193, %c0_194] : memref<128x512xf32, #tpu.memory_space<vmem>>, vector<128x512xf32>
    %cst_195 = arith.constant dense<0.000000e+00> : vector<32x512xf32>
    %378 = tpu.matmul %376, %377, %cst_195 {dimension_numbers = #tpu.dot_dimension_numbers<[1], [0], [0], [1], [0, 0, 1, 1], [], []>} : vector<32x128xf32>, vector<128x512xf32>, vector<32x512xf32> -> vector<32x512xf32>
    %c0_196 = arith.constant 0 : index
    %c0_197 = arith.constant 0 : index
    %379 = vector.load %arg11[%c0_196, %c0_197] : memref<1x512xf32, #tpu.memory_space<vmem>>, vector<1x512xf32>
    %380 = vector.broadcast %379 : vector<1x512xf32> to vector<32x512xf32>
    %381 = arith.addf %378, %380 : vector<32x512xf32>
    %382 = vector.shape_cast %381 : vector<32x512xf32> to vector<4x8x512xf32>
    %c0_198 = arith.constant 0 : index
    %c0_199 = arith.constant 0 : index
    %c0_200 = arith.constant 0 : index
    %383 = vector.load %arg25[%c0_198, %c0_199, %c0_200] : memref<4x8x512xf32, #tpu.memory_space<vmem>>, vector<4x8x512xf32>
    tpu.vector_store %arg25[%c0_198, %c0_199, %c0_200], %382 {strides = array<i32>} : memref<4x8x512xf32, #tpu.memory_space<vmem>>, vector<4x8x512xf32>,
    %c0_201 = arith.constant 0 : index
    %c0_202 = arith.constant 0 : index
    %384 = vector.load %arg10[%c0_201, %c0_202] : memref<128x512xf32, #tpu.memory_space<vmem>>, vector<128x512xf32>
    %c0_i32_203 = arith.constant 0 : i32
    %c0_204 = arith.constant 0 : index
    %c0_205 = arith.constant 0 : index
    %c0_206 = arith.constant 0 : index
    %385 = vector.load %arg20[%c0_204, %c0_205, %c0_206] : memref<2x8x128xf32, #tpu.memory_space<vmem>>, vector<1x8x128xf32>
    %386 = vector.shape_cast %385 : vector<1x8x128xf32> to vector<8x128xf32>
    %c1_207 = arith.constant 1 : index
    %c0_208 = arith.constant 0 : index
    %c0_209 = arith.constant 0 : index
    %387 = vector.load %arg20[%c1_207, %c0_208, %c0_209] : memref<2x8x128xf32, #tpu.memory_space<vmem>>, vector<1x8x128xf32>
    %388 = vector.shape_cast %387 : vector<1x8x128xf32> to vector<8x128xf32>
    %389 = arith.index_cast %c0_i32_203 : i32 to index
    %c0_210 = arith.constant 0 : index
    %c0_211 = arith.constant 0 : index
    %390 = vector.load %arg25[%389, %c0_210, %c0_211] : memref<4x8x512xf32, #tpu.memory_space<vmem>>, vector<1x8x512xf32>
    %391 = vector.shape_cast %390 : vector<1x8x512xf32> to vector<8x512xf32>
    %cst_212 = arith.constant dense<0.000000e+00> : vector<8x512xf32>
    %392 = tpu.matmul %386, %384, %cst_212 {dimension_numbers = #tpu.dot_dimension_numbers<[1], [0], [0], [1], [0, 0, 1, 1], [], []>} : vector<8x128xf32>, vector<128x512xf32>, vector<8x512xf32> -> vector<8x512xf32>
    %393 = arith.addf %391, %392 : vector<8x512xf32>
    %394 = vector.extract_strided_slice %393 {offsets = [0, 0], sizes = [8, 128], strides = [1, 1]} : vector<8x512xf32> to vector<8x128xf32>
    %395 = arith.negf %394 : vector<8x128xf32>
    %396 = math.exp %395 : vector<8x128xf32>
    %cst_213 = arith.constant 1.000000e+00 : f32
    %397 = vector.broadcast %cst_213 : f32 to vector<8x128xf32>
    %398 = arith.addf %397, %396 : vector<8x128xf32>
    %399 = arith.divf %397, %398 : vector<8x128xf32>
    %400 = vector.extract_strided_slice %393 {offsets = [0, 128], sizes = [8, 128], strides = [1, 1]} : vector<8x512xf32> to vector<8x128xf32>
    %401 = arith.negf %400 : vector<8x128xf32>
    %402 = math.exp %401 : vector<8x128xf32>
    %cst_214 = arith.constant 1.000000e+00 : f32
    %403 = vector.broadcast %cst_214 : f32 to vector<8x128xf32>
    %404 = arith.addf %403, %402 : vector<8x128xf32>
    %405 = arith.divf %403, %404 : vector<8x128xf32>
    %406 = vector.extract_strided_slice %393 {offsets = [0, 256], sizes = [8, 128], strides = [1, 1]} : vector<8x512xf32> to vector<8x128xf32>
    %407 = math.tanh %406 : vector<8x128xf32>
    %408 = vector.extract_strided_slice %393 {offsets = [0, 384], sizes = [8, 128], strides = [1, 1]} : vector<8x512xf32> to vector<8x128xf32>
    %409 = arith.negf %408 : vector<8x128xf32>
    %410 = math.exp %409 : vector<8x128xf32>
    %cst_215 = arith.constant 1.000000e+00 : f32
    %411 = vector.broadcast %cst_215 : f32 to vector<8x128xf32>
    %412 = arith.addf %411, %410 : vector<8x128xf32>
    %413 = arith.divf %411, %412 : vector<8x128xf32>
    %414 = arith.mulf %405, %388 : vector<8x128xf32>
    %415 = arith.mulf %399, %407 : vector<8x128xf32>
    %416 = arith.addf %414, %415 : vector<8x128xf32>
    %417 = math.tanh %416 : vector<8x128xf32>
    %418 = arith.mulf %413, %417 : vector<8x128xf32>
    %c0_216 = arith.constant 0 : index
    %c0_217 = arith.constant 0 : index
    %c0_218 = arith.constant 0 : index
    %419 = vector.load %arg20[%c0_216, %c0_217, %c0_218] : memref<2x8x128xf32, #tpu.memory_space<vmem>>, vector<1x8x128xf32>
    %420 = vector.shape_cast %419 : vector<1x8x128xf32> to vector<8x128xf32>
    %421 = vector.shape_cast %418 : vector<8x128xf32> to vector<1x8x128xf32>
    tpu.vector_store %arg20[%c0_216, %c0_217, %c0_218], %421 {strides = array<i32>} : memref<2x8x128xf32, #tpu.memory_space<vmem>>, vector<1x8x128xf32>,
    %c1_219 = arith.constant 1 : index
    %c0_220 = arith.constant 0 : index
    %c0_221 = arith.constant 0 : index
    %422 = vector.load %arg20[%c1_219, %c0_220, %c0_221] : memref<2x8x128xf32, #tpu.memory_space<vmem>>, vector<1x8x128xf32>
    %423 = vector.shape_cast %422 : vector<1x8x128xf32> to vector<8x128xf32>
    %424 = vector.shape_cast %416 : vector<8x128xf32> to vector<1x8x128xf32>
    tpu.vector_store %arg20[%c1_219, %c0_220, %c0_221], %424 {strides = array<i32>} : memref<2x8x128xf32, #tpu.memory_space<vmem>>, vector<1x8x128xf32>,
    %425 = arith.index_cast %c0_i32_203 : i32 to index
    %c0_222 = arith.constant 0 : index
    %c0_223 = arith.constant 0 : index
    %426 = vector.load %arg23[%425, %c0_222, %c0_223] : memref<4x8x128xf32, #tpu.memory_space<vmem>>, vector<1x8x128xf32>
    %427 = vector.shape_cast %426 : vector<1x8x128xf32> to vector<8x128xf32>
    %428 = vector.shape_cast %418 : vector<8x128xf32> to vector<1x8x128xf32>
    tpu.vector_store %arg23[%425, %c0_222, %c0_223], %428 {strides = array<i32>} : memref<4x8x128xf32, #tpu.memory_space<vmem>>, vector<1x8x128xf32>,
    %c1_i32_224 = arith.constant 1 : i32
    %c0_225 = arith.constant 0 : index
    %c0_226 = arith.constant 0 : index
    %c0_227 = arith.constant 0 : index
    %429 = vector.load %arg20[%c0_225, %c0_226, %c0_227] : memref<2x8x128xf32, #tpu.memory_space<vmem>>, vector<1x8x128xf32>
    %430 = vector.shape_cast %429 : vector<1x8x128xf32> to vector<8x128xf32>
    %c1_228 = arith.constant 1 : index
    %c0_229 = arith.constant 0 : index
    %c0_230 = arith.constant 0 : index
    %431 = vector.load %arg20[%c1_228, %c0_229, %c0_230] : memref<2x8x128xf32, #tpu.memory_space<vmem>>, vector<1x8x128xf32>
    %432 = vector.shape_cast %431 : vector<1x8x128xf32> to vector<8x128xf32>
    %433 = arith.index_cast %c1_i32_224 : i32 to index
    %c0_231 = arith.constant 0 : index
    %c0_232 = arith.constant 0 : index
    %434 = vector.load %arg25[%433, %c0_231, %c0_232] : memref<4x8x512xf32, #tpu.memory_space<vmem>>, vector<1x8x512xf32>
    %435 = vector.shape_cast %434 : vector<1x8x512xf32> to vector<8x512xf32>
    %cst_233 = arith.constant dense<0.000000e+00> : vector<8x512xf32>
    %436 = tpu.matmul %430, %384, %cst_233 {dimension_numbers = #tpu.dot_dimension_numbers<[1], [0], [0], [1], [0, 0, 1, 1], [], []>} : vector<8x128xf32>, vector<128x512xf32>, vector<8x512xf32> -> vector<8x512xf32>
    %437 = arith.addf %435, %436 : vector<8x512xf32>
    %438 = vector.extract_strided_slice %437 {offsets = [0, 0], sizes = [8, 128], strides = [1, 1]} : vector<8x512xf32> to vector<8x128xf32>
    %439 = arith.negf %438 : vector<8x128xf32>
    %440 = math.exp %439 : vector<8x128xf32>
    %cst_234 = arith.constant 1.000000e+00 : f32
    %441 = vector.broadcast %cst_234 : f32 to vector<8x128xf32>
    %442 = arith.addf %441, %440 : vector<8x128xf32>
    %443 = arith.divf %441, %442 : vector<8x128xf32>
    %444 = vector.extract_strided_slice %437 {offsets = [0, 128], sizes = [8, 128], strides = [1, 1]} : vector<8x512xf32> to vector<8x128xf32>
    %445 = arith.negf %444 : vector<8x128xf32>
    %446 = math.exp %445 : vector<8x128xf32>
    %cst_235 = arith.constant 1.000000e+00 : f32
    %447 = vector.broadcast %cst_235 : f32 to vector<8x128xf32>
    %448 = arith.addf %447, %446 : vector<8x128xf32>
    %449 = arith.divf %447, %448 : vector<8x128xf32>
    %450 = vector.extract_strided_slice %437 {offsets = [0, 256], sizes = [8, 128], strides = [1, 1]} : vector<8x512xf32> to vector<8x128xf32>
    %451 = math.tanh %450 : vector<8x128xf32>
    %452 = vector.extract_strided_slice %437 {offsets = [0, 384], sizes = [8, 128], strides = [1, 1]} : vector<8x512xf32> to vector<8x128xf32>
    %453 = arith.negf %452 : vector<8x128xf32>
    %454 = math.exp %453 : vector<8x128xf32>
    %cst_236 = arith.constant 1.000000e+00 : f32
    %455 = vector.broadcast %cst_236 : f32 to vector<8x128xf32>
    %456 = arith.addf %455, %454 : vector<8x128xf32>
    %457 = arith.divf %455, %456 : vector<8x128xf32>
    %458 = arith.mulf %449, %432 : vector<8x128xf32>
    %459 = arith.mulf %443, %451 : vector<8x128xf32>
    %460 = arith.addf %458, %459 : vector<8x128xf32>
    %461 = math.tanh %460 : vector<8x128xf32>
    %462 = arith.mulf %457, %461 : vector<8x128xf32>
    %c0_237 = arith.constant 0 : index
    %c0_238 = arith.constant 0 : index
    %c0_239 = arith.constant 0 : index
    %463 = vector.load %arg20[%c0_237, %c0_238, %c0_239] : memref<2x8x128xf32, #tpu.memory_space<vmem>>, vector<1x8x128xf32>
    %464 = vector.shape_cast %463 : vector<1x8x128xf32> to vector<8x128xf32>
    %465 = vector.shape_cast %462 : vector<8x128xf32> to vector<1x8x128xf32>
    tpu.vector_store %arg20[%c0_237, %c0_238, %c0_239], %465 {strides = array<i32>} : memref<2x8x128xf32, #tpu.memory_space<vmem>>, vector<1x8x128xf32>,
    %c1_240 = arith.constant 1 : index
    %c0_241 = arith.constant 0 : index
    %c0_242 = arith.constant 0 : index
    %466 = vector.load %arg20[%c1_240, %c0_241, %c0_242] : memref<2x8x128xf32, #tpu.memory_space<vmem>>, vector<1x8x128xf32>
    %467 = vector.shape_cast %466 : vector<1x8x128xf32> to vector<8x128xf32>
    %468 = vector.shape_cast %460 : vector<8x128xf32> to vector<1x8x128xf32>
    tpu.vector_store %arg20[%c1_240, %c0_241, %c0_242], %468 {strides = array<i32>} : memref<2x8x128xf32, #tpu.memory_space<vmem>>, vector<1x8x128xf32>,
    %469 = arith.index_cast %c1_i32_224 : i32 to index
    %c0_243 = arith.constant 0 : index
    %c0_244 = arith.constant 0 : index
    %470 = vector.load %arg23[%469, %c0_243, %c0_244] : memref<4x8x128xf32, #tpu.memory_space<vmem>>, vector<1x8x128xf32>
    %471 = vector.shape_cast %470 : vector<1x8x128xf32> to vector<8x128xf32>
    %472 = vector.shape_cast %462 : vector<8x128xf32> to vector<1x8x128xf32>
    tpu.vector_store %arg23[%469, %c0_243, %c0_244], %472 {strides = array<i32>} : memref<4x8x128xf32, #tpu.memory_space<vmem>>, vector<1x8x128xf32>,
    %c2_i32_245 = arith.constant 2 : i32
    %c0_246 = arith.constant 0 : index
    %c0_247 = arith.constant 0 : index
    %c0_248 = arith.constant 0 : index
    %473 = vector.load %arg20[%c0_246, %c0_247, %c0_248] : memref<2x8x128xf32, #tpu.memory_space<vmem>>, vector<1x8x128xf32>
    %474 = vector.shape_cast %473 : vector<1x8x128xf32> to vector<8x128xf32>
    %c1_249 = arith.constant 1 : index
    %c0_250 = arith.constant 0 : index
    %c0_251 = arith.constant 0 : index
    %475 = vector.load %arg20[%c1_249, %c0_250, %c0_251] : memref<2x8x128xf32, #tpu.memory_space<vmem>>, vector<1x8x128xf32>
    %476 = vector.shape_cast %475 : vector<1x8x128xf32> to vector<8x128xf32>
    %477 = arith.index_cast %c2_i32_245 : i32 to index
    %c0_252 = arith.constant 0 : index
    %c0_253 = arith.constant 0 : index
    %478 = vector.load %arg25[%477, %c0_252, %c0_253] : memref<4x8x512xf32, #tpu.memory_space<vmem>>, vector<1x8x512xf32>
    %479 = vector.shape_cast %478 : vector<1x8x512xf32> to vector<8x512xf32>
    %cst_254 = arith.constant dense<0.000000e+00> : vector<8x512xf32>
    %480 = tpu.matmul %474, %384, %cst_254 {dimension_numbers = #tpu.dot_dimension_numbers<[1], [0], [0], [1], [0, 0, 1, 1], [], []>} : vector<8x128xf32>, vector<128x512xf32>, vector<8x512xf32> -> vector<8x512xf32>
    %481 = arith.addf %479, %480 : vector<8x512xf32>
    %482 = vector.extract_strided_slice %481 {offsets = [0, 0], sizes = [8, 128], strides = [1, 1]} : vector<8x512xf32> to vector<8x128xf32>
    %483 = arith.negf %482 : vector<8x128xf32>
    %484 = math.exp %483 : vector<8x128xf32>
    %cst_255 = arith.constant 1.000000e+00 : f32
    %485 = vector.broadcast %cst_255 : f32 to vector<8x128xf32>
    %486 = arith.addf %485, %484 : vector<8x128xf32>
    %487 = arith.divf %485, %486 : vector<8x128xf32>
    %488 = vector.extract_strided_slice %481 {offsets = [0, 128], sizes = [8, 128], strides = [1, 1]} : vector<8x512xf32> to vector<8x128xf32>
    %489 = arith.negf %488 : vector<8x128xf32>
    %490 = math.exp %489 : vector<8x128xf32>
    %cst_256 = arith.constant 1.000000e+00 : f32
    %491 = vector.broadcast %cst_256 : f32 to vector<8x128xf32>
    %492 = arith.addf %491, %490 : vector<8x128xf32>
    %493 = arith.divf %491, %492 : vector<8x128xf32>
    %494 = vector.extract_strided_slice %481 {offsets = [0, 256], sizes = [8, 128], strides = [1, 1]} : vector<8x512xf32> to vector<8x128xf32>
    %495 = math.tanh %494 : vector<8x128xf32>
    %496 = vector.extract_strided_slice %481 {offsets = [0, 384], sizes = [8, 128], strides = [1, 1]} : vector<8x512xf32> to vector<8x128xf32>
    %497 = arith.negf %496 : vector<8x128xf32>
    %498 = math.exp %497 : vector<8x128xf32>
    %cst_257 = arith.constant 1.000000e+00 : f32
    %499 = vector.broadcast %cst_257 : f32 to vector<8x128xf32>
    %500 = arith.addf %499, %498 : vector<8x128xf32>
    %501 = arith.divf %499, %500 : vector<8x128xf32>
    %502 = arith.mulf %493, %476 : vector<8x128xf32>
    %503 = arith.mulf %487, %495 : vector<8x128xf32>
    %504 = arith.addf %502, %503 : vector<8x128xf32>
    %505 = math.tanh %504 : vector<8x128xf32>
    %506 = arith.mulf %501, %505 : vector<8x128xf32>
    %c0_258 = arith.constant 0 : index
    %c0_259 = arith.constant 0 : index
    %c0_260 = arith.constant 0 : index
    %507 = vector.load %arg20[%c0_258, %c0_259, %c0_260] : memref<2x8x128xf32, #tpu.memory_space<vmem>>, vector<1x8x128xf32>
    %508 = vector.shape_cast %507 : vector<1x8x128xf32> to vector<8x128xf32>
    %509 = vector.shape_cast %506 : vector<8x128xf32> to vector<1x8x128xf32>
    tpu.vector_store %arg20[%c0_258, %c0_259, %c0_260], %509 {strides = array<i32>} : memref<2x8x128xf32, #tpu.memory_space<vmem>>, vector<1x8x128xf32>,
    %c1_261 = arith.constant 1 : index
    %c0_262 = arith.constant 0 : index
    %c0_263 = arith.constant 0 : index
    %510 = vector.load %arg20[%c1_261, %c0_262, %c0_263] : memref<2x8x128xf32, #tpu.memory_space<vmem>>, vector<1x8x128xf32>
    %511 = vector.shape_cast %510 : vector<1x8x128xf32> to vector<8x128xf32>
    %512 = vector.shape_cast %504 : vector<8x128xf32> to vector<1x8x128xf32>
    tpu.vector_store %arg20[%c1_261, %c0_262, %c0_263], %512 {strides = array<i32>} : memref<2x8x128xf32, #tpu.memory_space<vmem>>, vector<1x8x128xf32>,
    %513 = arith.index_cast %c2_i32_245 : i32 to index
    %c0_264 = arith.constant 0 : index
    %c0_265 = arith.constant 0 : index
    %514 = vector.load %arg23[%513, %c0_264, %c0_265] : memref<4x8x128xf32, #tpu.memory_space<vmem>>, vector<1x8x128xf32>
    %515 = vector.shape_cast %514 : vector<1x8x128xf32> to vector<8x128xf32>
    %516 = vector.shape_cast %506 : vector<8x128xf32> to vector<1x8x128xf32>
    tpu.vector_store %arg23[%513, %c0_264, %c0_265], %516 {strides = array<i32>} : memref<4x8x128xf32, #tpu.memory_space<vmem>>, vector<1x8x128xf32>,
    %c3_i32_266 = arith.constant 3 : i32
    %c0_267 = arith.constant 0 : index
    %c0_268 = arith.constant 0 : index
    %c0_269 = arith.constant 0 : index
    %517 = vector.load %arg20[%c0_267, %c0_268, %c0_269] : memref<2x8x128xf32, #tpu.memory_space<vmem>>, vector<1x8x128xf32>
    %518 = vector.shape_cast %517 : vector<1x8x128xf32> to vector<8x128xf32>
    %c1_270 = arith.constant 1 : index
    %c0_271 = arith.constant 0 : index
    %c0_272 = arith.constant 0 : index
    %519 = vector.load %arg20[%c1_270, %c0_271, %c0_272] : memref<2x8x128xf32, #tpu.memory_space<vmem>>, vector<1x8x128xf32>
    %520 = vector.shape_cast %519 : vector<1x8x128xf32> to vector<8x128xf32>
    %521 = arith.index_cast %c3_i32_266 : i32 to index
    %c0_273 = arith.constant 0 : index
    %c0_274 = arith.constant 0 : index
    %522 = vector.load %arg25[%521, %c0_273, %c0_274] : memref<4x8x512xf32, #tpu.memory_space<vmem>>, vector<1x8x512xf32>
    %523 = vector.shape_cast %522 : vector<1x8x512xf32> to vector<8x512xf32>
    %cst_275 = arith.constant dense<0.000000e+00> : vector<8x512xf32>
    %524 = tpu.matmul %518, %384, %cst_275 {dimension_numbers = #tpu.dot_dimension_numbers<[1], [0], [0], [1], [0, 0, 1, 1], [], []>} : vector<8x128xf32>, vector<128x512xf32>, vector<8x512xf32> -> vector<8x512xf32>
    %525 = arith.addf %523, %524 : vector<8x512xf32>
    %526 = vector.extract_strided_slice %525 {offsets = [0, 0], sizes = [8, 128], strides = [1, 1]} : vector<8x512xf32> to vector<8x128xf32>
    %527 = arith.negf %526 : vector<8x128xf32>
    %528 = math.exp %527 : vector<8x128xf32>
    %cst_276 = arith.constant 1.000000e+00 : f32
    %529 = vector.broadcast %cst_276 : f32 to vector<8x128xf32>
    %530 = arith.addf %529, %528 : vector<8x128xf32>
    %531 = arith.divf %529, %530 : vector<8x128xf32>
    %532 = vector.extract_strided_slice %525 {offsets = [0, 128], sizes = [8, 128], strides = [1, 1]} : vector<8x512xf32> to vector<8x128xf32>
    %533 = arith.negf %532 : vector<8x128xf32>
    %534 = math.exp %533 : vector<8x128xf32>
    %cst_277 = arith.constant 1.000000e+00 : f32
    %535 = vector.broadcast %cst_277 : f32 to vector<8x128xf32>
    %536 = arith.addf %535, %534 : vector<8x128xf32>
    %537 = arith.divf %535, %536 : vector<8x128xf32>
    %538 = vector.extract_strided_slice %525 {offsets = [0, 256], sizes = [8, 128], strides = [1, 1]} : vector<8x512xf32> to vector<8x128xf32>
    %539 = math.tanh %538 : vector<8x128xf32>
    %540 = vector.extract_strided_slice %525 {offsets = [0, 384], sizes = [8, 128], strides = [1, 1]} : vector<8x512xf32> to vector<8x128xf32>
    %541 = arith.negf %540 : vector<8x128xf32>
    %542 = math.exp %541 : vector<8x128xf32>
    %cst_278 = arith.constant 1.000000e+00 : f32
    %543 = vector.broadcast %cst_278 : f32 to vector<8x128xf32>
    %544 = arith.addf %543, %542 : vector<8x128xf32>
    %545 = arith.divf %543, %544 : vector<8x128xf32>
    %546 = arith.mulf %537, %520 : vector<8x128xf32>
    %547 = arith.mulf %531, %539 : vector<8x128xf32>
    %548 = arith.addf %546, %547 : vector<8x128xf32>
    %549 = math.tanh %548 : vector<8x128xf32>
    %550 = arith.mulf %545, %549 : vector<8x128xf32>
    %c0_279 = arith.constant 0 : index
    %c0_280 = arith.constant 0 : index
    %c0_281 = arith.constant 0 : index
    %551 = vector.load %arg20[%c0_279, %c0_280, %c0_281] : memref<2x8x128xf32, #tpu.memory_space<vmem>>, vector<1x8x128xf32>
    %552 = vector.shape_cast %551 : vector<1x8x128xf32> to vector<8x128xf32>
    %553 = vector.shape_cast %550 : vector<8x128xf32> to vector<1x8x128xf32>
    tpu.vector_store %arg20[%c0_279, %c0_280, %c0_281], %553 {strides = array<i32>} : memref<2x8x128xf32, #tpu.memory_space<vmem>>, vector<1x8x128xf32>,
    %c1_282 = arith.constant 1 : index
    %c0_283 = arith.constant 0 : index
    %c0_284 = arith.constant 0 : index
    %554 = vector.load %arg20[%c1_282, %c0_283, %c0_284] : memref<2x8x128xf32, #tpu.memory_space<vmem>>, vector<1x8x128xf32>
    %555 = vector.shape_cast %554 : vector<1x8x128xf32> to vector<8x128xf32>
    %556 = vector.shape_cast %548 : vector<8x128xf32> to vector<1x8x128xf32>
    tpu.vector_store %arg20[%c1_282, %c0_283, %c0_284], %556 {strides = array<i32>} : memref<2x8x128xf32, #tpu.memory_space<vmem>>, vector<1x8x128xf32>,
    %557 = arith.index_cast %c3_i32_266 : i32 to index
    %c0_285 = arith.constant 0 : index
    %c0_286 = arith.constant 0 : index
    %558 = vector.load %arg23[%557, %c0_285, %c0_286] : memref<4x8x128xf32, #tpu.memory_space<vmem>>, vector<1x8x128xf32>
    %559 = vector.shape_cast %558 : vector<1x8x128xf32> to vector<8x128xf32>
    %560 = vector.shape_cast %550 : vector<8x128xf32> to vector<1x8x128xf32>
    tpu.vector_store %arg23[%557, %c0_285, %c0_286], %560 {strides = array<i32>} : memref<4x8x128xf32, #tpu.memory_space<vmem>>, vector<1x8x128xf32>,
    %c4_i32_287 = arith.constant 4 : i32
    %c0_288 = arith.constant 0 : index
    %c0_289 = arith.constant 0 : index
    %c0_290 = arith.constant 0 : index
    %561 = vector.load %arg23[%c0_288, %c0_289, %c0_290] : memref<4x8x128xf32, #tpu.memory_space<vmem>>, vector<4x8x128xf32>
    %562 = vector.shape_cast %561 : vector<4x8x128xf32> to vector<32x128xf32>
    %c0_291 = arith.constant 0 : index
    %c0_292 = arith.constant 0 : index
    %563 = vector.load %arg12[%c0_291, %c0_292] : memref<128x512xf32, #tpu.memory_space<vmem>>, vector<128x512xf32>
    %cst_293 = arith.constant dense<0.000000e+00> : vector<32x512xf32>
    %564 = tpu.matmul %562, %563, %cst_293 {dimension_numbers = #tpu.dot_dimension_numbers<[1], [0], [0], [1], [0, 0, 1, 1], [], []>} : vector<32x128xf32>, vector<128x512xf32>, vector<32x512xf32> -> vector<32x512xf32>
    %c0_294 = arith.constant 0 : index
    %c0_295 = arith.constant 0 : index
    %565 = vector.load %arg14[%c0_294, %c0_295] : memref<1x512xf32, #tpu.memory_space<vmem>>, vector<1x512xf32>
    %566 = vector.broadcast %565 : vector<1x512xf32> to vector<32x512xf32>
    %567 = arith.addf %564, %566 : vector<32x512xf32>
    %568 = vector.shape_cast %567 : vector<32x512xf32> to vector<4x8x512xf32>
    %c0_296 = arith.constant 0 : index
    %c0_297 = arith.constant 0 : index
    %c0_298 = arith.constant 0 : index
    %569 = vector.load %arg25[%c0_296, %c0_297, %c0_298] : memref<4x8x512xf32, #tpu.memory_space<vmem>>, vector<4x8x512xf32>
    tpu.vector_store %arg25[%c0_296, %c0_297, %c0_298], %568 {strides = array<i32>} : memref<4x8x512xf32, #tpu.memory_space<vmem>>, vector<4x8x512xf32>,
    %c0_299 = arith.constant 0 : index
    %c0_300 = arith.constant 0 : index
    %570 = vector.load %arg13[%c0_299, %c0_300] : memref<128x512xf32, #tpu.memory_space<vmem>>, vector<128x512xf32>
    %c0_i32_301 = arith.constant 0 : i32
    %c0_302 = arith.constant 0 : index
    %c0_303 = arith.constant 0 : index
    %c0_304 = arith.constant 0 : index
    %571 = vector.load %arg21[%c0_302, %c0_303, %c0_304] : memref<2x8x128xf32, #tpu.memory_space<vmem>>, vector<1x8x128xf32>
    %572 = vector.shape_cast %571 : vector<1x8x128xf32> to vector<8x128xf32>
    %c1_305 = arith.constant 1 : index
    %c0_306 = arith.constant 0 : index
    %c0_307 = arith.constant 0 : index
    %573 = vector.load %arg21[%c1_305, %c0_306, %c0_307] : memref<2x8x128xf32, #tpu.memory_space<vmem>>, vector<1x8x128xf32>
    %574 = vector.shape_cast %573 : vector<1x8x128xf32> to vector<8x128xf32>
    %575 = arith.index_cast %c0_i32_301 : i32 to index
    %c0_308 = arith.constant 0 : index
    %c0_309 = arith.constant 0 : index
    %576 = vector.load %arg25[%575, %c0_308, %c0_309] : memref<4x8x512xf32, #tpu.memory_space<vmem>>, vector<1x8x512xf32>
    %577 = vector.shape_cast %576 : vector<1x8x512xf32> to vector<8x512xf32>
    %cst_310 = arith.constant dense<0.000000e+00> : vector<8x512xf32>
    %578 = tpu.matmul %572, %570, %cst_310 {dimension_numbers = #tpu.dot_dimension_numbers<[1], [0], [0], [1], [0, 0, 1, 1], [], []>} : vector<8x128xf32>, vector<128x512xf32>, vector<8x512xf32> -> vector<8x512xf32>
    %579 = arith.addf %577, %578 : vector<8x512xf32>
    %580 = vector.extract_strided_slice %579 {offsets = [0, 0], sizes = [8, 128], strides = [1, 1]} : vector<8x512xf32> to vector<8x128xf32>
    %581 = arith.negf %580 : vector<8x128xf32>
    %582 = math.exp %581 : vector<8x128xf32>
    %cst_311 = arith.constant 1.000000e+00 : f32
    %583 = vector.broadcast %cst_311 : f32 to vector<8x128xf32>
    %584 = arith.addf %583, %582 : vector<8x128xf32>
    %585 = arith.divf %583, %584 : vector<8x128xf32>
    %586 = vector.extract_strided_slice %579 {offsets = [0, 128], sizes = [8, 128], strides = [1, 1]} : vector<8x512xf32> to vector<8x128xf32>
    %587 = arith.negf %586 : vector<8x128xf32>
    %588 = math.exp %587 : vector<8x128xf32>
    %cst_312 = arith.constant 1.000000e+00 : f32
    %589 = vector.broadcast %cst_312 : f32 to vector<8x128xf32>
    %590 = arith.addf %589, %588 : vector<8x128xf32>
    %591 = arith.divf %589, %590 : vector<8x128xf32>
    %592 = vector.extract_strided_slice %579 {offsets = [0, 256], sizes = [8, 128], strides = [1, 1]} : vector<8x512xf32> to vector<8x128xf32>
    %593 = math.tanh %592 : vector<8x128xf32>
    %594 = vector.extract_strided_slice %579 {offsets = [0, 384], sizes = [8, 128], strides = [1, 1]} : vector<8x512xf32> to vector<8x128xf32>
    %595 = arith.negf %594 : vector<8x128xf32>
    %596 = math.exp %595 : vector<8x128xf32>
    %cst_313 = arith.constant 1.000000e+00 : f32
    %597 = vector.broadcast %cst_313 : f32 to vector<8x128xf32>
    %598 = arith.addf %597, %596 : vector<8x128xf32>
    %599 = arith.divf %597, %598 : vector<8x128xf32>
    %600 = arith.mulf %591, %574 : vector<8x128xf32>
    %601 = arith.mulf %585, %593 : vector<8x128xf32>
    %602 = arith.addf %600, %601 : vector<8x128xf32>
    %603 = math.tanh %602 : vector<8x128xf32>
    %604 = arith.mulf %599, %603 : vector<8x128xf32>
    %c0_314 = arith.constant 0 : index
    %c0_315 = arith.constant 0 : index
    %c0_316 = arith.constant 0 : index
    %605 = vector.load %arg21[%c0_314, %c0_315, %c0_316] : memref<2x8x128xf32, #tpu.memory_space<vmem>>, vector<1x8x128xf32>
    %606 = vector.shape_cast %605 : vector<1x8x128xf32> to vector<8x128xf32>
    %607 = vector.shape_cast %604 : vector<8x128xf32> to vector<1x8x128xf32>
    tpu.vector_store %arg21[%c0_314, %c0_315, %c0_316], %607 {strides = array<i32>} : memref<2x8x128xf32, #tpu.memory_space<vmem>>, vector<1x8x128xf32>,
    %c1_317 = arith.constant 1 : index
    %c0_318 = arith.constant 0 : index
    %c0_319 = arith.constant 0 : index
    %608 = vector.load %arg21[%c1_317, %c0_318, %c0_319] : memref<2x8x128xf32, #tpu.memory_space<vmem>>, vector<1x8x128xf32>
    %609 = vector.shape_cast %608 : vector<1x8x128xf32> to vector<8x128xf32>
    %610 = vector.shape_cast %602 : vector<8x128xf32> to vector<1x8x128xf32>
    tpu.vector_store %arg21[%c1_317, %c0_318, %c0_319], %610 {strides = array<i32>} : memref<2x8x128xf32, #tpu.memory_space<vmem>>, vector<1x8x128xf32>,
    %611 = arith.index_cast %c0_i32_301 : i32 to index
    %c0_320 = arith.constant 0 : index
    %c0_321 = arith.constant 0 : index
    %612 = vector.load %arg23[%611, %c0_320, %c0_321] : memref<4x8x128xf32, #tpu.memory_space<vmem>>, vector<1x8x128xf32>
    %613 = vector.shape_cast %612 : vector<1x8x128xf32> to vector<8x128xf32>
    %614 = vector.shape_cast %604 : vector<8x128xf32> to vector<1x8x128xf32>
    tpu.vector_store %arg23[%611, %c0_320, %c0_321], %614 {strides = array<i32>} : memref<4x8x128xf32, #tpu.memory_space<vmem>>, vector<1x8x128xf32>,
    %c1_i32_322 = arith.constant 1 : i32
    %c0_323 = arith.constant 0 : index
    %c0_324 = arith.constant 0 : index
    %c0_325 = arith.constant 0 : index
    %615 = vector.load %arg21[%c0_323, %c0_324, %c0_325] : memref<2x8x128xf32, #tpu.memory_space<vmem>>, vector<1x8x128xf32>
    %616 = vector.shape_cast %615 : vector<1x8x128xf32> to vector<8x128xf32>
    %c1_326 = arith.constant 1 : index
    %c0_327 = arith.constant 0 : index
    %c0_328 = arith.constant 0 : index
    %617 = vector.load %arg21[%c1_326, %c0_327, %c0_328] : memref<2x8x128xf32, #tpu.memory_space<vmem>>, vector<1x8x128xf32>
    %618 = vector.shape_cast %617 : vector<1x8x128xf32> to vector<8x128xf32>
    %619 = arith.index_cast %c1_i32_322 : i32 to index
    %c0_329 = arith.constant 0 : index
    %c0_330 = arith.constant 0 : index
    %620 = vector.load %arg25[%619, %c0_329, %c0_330] : memref<4x8x512xf32, #tpu.memory_space<vmem>>, vector<1x8x512xf32>
    %621 = vector.shape_cast %620 : vector<1x8x512xf32> to vector<8x512xf32>
    %cst_331 = arith.constant dense<0.000000e+00> : vector<8x512xf32>
    %622 = tpu.matmul %616, %570, %cst_331 {dimension_numbers = #tpu.dot_dimension_numbers<[1], [0], [0], [1], [0, 0, 1, 1], [], []>} : vector<8x128xf32>, vector<128x512xf32>, vector<8x512xf32> -> vector<8x512xf32>
    %623 = arith.addf %621, %622 : vector<8x512xf32>
    %624 = vector.extract_strided_slice %623 {offsets = [0, 0], sizes = [8, 128], strides = [1, 1]} : vector<8x512xf32> to vector<8x128xf32>
    %625 = arith.negf %624 : vector<8x128xf32>
    %626 = math.exp %625 : vector<8x128xf32>
    %cst_332 = arith.constant 1.000000e+00 : f32
    %627 = vector.broadcast %cst_332 : f32 to vector<8x128xf32>
    %628 = arith.addf %627, %626 : vector<8x128xf32>
    %629 = arith.divf %627, %628 : vector<8x128xf32>
    %630 = vector.extract_strided_slice %623 {offsets = [0, 128], sizes = [8, 128], strides = [1, 1]} : vector<8x512xf32> to vector<8x128xf32>
    %631 = arith.negf %630 : vector<8x128xf32>
    %632 = math.exp %631 : vector<8x128xf32>
    %cst_333 = arith.constant 1.000000e+00 : f32
    %633 = vector.broadcast %cst_333 : f32 to vector<8x128xf32>
    %634 = arith.addf %633, %632 : vector<8x128xf32>
    %635 = arith.divf %633, %634 : vector<8x128xf32>
    %636 = vector.extract_strided_slice %623 {offsets = [0, 256], sizes = [8, 128], strides = [1, 1]} : vector<8x512xf32> to vector<8x128xf32>
    %637 = math.tanh %636 : vector<8x128xf32>
    %638 = vector.extract_strided_slice %623 {offsets = [0, 384], sizes = [8, 128], strides = [1, 1]} : vector<8x512xf32> to vector<8x128xf32>
    %639 = arith.negf %638 : vector<8x128xf32>
    %640 = math.exp %639 : vector<8x128xf32>
    %cst_334 = arith.constant 1.000000e+00 : f32
    %641 = vector.broadcast %cst_334 : f32 to vector<8x128xf32>
    %642 = arith.addf %641, %640 : vector<8x128xf32>
    %643 = arith.divf %641, %642 : vector<8x128xf32>
    %644 = arith.mulf %635, %618 : vector<8x128xf32>
    %645 = arith.mulf %629, %637 : vector<8x128xf32>
    %646 = arith.addf %644, %645 : vector<8x128xf32>
    %647 = math.tanh %646 : vector<8x128xf32>
    %648 = arith.mulf %643, %647 : vector<8x128xf32>
    %c0_335 = arith.constant 0 : index
    %c0_336 = arith.constant 0 : index
    %c0_337 = arith.constant 0 : index
    %649 = vector.load %arg21[%c0_335, %c0_336, %c0_337] : memref<2x8x128xf32, #tpu.memory_space<vmem>>, vector<1x8x128xf32>
    %650 = vector.shape_cast %649 : vector<1x8x128xf32> to vector<8x128xf32>
    %651 = vector.shape_cast %648 : vector<8x128xf32> to vector<1x8x128xf32>
    tpu.vector_store %arg21[%c0_335, %c0_336, %c0_337], %651 {strides = array<i32>} : memref<2x8x128xf32, #tpu.memory_space<vmem>>, vector<1x8x128xf32>,
    %c1_338 = arith.constant 1 : index
    %c0_339 = arith.constant 0 : index
    %c0_340 = arith.constant 0 : index
    %652 = vector.load %arg21[%c1_338, %c0_339, %c0_340] : memref<2x8x128xf32, #tpu.memory_space<vmem>>, vector<1x8x128xf32>
    %653 = vector.shape_cast %652 : vector<1x8x128xf32> to vector<8x128xf32>
    %654 = vector.shape_cast %646 : vector<8x128xf32> to vector<1x8x128xf32>
    tpu.vector_store %arg21[%c1_338, %c0_339, %c0_340], %654 {strides = array<i32>} : memref<2x8x128xf32, #tpu.memory_space<vmem>>, vector<1x8x128xf32>,
    %655 = arith.index_cast %c1_i32_322 : i32 to index
    %c0_341 = arith.constant 0 : index
    %c0_342 = arith.constant 0 : index
    %656 = vector.load %arg23[%655, %c0_341, %c0_342] : memref<4x8x128xf32, #tpu.memory_space<vmem>>, vector<1x8x128xf32>
    %657 = vector.shape_cast %656 : vector<1x8x128xf32> to vector<8x128xf32>
    %658 = vector.shape_cast %648 : vector<8x128xf32> to vector<1x8x128xf32>
    tpu.vector_store %arg23[%655, %c0_341, %c0_342], %658 {strides = array<i32>} : memref<4x8x128xf32, #tpu.memory_space<vmem>>, vector<1x8x128xf32>,
    %c2_i32_343 = arith.constant 2 : i32
    %c0_344 = arith.constant 0 : index
    %c0_345 = arith.constant 0 : index
    %c0_346 = arith.constant 0 : index
    %659 = vector.load %arg21[%c0_344, %c0_345, %c0_346] : memref<2x8x128xf32, #tpu.memory_space<vmem>>, vector<1x8x128xf32>
    %660 = vector.shape_cast %659 : vector<1x8x128xf32> to vector<8x128xf32>
    %c1_347 = arith.constant 1 : index
    %c0_348 = arith.constant 0 : index
    %c0_349 = arith.constant 0 : index
    %661 = vector.load %arg21[%c1_347, %c0_348, %c0_349] : memref<2x8x128xf32, #tpu.memory_space<vmem>>, vector<1x8x128xf32>
    %662 = vector.shape_cast %661 : vector<1x8x128xf32> to vector<8x128xf32>
    %663 = arith.index_cast %c2_i32_343 : i32 to index
    %c0_350 = arith.constant 0 : index
    %c0_351 = arith.constant 0 : index
    %664 = vector.load %arg25[%663, %c0_350, %c0_351] : memref<4x8x512xf32, #tpu.memory_space<vmem>>, vector<1x8x512xf32>
    %665 = vector.shape_cast %664 : vector<1x8x512xf32> to vector<8x512xf32>
    %cst_352 = arith.constant dense<0.000000e+00> : vector<8x512xf32>
    %666 = tpu.matmul %660, %570, %cst_352 {dimension_numbers = #tpu.dot_dimension_numbers<[1], [0], [0], [1], [0, 0, 1, 1], [], []>} : vector<8x128xf32>, vector<128x512xf32>, vector<8x512xf32> -> vector<8x512xf32>
    %667 = arith.addf %665, %666 : vector<8x512xf32>
    %668 = vector.extract_strided_slice %667 {offsets = [0, 0], sizes = [8, 128], strides = [1, 1]} : vector<8x512xf32> to vector<8x128xf32>
    %669 = arith.negf %668 : vector<8x128xf32>
    %670 = math.exp %669 : vector<8x128xf32>
    %cst_353 = arith.constant 1.000000e+00 : f32
    %671 = vector.broadcast %cst_353 : f32 to vector<8x128xf32>
    %672 = arith.addf %671, %670 : vector<8x128xf32>
    %673 = arith.divf %671, %672 : vector<8x128xf32>
    %674 = vector.extract_strided_slice %667 {offsets = [0, 128], sizes = [8, 128], strides = [1, 1]} : vector<8x512xf32> to vector<8x128xf32>
    %675 = arith.negf %674 : vector<8x128xf32>
    %676 = math.exp %675 : vector<8x128xf32>
    %cst_354 = arith.constant 1.000000e+00 : f32
    %677 = vector.broadcast %cst_354 : f32 to vector<8x128xf32>
    %678 = arith.addf %677, %676 : vector<8x128xf32>
    %679 = arith.divf %677, %678 : vector<8x128xf32>
    %680 = vector.extract_strided_slice %667 {offsets = [0, 256], sizes = [8, 128], strides = [1, 1]} : vector<8x512xf32> to vector<8x128xf32>
    %681 = math.tanh %680 : vector<8x128xf32>
    %682 = vector.extract_strided_slice %667 {offsets = [0, 384], sizes = [8, 128], strides = [1, 1]} : vector<8x512xf32> to vector<8x128xf32>
    %683 = arith.negf %682 : vector<8x128xf32>
    %684 = math.exp %683 : vector<8x128xf32>
    %cst_355 = arith.constant 1.000000e+00 : f32
    %685 = vector.broadcast %cst_355 : f32 to vector<8x128xf32>
    %686 = arith.addf %685, %684 : vector<8x128xf32>
    %687 = arith.divf %685, %686 : vector<8x128xf32>
    %688 = arith.mulf %679, %662 : vector<8x128xf32>
    %689 = arith.mulf %673, %681 : vector<8x128xf32>
    %690 = arith.addf %688, %689 : vector<8x128xf32>
    %691 = math.tanh %690 : vector<8x128xf32>
    %692 = arith.mulf %687, %691 : vector<8x128xf32>
    %c0_356 = arith.constant 0 : index
    %c0_357 = arith.constant 0 : index
    %c0_358 = arith.constant 0 : index
    %693 = vector.load %arg21[%c0_356, %c0_357, %c0_358] : memref<2x8x128xf32, #tpu.memory_space<vmem>>, vector<1x8x128xf32>
    %694 = vector.shape_cast %693 : vector<1x8x128xf32> to vector<8x128xf32>
    %695 = vector.shape_cast %692 : vector<8x128xf32> to vector<1x8x128xf32>
    tpu.vector_store %arg21[%c0_356, %c0_357, %c0_358], %695 {strides = array<i32>} : memref<2x8x128xf32, #tpu.memory_space<vmem>>, vector<1x8x128xf32>,
    %c1_359 = arith.constant 1 : index
    %c0_360 = arith.constant 0 : index
    %c0_361 = arith.constant 0 : index
    %696 = vector.load %arg21[%c1_359, %c0_360, %c0_361] : memref<2x8x128xf32, #tpu.memory_space<vmem>>, vector<1x8x128xf32>
    %697 = vector.shape_cast %696 : vector<1x8x128xf32> to vector<8x128xf32>
    %698 = vector.shape_cast %690 : vector<8x128xf32> to vector<1x8x128xf32>
    tpu.vector_store %arg21[%c1_359, %c0_360, %c0_361], %698 {strides = array<i32>} : memref<2x8x128xf32, #tpu.memory_space<vmem>>, vector<1x8x128xf32>,
    %699 = arith.index_cast %c2_i32_343 : i32 to index
    %c0_362 = arith.constant 0 : index
    %c0_363 = arith.constant 0 : index
    %700 = vector.load %arg23[%699, %c0_362, %c0_363] : memref<4x8x128xf32, #tpu.memory_space<vmem>>, vector<1x8x128xf32>
    %701 = vector.shape_cast %700 : vector<1x8x128xf32> to vector<8x128xf32>
    %702 = vector.shape_cast %692 : vector<8x128xf32> to vector<1x8x128xf32>
    tpu.vector_store %arg23[%699, %c0_362, %c0_363], %702 {strides = array<i32>} : memref<4x8x128xf32, #tpu.memory_space<vmem>>, vector<1x8x128xf32>,
    %c3_i32_364 = arith.constant 3 : i32
    %c0_365 = arith.constant 0 : index
    %c0_366 = arith.constant 0 : index
    %c0_367 = arith.constant 0 : index
    %703 = vector.load %arg21[%c0_365, %c0_366, %c0_367] : memref<2x8x128xf32, #tpu.memory_space<vmem>>, vector<1x8x128xf32>
    %704 = vector.shape_cast %703 : vector<1x8x128xf32> to vector<8x128xf32>
    %c1_368 = arith.constant 1 : index
    %c0_369 = arith.constant 0 : index
    %c0_370 = arith.constant 0 : index
    %705 = vector.load %arg21[%c1_368, %c0_369, %c0_370] : memref<2x8x128xf32, #tpu.memory_space<vmem>>, vector<1x8x128xf32>
    %706 = vector.shape_cast %705 : vector<1x8x128xf32> to vector<8x128xf32>
    %707 = arith.index_cast %c3_i32_364 : i32 to index
    %c0_371 = arith.constant 0 : index
    %c0_372 = arith.constant 0 : index
    %708 = vector.load %arg25[%707, %c0_371, %c0_372] : memref<4x8x512xf32, #tpu.memory_space<vmem>>, vector<1x8x512xf32>
    %709 = vector.shape_cast %708 : vector<1x8x512xf32> to vector<8x512xf32>
    %cst_373 = arith.constant dense<0.000000e+00> : vector<8x512xf32>
    %710 = tpu.matmul %704, %570, %cst_373 {dimension_numbers = #tpu.dot_dimension_numbers<[1], [0], [0], [1], [0, 0, 1, 1], [], []>} : vector<8x128xf32>, vector<128x512xf32>, vector<8x512xf32> -> vector<8x512xf32>
    %711 = arith.addf %709, %710 : vector<8x512xf32>
    %712 = vector.extract_strided_slice %711 {offsets = [0, 0], sizes = [8, 128], strides = [1, 1]} : vector<8x512xf32> to vector<8x128xf32>
    %713 = arith.negf %712 : vector<8x128xf32>
    %714 = math.exp %713 : vector<8x128xf32>
    %cst_374 = arith.constant 1.000000e+00 : f32
    %715 = vector.broadcast %cst_374 : f32 to vector<8x128xf32>
    %716 = arith.addf %715, %714 : vector<8x128xf32>
    %717 = arith.divf %715, %716 : vector<8x128xf32>
    %718 = vector.extract_strided_slice %711 {offsets = [0, 128], sizes = [8, 128], strides = [1, 1]} : vector<8x512xf32> to vector<8x128xf32>
    %719 = arith.negf %718 : vector<8x128xf32>
    %720 = math.exp %719 : vector<8x128xf32>
    %cst_375 = arith.constant 1.000000e+00 : f32
    %721 = vector.broadcast %cst_375 : f32 to vector<8x128xf32>
    %722 = arith.addf %721, %720 : vector<8x128xf32>
    %723 = arith.divf %721, %722 : vector<8x128xf32>
    %724 = vector.extract_strided_slice %711 {offsets = [0, 256], sizes = [8, 128], strides = [1, 1]} : vector<8x512xf32> to vector<8x128xf32>
    %725 = math.tanh %724 : vector<8x128xf32>
    %726 = vector.extract_strided_slice %711 {offsets = [0, 384], sizes = [8, 128], strides = [1, 1]} : vector<8x512xf32> to vector<8x128xf32>
    %727 = arith.negf %726 : vector<8x128xf32>
    %728 = math.exp %727 : vector<8x128xf32>
    %cst_376 = arith.constant 1.000000e+00 : f32
    %729 = vector.broadcast %cst_376 : f32 to vector<8x128xf32>
    %730 = arith.addf %729, %728 : vector<8x128xf32>
    %731 = arith.divf %729, %730 : vector<8x128xf32>
    %732 = arith.mulf %723, %706 : vector<8x128xf32>
    %733 = arith.mulf %717, %725 : vector<8x128xf32>
    %734 = arith.addf %732, %733 : vector<8x128xf32>
    %735 = math.tanh %734 : vector<8x128xf32>
    %736 = arith.mulf %731, %735 : vector<8x128xf32>
    %c0_377 = arith.constant 0 : index
    %c0_378 = arith.constant 0 : index
    %c0_379 = arith.constant 0 : index
    %737 = vector.load %arg21[%c0_377, %c0_378, %c0_379] : memref<2x8x128xf32, #tpu.memory_space<vmem>>, vector<1x8x128xf32>
    %738 = vector.shape_cast %737 : vector<1x8x128xf32> to vector<8x128xf32>
    %739 = vector.shape_cast %736 : vector<8x128xf32> to vector<1x8x128xf32>
    tpu.vector_store %arg21[%c0_377, %c0_378, %c0_379], %739 {strides = array<i32>} : memref<2x8x128xf32, #tpu.memory_space<vmem>>, vector<1x8x128xf32>,
    %c1_380 = arith.constant 1 : index
    %c0_381 = arith.constant 0 : index
    %c0_382 = arith.constant 0 : index
    %740 = vector.load %arg21[%c1_380, %c0_381, %c0_382] : memref<2x8x128xf32, #tpu.memory_space<vmem>>, vector<1x8x128xf32>
    %741 = vector.shape_cast %740 : vector<1x8x128xf32> to vector<8x128xf32>
    %742 = vector.shape_cast %734 : vector<8x128xf32> to vector<1x8x128xf32>
    tpu.vector_store %arg21[%c1_380, %c0_381, %c0_382], %742 {strides = array<i32>} : memref<2x8x128xf32, #tpu.memory_space<vmem>>, vector<1x8x128xf32>,
    %743 = arith.index_cast %c3_i32_364 : i32 to index
    %c0_383 = arith.constant 0 : index
    %c0_384 = arith.constant 0 : index
    %744 = vector.load %arg23[%743, %c0_383, %c0_384] : memref<4x8x128xf32, #tpu.memory_space<vmem>>, vector<1x8x128xf32>
    %745 = vector.shape_cast %744 : vector<1x8x128xf32> to vector<8x128xf32>
    %746 = vector.shape_cast %736 : vector<8x128xf32> to vector<1x8x128xf32>
    tpu.vector_store %arg23[%743, %c0_383, %c0_384], %746 {strides = array<i32>} : memref<4x8x128xf32, #tpu.memory_space<vmem>>, vector<1x8x128xf32>,
    %c4_i32_385 = arith.constant 4 : i32
    %c0_386 = arith.constant 0 : index
    %c0_387 = arith.constant 0 : index
    %c0_388 = arith.constant 0 : index
    %747 = vector.load %arg23[%c0_386, %c0_387, %c0_388] : memref<4x8x128xf32, #tpu.memory_space<vmem>>, vector<4x8x128xf32>
    %748 = tpu.iota {dimensions = array<i32: 2>} : vector<1x1x128xi32>
    %c16_i32 = arith.constant 16 : i32
    %749 = vector.broadcast %c16_i32 : i32 to vector<1x1x128xi32>
    %750 = arith.cmpi slt, %748, %749 : vector<1x1x128xi32>
    %751 = arith.extui %750 : vector<1x1x128xi1> to vector<1x1x128xi32>
    %752 = arith.sitofp %751 : vector<1x1x128xi32> to vector<1x1x128xf32>
    %753 = vector.broadcast %752 : vector<1x1x128xf32> to vector<4x8x128xf32>
    %754 = arith.mulf %747, %753 : vector<4x8x128xf32>
    %cst_389 = arith.constant dense<0.000000e+00> : vector<4x8xf32>
    %755 = vector.multi_reduction <add>, %754, %cst_389 [2] : vector<4x8x128xf32> to vector<4x8xf32>
    %756 = vector.shape_cast %755 : vector<4x8xf32> to vector<4x8x1xf32>
    %cst_390 = arith.constant 6.250000e-02 : f32
    %757 = vector.broadcast %cst_390 : f32 to vector<4x8x1xf32>
    %758 = arith.mulf %756, %757 : vector<4x8x1xf32>
    %759 = vector.broadcast %758 : vector<4x8x1xf32> to vector<4x8x128xf32>
    %760 = arith.subf %747, %759 : vector<4x8x128xf32>
    %761 = vector.broadcast %752 : vector<1x1x128xf32> to vector<4x8x128xf32>
    %762 = arith.mulf %760, %761 : vector<4x8x128xf32>
    %763 = arith.mulf %762, %762 : vector<4x8x128xf32>
    %cst_391 = arith.constant dense<0.000000e+00> : vector<4x8xf32>
    %764 = vector.multi_reduction <add>, %763, %cst_391 [2] : vector<4x8x128xf32> to vector<4x8xf32>
    %765 = vector.shape_cast %764 : vector<4x8xf32> to vector<4x8x1xf32>
    %cst_392 = arith.constant 6.250000e-02 : f32
    %766 = vector.broadcast %cst_392 : f32 to vector<4x8x1xf32>
    %767 = arith.mulf %765, %766 : vector<4x8x1xf32>
    %cst_393 = arith.constant 9.99999974E-6 : f32
    %768 = vector.broadcast %cst_393 : f32 to vector<4x8x1xf32>
    %769 = arith.addf %767, %768 : vector<4x8x1xf32>
    %770 = math.rsqrt %769 : vector<4x8x1xf32>
    %771 = vector.broadcast %770 : vector<4x8x1xf32> to vector<4x8x128xf32>
    %772 = arith.mulf %762, %771 : vector<4x8x128xf32>
    %c0_394 = arith.constant 0 : index
    %c0_395 = arith.constant 0 : index
    %773 = vector.load %arg15[%c0_394, %c0_395] : memref<1x128xf32, #tpu.memory_space<vmem>>, vector<1x128xf32>
    %774 = vector.shape_cast %773 : vector<1x128xf32> to vector<1x1x128xf32>
    %775 = vector.broadcast %774 : vector<1x1x128xf32> to vector<4x8x128xf32>
    %776 = arith.mulf %772, %775 : vector<4x8x128xf32>
    %c0_396 = arith.constant 0 : index
    %c0_397 = arith.constant 0 : index
    %777 = vector.load %arg16[%c0_396, %c0_397] : memref<1x128xf32, #tpu.memory_space<vmem>>, vector<1x128xf32>
    %778 = vector.shape_cast %777 : vector<1x128xf32> to vector<1x1x128xf32>
    %779 = vector.broadcast %778 : vector<1x1x128xf32> to vector<4x8x128xf32>
    %780 = arith.addf %776, %779 : vector<4x8x128xf32>
    %c0_398 = arith.constant 0 : index
    %c0_399 = arith.constant 0 : index
    %c0_400 = arith.constant 0 : index
    %781 = vector.load %arg17[%c0_398, %c0_399, %c0_400] : memref<4x8x128xf32, #tpu.memory_space<vmem>>, vector<4x8x128xf32>
    tpu.vector_store %arg17[%c0_398, %c0_399, %c0_400], %780 {strides = array<i32>} : memref<4x8x128xf32, #tpu.memory_space<vmem>>, vector<4x8x128xf32>,
    return
  }
  func.func @transform_0(%arg0: i32, %arg1: i32) -> (i32, i32, i32) {
    %c0_i32 = arith.constant 0 : i32
    %c0_i32_0 = arith.constant 0 : i32
    return %arg1, %arg0, %c0_i32 : i32, i32, i32
  }
  func.func @transform_1(%arg0: i32, %arg1: i32) -> (i32, i32) {
    %c0_i32 = arith.constant 0 : i32
    %c0_i32_0 = arith.constant 0 : i32
    %c0_i32_1 = arith.constant 0 : i32
    return %c0_i32, %c0_i32_0 : i32, i32
  }
  func.func @transform_2(%arg0: i32, %arg1: i32) -> (i32, i32) {
    %c0_i32 = arith.constant 0 : i32
    %c0_i32_0 = arith.constant 0 : i32
    %c0_i32_1 = arith.constant 0 : i32
    return %c0_i32, %c0_i32_0 : i32, i32
  }
  func.func @transform_3(%arg0: i32, %arg1: i32) -> (i32, i32) {
    %c0_i32 = arith.constant 0 : i32
    %c0_i32_0 = arith.constant 0 : i32
    %c0_i32_1 = arith.constant 0 : i32
    return %c0_i32, %c0_i32_0 : i32, i32
  }
  func.func @transform_4(%arg0: i32, %arg1: i32) -> (i32, i32) {
    %c0_i32 = arith.constant 0 : i32
    %c0_i32_0 = arith.constant 0 : i32
    %c0_i32_1 = arith.constant 0 : i32
    return %c0_i32, %c0_i32_0 : i32, i32
  }
  func.func @transform_5(%arg0: i32, %arg1: i32) -> (i32, i32) {
    %c0_i32 = arith.constant 0 : i32
    %c0_i32_0 = arith.constant 0 : i32
    %c0_i32_1 = arith.constant 0 : i32
    return %c0_i32, %c0_i32_0 : i32, i32
  }
  func.func @transform_6(%arg0: i32, %arg1: i32) -> (i32, i32) {
    %c0_i32 = arith.constant 0 : i32
    %c0_i32_0 = arith.constant 0 : i32
    %c0_i32_1 = arith.constant 0 : i32
    return %c0_i32, %c0_i32_0 : i32, i32
  }
  func.func @transform_7(%arg0: i32, %arg1: i32) -> (i32, i32) {
    %c0_i32 = arith.constant 0 : i32
    %c0_i32_0 = arith.constant 0 : i32
    %c0_i32_1 = arith.constant 0 : i32
    return %c0_i32, %c0_i32_0 : i32, i32
  }
  func.func @transform_8(%arg0: i32, %arg1: i32) -> (i32, i32) {
    %c0_i32 = arith.constant 0 : i32
    %c0_i32_0 = arith.constant 0 : i32
    %c0_i32_1 = arith.constant 0 : i32
    return %c0_i32, %c0_i32_0 : i32, i32
  }
  func.func @transform_9(%arg0: i32, %arg1: i32) -> (i32, i32) {
    %c0_i32 = arith.constant 0 : i32
    %c0_i32_0 = arith.constant 0 : i32
    %c0_i32_1 = arith.constant 0 : i32
    return %c0_i32, %c0_i32_0 : i32, i32
  }
  func.func @transform_10(%arg0: i32, %arg1: i32) -> (i32, i32) {
    %c0_i32 = arith.constant 0 : i32
    %c0_i32_0 = arith.constant 0 : i32
    %c0_i32_1 = arith.constant 0 : i32
    return %c0_i32, %c0_i32_0 : i32, i32
  }
  func.func @transform_11(%arg0: i32, %arg1: i32) -> (i32, i32) {
    %c0_i32 = arith.constant 0 : i32
    %c0_i32_0 = arith.constant 0 : i32
    %c0_i32_1 = arith.constant 0 : i32
    return %c0_i32, %c0_i32_0 : i32, i32
  }
  func.func @transform_12(%arg0: i32, %arg1: i32) -> (i32, i32) {
    %c0_i32 = arith.constant 0 : i32
    %c0_i32_0 = arith.constant 0 : i32
    %c0_i32_1 = arith.constant 0 : i32
    return %c0_i32, %c0_i32_0 : i32, i32
  }
  func.func @transform_13(%arg0: i32, %arg1: i32) -> (i32, i32) {
    %c0_i32 = arith.constant 0 : i32
    %c0_i32_0 = arith.constant 0 : i32
    %c0_i32_1 = arith.constant 0 : i32
    return %c0_i32, %c0_i32_0 : i32, i32
  }
  func.func @transform_14(%arg0: i32, %arg1: i32) -> (i32, i32) {
    %c0_i32 = arith.constant 0 : i32
    %c0_i32_0 = arith.constant 0 : i32
    %c0_i32_1 = arith.constant 0 : i32
    return %c0_i32, %c0_i32_0 : i32, i32
  }
  func.func @transform_15(%arg0: i32, %arg1: i32) -> (i32, i32, i32) {
    %c0_i32 = arith.constant 0 : i32
    %c0_i32_0 = arith.constant 0 : i32
    return %arg1, %arg0, %c0_i32 : i32, i32, i32
  }
}

</mosaic_0001>

<bundles_post_ra>
// kernel: tpu_custom_call.1
= control target key start
LH: loop header
LB: loop body
LE: loop exit
PB: predicated region body
PF: predicated region fallthrough
CT: control target
= control target key end

     0   :  { %s8998_s0 = inlined_call_operand.hbm [shape: f32[8,8,16], index: 0, kind: input, shape index: {}]   ;;  %s8999_s1 = inlined_call_operand.hbm [shape: f32[16,512], index: 1, kind: input, shape index: {}]   ;;  %s9000_s2 = inlined_call_operand.hbm [shape: f32[128,512], index: 2, kind: input, shape index: {}]   ;;  %s9001_s3 = inlined_call_operand.vmem [shape: f32[1,512], index: 3, kind: input, shape index: {}]   ;;  %s9002_s4 = inlined_call_operand.hbm [shape: f32[128,512], index: 4, kind: input, shape index: {}]   ;;  %s9003_s5 = inlined_call_operand.hbm [shape: f32[128,512], index: 5, kind: input, shape index: {}]   ;;  %s9004_s6 = inlined_call_operand.vmem [shape: f32[1,512], index: 6, kind: input, shape index: {}]   ;;  %s9005_s7 = inlined_call_operand.hbm [shape: f32[128,512], index: 7, kind: input, shape index: {}]   ;;  %s9006_s8 = inlined_call_operand.hbm [shape: f32[128,512], index: 8, kind: input, shape index: {}]   ;;  %s9007_s9 = inlined_call_operand.vmem [shape: f32[1,512], index: 9, kind: input, shape index: {}]   ;;  %s9008_s10 = inlined_call_operand.hbm [shape: f32[128,512], index: 10, kind: input, shape index: {}]   ;;  %s9009_s11 = inlined_call_operand.hbm [shape: f32[128,512], index: 11, kind: input, shape index: {}]   ;;  %s9010_s12 = inlined_call_operand.vmem [shape: f32[1,512], index: 12, kind: input, shape index: {}]   ;;  %s9011_s13 = inlined_call_operand.vmem [shape: f32[1,128], index: 13, kind: input, shape index: {}]   ;;  %s9012_s14 = inlined_call_operand.vmem [shape: f32[1,128], index: 14, kind: input, shape index: {}]   ;;  %s9013_s15 = inlined_call_operand.hbm [shape: f32[8,8,128], index: 15, kind: output, shape index: {}]  }
   0x1   :  { %9021 = sst [smem:[#allocation34_spill]] %s8999_s1 }
   0x2   :  { %9022 = sst [smem:[#allocation35_spill]] %s9001_s3 }
   0x3   :  { %9023 = sst [smem:[#allocation36_spill]] %s9004_s6 }
   0x4   :  { %9024 = sst [smem:[#allocation37_spill]] %s9007_s9 }
   0x5   :  { %9025 = sst [smem:[#allocation38_spill]] %s9010_s12 }
   0x6   :  { %9026 = sst [smem:[#allocation39_spill]] %s9011_s13 }
   0x7   :  { %9027 = sst [smem:[#allocation40_spill]] %s9012_s14 }
   0x8   :  { %9028 = sst [smem:[#allocation41_spill]] %s9013_s15 }
   0x9   :  { %20 = vsyncpa [#allocation11], 0 }
   0xa   :  { %22 = vsyncpa [#allocation11 + $0x1], 0 }
   0xb   :  { %23 = vsyncpa [#allocation14], 0 }
   0xc   :  { %24 = vsyncpa [#allocation17], 0 }
   0xd   :  { %25 = vsyncpa [#allocation20], 0 }
   0xe   :  { %26 = vsyncpa [#allocation23], 0 }
   0xf   :  { %27 = vsyncpa [#allocation12], 0 }
  0x10   :  { %29 = vsyncpa [#allocation12 + $0x1], 0  ;;  %s7464_s18 = smov 0   ;;  %s7466_s19 = smov 0  }
  0x11   :  { %s7468_s20 = smov 0   ;;  %s7470_s21 = smov 0  }
  0x12   :  { %s7472_s22 = smov 0   ;;  %s7474_s23 = smov 0  }
  0x13 LB: > { %9029 = sst [smem:[#allocation32_spill]] %s7356_s21  ;;  %s9014_s24 = sadd.s32 4294967295, %s7364_s23   ;;  %s7364_s23 = sphi %s7474_s23, %s35_s23   ;;  %s7360_s22 = sphi %s7472_s22, %s9063_s22   ;;  %s7356_s21 = sphi %s7470_s21, %s9062_s21   ;;  %s7352_s20 = sphi %s7468_s20, %s9061_s20   ;;  %s7348_s19 = sphi %s7466_s19, %s9060_s19   ;;  %s7344_s18 = sphi %s7464_s18, %s9059_s18  }
  0x14   : > { %p5154_p0 = scmp.ge.s32.totalorder %s7364_s23, 1  ;;  %p7498_p1 = scmp.eq.s32.totalorder %s9014_s24, 0 }
  0x15   : > { %p402_p2 = scmp.lt.s32.totalorder %s7364_s23, 3  ;;  %s7366_s27 = smov [#allocation13]  }
  0x16   : > { %s9030_s25 = scalar_select %p7498_p1, 1, 0 }
  0x17   : > { %p7503_p3 = pnand %p5154_p0, %p402_p2  ;;  %s414_s28 = sshll.u32 %s7366_s27, 4  ;;  %s7507_s28 = int_to_ptr.vmem [resolvable:$true] %s414_s28 }
  0x18   : > { %s7367_s30 = smov [#allocation16]   ;;  %s7368_s17 = smov [#allocation19]  }
  0x19   : > { %s9031_s26 = scalar_select %p7503_p3, 1, 0 }
  0x1a   : > { %p6633_p4 = pneg %p7503_p3  ;;  %s443_s16 = sshll.u32 %s7367_s30, 4  ;;  %s7518_s16 = int_to_ptr.vmem [resolvable:$true] %s443_s16 }
  0x1b   : > { %9032 = sst [smem:[#allocation33_spill]] %s9031_s26  ;;  %s7520_s24 = sshll.u32 %s7368_s17, 4  ;;  %s473_s24 = int_to_ptr.vmem [resolvable:$true] %s7520_s24 }
  0x1c   : > { %p7514_p6 = pnand %p6633_p4, %p7498_p1  ;;  %s9034_s1 = sld [smem:[#allocation34_spill]] }
  0x1e   : > { %p7530_p8 = pneg %p7514_p6 }
  0x22   : > { %s7012_s14 = scalar_lea.hbm %s9034_s1, 1024 }
  0x23   : > { %p7013_p7 = scmp.ne.s32.totalorder %s9034_s1, %s7012_s14  ;;  %p7019_p11 = scmp.lt.u32.totalorder %s7012_s14, %s9034_s1 }
  0x25   : > { %p7015_p9 = pnand %p7530_p8, %p7013_p7 }
  0x27   : > { %p7016_p10 = pneg %p7015_p9 }
  0x29   : > { %p7021_p12 = pnand %p7019_p11, %p7016_p10 }
  0x2b   : > { %7024 = shalt.err (!%p7021_p12)
}
  0x2c   : > { %s7025_s12 = scalar_lea.vmem %s7507_s28, 1024  ;;  %p7033_p4 = scmp.lt.s32.totalorder %s7507_s28, %s7507_s28 }
  0x2d   : > { %p7026_p13 = scmp.ne.s32.totalorder %s7507_s28, %s7025_s12  ;;  %p7034_p5 = scmp.lt.s32.totalorder %s7025_s12, %s7025_s12 }
  0x2f   : > { %p7028_p0 = pnand %p7026_p13, %p7530_p8  ;;  %p7035_p7 = por %p7034_p5, %p7033_p4 }
  0x31   : > { %p7029_p2 = pneg %p7028_p0 }
  0x33   : > { %p7036_p9 = pnand %p7035_p7, %p7029_p2 }
  0x35   : > { %7039 = shalt.err (!%p7036_p9)
}
  0x36   : > { %s7369_s13 = smov 512   ;;  %s7370_s14 = smov 32  }
  0x37   : > { %6636 = dma.hbm_to_vmem [thread:$0]  (!%p7514_p6), %s9034_s1, 1024, %s7507_s28, [#allocation14], %s7369_s13, %s7369_s13, %s7370_s14  }
  0x38   : > { %s7040_s12 = scalar_lea.hbm %s9002_s4, 8192 }
  0x39   : > { %p7041_p5 = scmp.ne.s32.totalorder %s9002_s4, %s7040_s12  ;;  %p7047_p12 = scmp.lt.u32.totalorder %s7040_s12, %s9002_s4 }
  0x3b   : > { %p7043_p10 = pnand %p7041_p5, %p7530_p8 }
  0x3d   : > { %p7044_p11 = pneg %p7043_p10 }
  0x3f   : > { %p7049_p13 = pnand %p7047_p12, %p7044_p11 }
  0x41   : > { %7052 = shalt.err (!%p7049_p13)
}
  0x42   : > { %s7053_s28 = scalar_lea.vmem %s7518_s16, 8192  ;;  %p7061_p7 = scmp.lt.s32.totalorder %s7518_s16, %s7518_s16 }
  0x43   : > { %p7054_p0 = scmp.ne.s32.totalorder %s7518_s16, %s7053_s28  ;;  %p7062_p9 = scmp.lt.s32.totalorder %s7053_s28, %s7053_s28 }
  0x45   : > { %p7056_p2 = pnand %p7054_p0, %p7530_p8  ;;  %p7063_p5 = por %p7062_p9, %p7061_p7 }
  0x47   : > { %p7057_p4 = pneg %p7056_p2 }
  0x49   : > { %p7064_p10 = pnand %p7063_p5, %p7057_p4 }
  0x4b   : > { %7067 = shalt.err (!%p7064_p10)
}
  0x4c   : > { %6642 = dma.hbm_to_vmem [thread:$0]  (!%p7514_p6), %s9002_s4, 8192, %s7518_s16, [#allocation17], %s7369_s13, %s7369_s13, %s7370_s14  }
  0x4d   : > { %s7068_s15 = scalar_lea.hbm %s9005_s7, 8192 }
  0x4e   : > { %p7069_p11 = scmp.ne.s32.totalorder %s9005_s7, %s7068_s15  ;;  %p7075_p0 = scmp.lt.u32.totalorder %s7068_s15, %s9005_s7 }
  0x50   : > { %p7071_p12 = pnand %p7069_p11, %p7530_p8 }
  0x52   : > { %p7072_p13 = pneg %p7071_p12 }
  0x54   : > { %p7077_p2 = pnand %p7075_p0, %p7072_p13 }
  0x56   : > { %7080 = shalt.err (!%p7077_p2)
}
  0x57   : > { %s7081_s28 = scalar_lea.vmem %s473_s24, 8192  ;;  %p7089_p5 = scmp.lt.s32.totalorder %s473_s24, %s473_s24 }
  0x58   : > { %p7082_p4 = scmp.ne.s32.totalorder %s473_s24, %s7081_s28  ;;  %p7090_p10 = scmp.lt.s32.totalorder %s7081_s28, %s7081_s28 }
  0x5a   : > { %p7084_p7 = pnand %p7082_p4, %p7530_p8  ;;  %p7091_p3 = por %p7090_p10, %p7089_p5 }
  0x5c   : > { %p7085_p9 = pneg %p7084_p7 }
  0x5e   : > { %p7092_p1 = pnand %p7091_p3, %p7085_p9 }
  0x60   : > { %7095 = shalt.err (!%p7092_p1)
}
  0x61   : > { %6648 = dma.hbm_to_vmem [thread:$0]  (!%p7514_p6), %s9005_s7, 8192, %s473_s24, [#allocation20], %s7369_s13, %s7369_s13, %s7370_s14  }
  0x62   : > { %s7371_s6 = smov [#allocation22]   ;;  %s7372_s26 = smov [#allocation15]  }
  0x63   : > { %s501_s21 = sshll.u32 %s7371_s6, 4  ;;  %s427_s15 = sshll.u32 %s7372_s26, 4  ;;  %s502_s21 = int_to_ptr.vmem [resolvable:$true] %s501_s21  ;;  %s428_s15 = int_to_ptr.vmem [resolvable:$true] %s427_s15 }
  0x64   : > { %s7096_s17 = scalar_lea.hbm %s9008_s10, 8192 }
  0x65   : > { %p7097_p1 = scmp.ne.s32.totalorder %s9008_s10, %s7096_s17  ;;  %p7103_p12 = scmp.lt.u32.totalorder %s7096_s17, %s9008_s10 }
  0x67   : > { %p7099_p3 = pnand %p7097_p1, %p7530_p8 }
  0x69   : > { %p7100_p11 = pneg %p7099_p3 }
  0x6b   : > { %p7105_p13 = pnand %p7103_p12, %p7100_p11 }
  0x6d   : > { %7108 = shalt.err (!%p7105_p13)
}
  0x6e   : > { %s7109_s24 = scalar_lea.vmem %s502_s21, 8192  ;;  %p7117_p7 = scmp.lt.s32.totalorder %s502_s21, %s502_s21 }
  0x6f   : > { %p7110_p0 = scmp.ne.s32.totalorder %s502_s21, %s7109_s24  ;;  %p7118_p9 = scmp.lt.s32.totalorder %s7109_s24, %s7109_s24 }
  0x71   : > { %p7112_p2 = pnand %p7110_p0, %p7530_p8  ;;  %p7119_p5 = por %p7118_p9, %p7117_p7 }
  0x73   : > { %p7113_p4 = pneg %p7112_p2 }
  0x75   : > { %p7120_p10 = pnand %p7119_p5, %p7113_p4 }
  0x77   : > { %7123 = shalt.err (!%p7120_p10)
}
  0x78   : > { %6654 = dma.hbm_to_vmem [thread:$0]  (!%p7514_p6), %s9008_s10, 8192, %s502_s21, [#allocation23], %s7369_s13, %s7369_s13, %s7370_s14  }
  0x79   : > { %s7124_s27 = scalar_lea.hbm %s9000_s2, 8192 }
  0x7a   : > { %p7125_p1 = scmp.ne.s32.totalorder %s9000_s2, %s7124_s27  ;;  %p7131_p12 = scmp.lt.u32.totalorder %s7124_s27, %s9000_s2 }
  0x7c   : > { %p7127_p3 = pnand %p7125_p1, %p7530_p8 }
  0x7e   : > { %p7128_p11 = pneg %p7127_p3 }
  0x80   : > { %p7133_p13 = pnand %p7131_p12, %p7128_p11 }
  0x82   : > { %7136 = shalt.err (!%p7133_p13)
}
  0x83   : > { %s7137_s16 = scalar_lea.vmem %s428_s15, 8192  ;;  %p7145_p7 = scmp.lt.s32.totalorder %s428_s15, %s428_s15 }
  0x84   : > { %p7138_p0 = scmp.ne.s32.totalorder %s428_s15, %s7137_s16  ;;  %p7146_p9 = scmp.lt.s32.totalorder %s7137_s16, %s7137_s16 }
  0x86   : > { %p7140_p2 = pnand %p7138_p0, %p7530_p8  ;;  %p7147_p5 = por %p7146_p9, %p7145_p7 }
  0x88   : > { %p7141_p4 = pneg %p7140_p2 }
  0x8a   : > { %p7148_p10 = pnand %p7147_p5, %p7141_p4 }
  0x8c   : > { %7151 = shalt.err (!%p7148_p10)
}
  0x8d   : > { %6639 = dma.hbm_to_vmem [thread:$0]  (!%p7514_p6), %s9000_s2, 8192, %s428_s15, [#allocation14], %s7369_s13, %s7369_s13, %s7370_s14  }
  0x8e   : > { %s7373_s1 = smov [#allocation18]   ;;  %s7374_s6 = smov [#allocation21]  }
  0x8f   : > { %s456_s3 = sshll.u32 %s7373_s1, 4  ;;  %s485_s26 = sshll.u32 %s7374_s6, 4  ;;  %s457_s3 = int_to_ptr.vmem [resolvable:$true] %s456_s3  ;;  %s486_s26 = int_to_ptr.vmem [resolvable:$true] %s485_s26 }
  0x90   : > { %s7152_s17 = scalar_lea.hbm %s9003_s5, 8192 }
  0x91   : > { %p7153_p1 = scmp.ne.s32.totalorder %s9003_s5, %s7152_s17  ;;  %p7159_p12 = scmp.lt.u32.totalorder %s7152_s17, %s9003_s5 }
  0x93   : > { %p7155_p3 = pnand %p7153_p1, %p7530_p8 }
  0x95   : > { %p7156_p11 = pneg %p7155_p3 }
  0x97   : > { %p7161_p13 = pnand %p7159_p12, %p7156_p11 }
  0x99   : > { %7164 = shalt.err (!%p7161_p13)
}
  0x9a   : > { %s7165_s15 = scalar_lea.vmem %s457_s3, 8192  ;;  %p7173_p7 = scmp.lt.s32.totalorder %s457_s3, %s457_s3 }
  0x9b   : > { %p7166_p0 = scmp.ne.s32.totalorder %s457_s3, %s7165_s15  ;;  %p7174_p9 = scmp.lt.s32.totalorder %s7165_s15, %s7165_s15 }
  0x9d   : > { %p7168_p2 = pnand %p7166_p0, %p7530_p8  ;;  %p7175_p5 = por %p7174_p9, %p7173_p7 }
  0x9f   : > { %p7169_p4 = pneg %p7168_p2 }
  0xa1   : > { %p7176_p10 = pnand %p7175_p5, %p7169_p4 }
  0xa3   : > { %7179 = shalt.err (!%p7176_p10)
}
  0xa4   : > { %6645 = dma.hbm_to_vmem [thread:$0]  (!%p7514_p6), %s9003_s5, 8192, %s457_s3, [#allocation17], %s7369_s13, %s7369_s13, %s7370_s14  }
  0xa5   : > { %s7180_s30 = scalar_lea.hbm %s9006_s8, 8192 }
  0xa6   : > { %p7181_p1 = scmp.ne.s32.totalorder %s9006_s8, %s7180_s30  ;;  %p7187_p12 = scmp.lt.u32.totalorder %s7180_s30, %s9006_s8 }
  0xa8   : > { %p7183_p3 = pnand %p7181_p1, %p7530_p8 }
  0xaa   : > { %p7184_p11 = pneg %p7183_p3 }
  0xac   : > { %p7189_p13 = pnand %p7187_p12, %p7184_p11 }
  0xae   : > { %7192 = shalt.err (!%p7189_p13)
}
  0xaf   : > { %s7193_s21 = scalar_lea.vmem %s486_s26, 8192  ;;  %p7201_p7 = scmp.lt.s32.totalorder %s486_s26, %s486_s26 }
  0xb0   : > { %p7194_p0 = scmp.ne.s32.totalorder %s486_s26, %s7193_s21  ;;  %p7202_p9 = scmp.lt.s32.totalorder %s7193_s21, %s7193_s21 }
  0xb2   : > { %p7196_p2 = pnand %p7194_p0, %p7530_p8  ;;  %p7203_p5 = por %p7202_p9, %p7201_p7 }
  0xb4   : > { %p7197_p4 = pneg %p7196_p2 }
  0xb6   : > { %p7204_p10 = pnand %p7203_p5, %p7197_p4 }
  0xb8   : > { %7207 = shalt.err (!%p7204_p10)
}
  0xb9   : > { %6651 = dma.hbm_to_vmem [thread:$0]  (!%p7514_p6), %s9006_s8, 8192, %s486_s26, [#allocation20], %s7369_s13, %s7369_s13, %s7370_s14  }
  0xba   : > { %s7375_s24 = smov [#allocation24]   ;;  %s7208_s30 = scalar_lea.hbm %s9009_s11, 8192 }
  0xbb   : > { %s514_s1 = sshll.u32 %s7375_s24, 4  ;;  %p7209_p1 = scmp.ne.s32.totalorder %s9009_s11, %s7208_s30  ;;  %s515_s1 = int_to_ptr.vmem [resolvable:$true] %s514_s1 }
  0xbc   : > { %p7215_p12 = scmp.lt.u32.totalorder %s7208_s30, %s9009_s11 }
  0xbd   : > { %p7211_p3 = pnand %p7209_p1, %p7530_p8 }
  0xbf   : > { %p7212_p11 = pneg %p7211_p3 }
  0xc1   : > { %p7217_p13 = pnand %p7215_p12, %p7212_p11 }
  0xc3   : > { %7220 = shalt.err (!%p7217_p13)
}
  0xc4   : > { %s7221_s26 = scalar_lea.vmem %s515_s1, 8192  ;;  %p7229_p7 = scmp.lt.s32.totalorder %s515_s1, %s515_s1 }
  0xc5   : > { %p7222_p0 = scmp.ne.s32.totalorder %s515_s1, %s7221_s26  ;;  %p7230_p9 = scmp.lt.s32.totalorder %s7221_s26, %s7221_s26 }
  0xc7   : > { %p7224_p2 = pnand %p7222_p0, %p7530_p8  ;;  %p7231_p5 = por %p7230_p9, %p7229_p7 }
  0xc9   : > { %p7225_p4 = pneg %p7224_p2 }
  0xcb   : > { %p7232_p10 = pnand %p7231_p5, %p7225_p4 }
  0xcd   : > { %7235 = shalt.err (!%p7232_p10)
}
  0xce   : > { %6657 = dma.hbm_to_vmem [thread:$0]  (!%p7514_p6), %s9009_s11, 8192, %s515_s1, [#allocation23], %s7369_s13, %s7369_s13, %s7370_s14  }
  0xcf   : > { %s5153_s9 = sadd.s32 4294967294, %s7364_s23   ;;  %s44_s29 = sadd.s32 1, %s7360_s22 }
  0xd0   : > { %p45_p8 = scmp.ge.s32.totalorder %s44_s29, 2  ;;  %s56_s15 = sadd.s32 1, %s7352_s20 }
  0xd1   : > { %p63_p1 = scmp.ne.s32.totalorder %s7352_s20, %s7348_s19  ;;  %p64_p3 = scmp.eq.s32.totalorder %s7364_s23, 0 }
  0xd2   : > { %s9065_s29 = smov (%p45_p8, %s44_s29), 0  ;;  %p69_p12 = scmp.ne.s32.totalorder %s7348_s19, %s7344_s18 }
  0xd3   : > { %p7715_p11 = por %p64_p3, %p63_p1  ;;  %s51_s13 = ssub.s32 %s7360_s22, %s9065_s29 }
  0xd4   : > { %s9037_s14 = sadd.s32 4294967295, %s7364_s23   ;;  %p54_p13 = scmp.eq.s32.totalorder %s51_s13, 0 }
  0xd5   : > { %p389_p6 = scmp.eq.s32.totalorder %s9037_s14, 1  ;;  %p9038_p0 = scmp.ne.s32.totalorder %s9030_s25, 0 }
  0xd6   : > { %p395_p7 = scmp.eq.s32.totalorder %s5153_s9, 1  ;;  %p6674_p5 = scmp.lt.s32.totalorder %s7364_s23, 2 }
  0xd7   : > { %p7727_p2 = por %p9038_p0, %p69_p12  ;;  %p7731_p4 = por %p389_p6, %p63_p1 }
  0xd8   : > { %s7736_s27 = scalar_select %p54_p13, %s7352_s20, %s56_s15  }
  0xd9   : > { %s9040_s6 = scalar_select %p7731_p4, 1, 0 }
  0xda   : > { %p7738_p9 = por %p395_p7, %p69_p12  ;;  %s537_s17 = sand.u32 1, %s7352_s20  }
  0xdb   : > { %s5243_s12 = sshll.u32 %s7360_s22, 9  ;;  %s5164_s28 = sshll.u32 %s537_s17, 5 }
  0xdc   : > { %s9041_s30 = scalar_select %p7738_p9, 1, 0 }
  0xdd   : > { %s7748_s21 = scalar_lea.hbm %s8998_s0, %s5243_s12  ;;  %s541_s3 = scalar_lea.vmem [#allocation10], %s5164_s28 }
  0xde   : > { %s549_s9 = sshll.u32 %s541_s3, 4  ;;  %p7752_p10 = pnand %p6674_p5, %p7715_p11  ;;  %s7756_s9 = int_to_ptr.vmem [resolvable:$true] %s549_s9 }
  0xdf   : > { %s7758_s13 = scalar_lea.sflag [#allocation11], %s537_s17  ;;  %s7236_s14 = scalar_lea.hbm %s7748_s21, 512 }
  0xe0   : > { %p7237_p8 = scmp.ne.s32.totalorder %s7748_s21, %s7236_s14  ;;  %p7238_p1 = pneg %p7752_p10 }
  0xe1   : > { %s7241_s28 = scalar_lea.hbm %s8998_s0, 1024  ;;  %p7242_p11 = scmp.lt.u32.totalorder %s7748_s21, %s8998_s0 }
  0xe2   : > { %p7239_p3 = pnand %p7238_p1, %p7237_p8  ;;  %p7243_p6 = scmp.lt.u32.totalorder %s7241_s28, %s7236_s14 }
  0xe3   : > { %p7245_p0 = scmp.lt.u32.totalorder %s7236_s14, %s7748_s21 }
  0xe4   : > { %p7240_p12 = pneg %p7239_p3  ;;  %p7244_p13 = por %p7243_p6, %p7242_p11 }
  0xe6   : > { %p7246_p7 = por %p7245_p0, %p7244_p13 }
  0xe8   : > { %p7247_p5 = pnand %p7246_p7, %p7240_p12 }
  0xea   : > { %7250 = shalt.err (!%p7247_p5)
}
  0xeb   : > { %s7251_s17 = scalar_lea.vmem %s7756_s9, 512  ;;  %s7376_s3 = smov [#allocation10]  }
  0xec   : > { %p7252_p8 = scmp.ne.s32.totalorder %s7756_s9, %s7251_s17  ;;  %s7256_s12 = sshll.u32 %s7376_s3, 4  ;;  %s7257_s12 = int_to_ptr.vmem [resolvable:$false] %s7256_s12 }
  0xed   : > { %s7258_s24 = scalar_lea.vmem %s7257_s12, 1024  ;;  %p7259_p4 = scmp.lt.s32.totalorder %s7756_s9, %s7257_s12 }
  0xee   : > { %p7254_p3 = pnand %p7252_p8, %p7238_p1  ;;  %p7260_p11 = scmp.lt.s32.totalorder %s7258_s24, %s7251_s17 }
  0xf0   : > { %p7255_p9 = pneg %p7254_p3  ;;  %p7261_p6 = por %p7260_p11, %p7259_p4 }
  0xf2   : > { %p7262_p13 = pnand %p7261_p6, %p7255_p9 }
  0xf4   : > { %7265 = shalt.err (!%p7262_p13)
}
  0xf5   : > { %s7377_s14 = smov 128   ;;  %s7378_s28 = smov 8  }
  0xf6   : > { %6661 = dma.hbm_to_vmem [thread:$0]  (!%p7752_p10), %s7748_s21, 512, %s7756_s9, %s7758_s13, %s7377_s14, %s7377_s14, %s7378_s28  }
  0xf7   : > { %s9043_s16 = sld [smem:[#allocation33_spill]] }
  0xfd   : > { %p9044_p1 = scmp.ne.s32.totalorder %s9043_s16, 0 }
  0xfe   : > { %s7789_s26 = sand.u32 (!%p9044_p1), 1, %s7348_s19  }
  0xff   : > { %561 = sbr.rel (%p9044_p1) target bundleno = 4797 (0x12bd), region = 80  ;;  %s5168_s17 = sshll.u32 (!%p9044_p1), %s7789_s26, 5 }
 0x100   : > { %s564_s3 = scalar_lea.sflag (!%p9044_p1), [#allocation11], %s7789_s26  ;;  %s7793_s12 = scalar_lea.vmem (!%p9044_p1), [#allocation10], %s5168_s17 }
 0x106   : > { %7319 = dma.done.wait (%p7727_p2), %s564_s3, 512  }
 0x107   : > { %7321 = vsyncadd (%p7727_p2), %s564_s3, 4294966784  ;;  %p9045_p4 = scmp.ne.s32.totalorder %s9030_s25, 0 }
 0x109   : > { %7323 = dma.done.wait (%p9045_p4), [#allocation14], 9216  }
 0x10a   : > { %7325 = vsyncadd (%p9045_p4), [#allocation14], 4294958080 }
 0x10b   : > { %7327 = dma.done.wait (%p9045_p4), [#allocation17], 16384  }
 0x10c   : > { %7329 = vsyncadd (%p9045_p4), [#allocation17], 4294950912 }
 0x10d   : > { %7331 = dma.done.wait (%p9045_p4), [#allocation20], 16384  }
 0x10e   : > { %7333 = vsyncadd (%p9045_p4), [#allocation20], 4294950912 }
 0x10f   : > { %7335 = dma.done.wait (%p9045_p4), [#allocation23], 16384  }
 0x110   : > { %7337 = vsyncadd (%p9045_p4), [#allocation23], 4294950912  ;;  %s7815_s1 = scalar_lea.vmem [#allocation25], %s5168_s17  ;;  %s9046_s21 = sld [smem:[#allocation32_spill]] }
 0x116   : > { %p5178_p2 = scmp.ne.s32.totalorder %s9046_s21, 0 }
 0x117   : > { %v7379_v0 = vmov (!%p5178_p2), 0.0  }
 0x118   : > { %651 = sbr.rel (%p5178_p2) target bundleno = 287 (0x11f), region = 120  ;;  %652 = vst [vmem:[#allocation2] sm:$0xff] (!%p5178_p2), %v7379_v0  ;;  %653 = vst [vmem:[#allocation2 + $0x8] sm:$0xff] (!%p5178_p2), %v7379_v0 }
 0x119   : > { %654 = vst [vmem:[#allocation3] sm:$0xff] (!%p5178_p2), %v7379_v0  ;;  %655 = vst [vmem:[#allocation3 + $0x8] sm:$0xff] (!%p5178_p2), %v7379_v0 }
 0x11a   : > { %656 = vst [vmem:[#allocation4] sm:$0xff] (!%p5178_p2), %v7379_v0  ;;  %657 = vst [vmem:[#allocation4 + $0x8] sm:$0xff] (!%p5178_p2), %v7379_v0 }
 0x11b   : > { %658 = vst [vmem:[#allocation5] sm:$0xff] (!%p5178_p2), %v7379_v0  ;;  %659 = vst [vmem:[#allocation5 + $0x8] sm:$0xff] (!%p5178_p2), %v7379_v0 }
 0x11f PF: > { %v665_v1 = vld [vmem:[#allocation13 + $0x8] sm:$0xff]  ;;  %v667_v3 = vld [vmem:[#allocation13 + $0x18] sm:$0xff]  ;;  %v664_v6 = vld [vmem:[#allocation13] sm:$0xff]  ;;  %v7380_v8 = vmov 0.0   ;;  %vm694_vm0 = vcmask 130048   ;;  %s9047_s15 = sld [smem:[#allocation35_spill]] }
 0x120   : > { %v669_v2 = vld [vmem:[#allocation13 + $0x28] sm:$0xff]  ;;  %v671_v5 = vld [vmem:[#allocation13 + $0x38] sm:$0xff]  ;;  %v668_v7 = vld [vmem:[#allocation13 + $0x20] sm:$0xff]  ;;  %771 = vmatprep.mubr.f32.mxu0 %v7380_v8  ;;  %860 = vmatprep.mubr.f32.mxu1 %v7380_v8  ;;  %s9048_s14 = sld [smem:[#allocation36_spill]]  ;;  %s9049_s17 = sld [smem:[#allocation37_spill]] }
 0x121   : > { %v5245_v4 = vpack.c.bf16 %v669_v2, %v665_v1  ;;  %v5249_v9 = vpack.c.bf16 %v671_v5, %v667_v3  ;;  %v5247_v10 = vpack.c.bf16 %v668_v7, %v664_v6  ;;  %v666_v11 = vld [vmem:[#allocation13 + $0x10] sm:$0xff]  ;;  %v902_v13 = vld [vmem:[#allocation15 + $0x8] sm:$0xff]  ;;  %v904_v16 = vld [vmem:[#allocation15 + $0x18] sm:$0xff]  ;;  %s9050_s21 = sld [smem:[#allocation38_spill]]  ;;  %s9053_s28 = sld [smem:[#allocation32_spill]] }
 0x122   : > { %v670_v12 = vld [vmem:[#allocation13 + $0x30] sm:$0xff]  ;;  %v906_v15 = vld [vmem:[#allocation15 + $0x28] sm:$0xff]  ;;  %v908_v17 = vld [vmem:[#allocation15 + $0x38] sm:$0xff]  ;;  %p9056_p10 = scmp.ne.s32.totalorder %s9040_s6, 0  ;;  %s7381_s24 = smov [#allocation25]  }
 0x123   : > { %5246 = vmatprep.subr.bf16.mxu0 %v5245_v4  ;;  %v5251_v14 = vpack.c.bf16 %v670_v12, %v666_v11  ;;  %5250 = vmatprep.subr.bf16.mxu1 %v5249_v9  ;;  %v7820_v18 = vpack.c.bf16 %v906_v15, %v902_v13  ;;  %v7822_v19 = vpack.c.bf16 %v908_v17, %v904_v16  ;;  %v660_v20 = vld [vmem:[%s7793_s12] sm:$0xff]  ;;  %v903_v24 = vld [vmem:[#allocation15 + $0x10] sm:$0xff]  ;;  %v910_v26 = vld [vmem:[#allocation15 + $0x48] sm:$0xff] }
 0x124   : > { %5248 = vmatpush1.bf16.msra.mxu0 %v5247_v10  ;;  %v901_v21 = vld [vmem:[#allocation15] sm:$0xff]  ;;  %v907_v25 = vld [vmem:[#allocation15 + $0x30] sm:$0xff]  ;;  %v914_v28 = vld [vmem:[#allocation15 + $0x68] sm:$0xff] }
 0x125   : > { %v905_v22 = vld [vmem:[#allocation15 + $0x20] sm:$0xff]  ;;  %5252 = vmatpush1.bf16.msra.mxu1 %v5251_v14  ;;  %5254 = vmatprep.subr.bf16.mxu0 %v7820_v18  ;;  %v7829_v27 = vpack.c.bf16 %v907_v25, %v903_v24  ;;  %v912_v29 = vld [vmem:[#allocation15 + $0x58] sm:$0xff]  ;;  %v7832_v31 = vpack.c.bf16 %v914_v28, %v910_v26  ;;  %v911_v35 = vld [vmem:[#allocation15 + $0x50] sm:$0xff] }
 0x126   : > { %v7825_v23 = vpack.c.bf16 %v905_v22, %v901_v21  ;;  %5286 = vmatprep.subr.bf16.mxu1 %v7822_v19  ;;  %v916_v30 = vld [vmem:[#allocation15 + $0x78] sm:$0xff]  ;;  %v909_v33 = vld [vmem:[#allocation15 + $0x40] sm:$0xff]  ;;  %v915_v37 = vld [vmem:[#allocation15 + $0x70] sm:$0xff] }
 0x127   : > { %5179 = vmatmul.mubr.msk.f32.vlgmr.msra.gmra.mrb[0].mxu0 %vm694_vm0, %v660_v20  ;;  %v7834_v32 = vpack.c.bf16 %v916_v30, %v912_v29  ;;  %v913_v34 = vld [vmem:[#allocation15 + $0x60] sm:$0xff]  ;;  %v918_v38 = vld [vmem:[#allocation15 + $0x88] sm:$0xff]  ;;  %v7842_v40 = vpack.c.bf16 %v915_v37, %v911_v35  ;;  %v920_v42 = vld [vmem:[#allocation15 + $0x98] sm:$0xff]  ;;  %s5244_s16 = sshll.u32 %s9053_s28, 9 }
 0x128   : > { %5183 = vmatmul.mubr.msk.f32.vlgmr.msra.gmra.mrb[0].mxu1 %vm694_vm0, %v660_v20  ;;  %5256 = vmatpush1.bf16.msra.mxu0 %v7825_v23  ;;  %v7838_v36 = vpack.c.bf16 %v913_v34, %v909_v33  ;;  %v922_v39 = vld [vmem:[#allocation15 + $0xa8] sm:$0xff]  ;;  %v924_v43 = vld [vmem:[#allocation15 + $0xb8] sm:$0xff]  ;;  %v917_v44 = vld [vmem:[#allocation15 + $0x80] sm:$0xff] }
 0x129   : > { %5288 = vmatpush1.bf16.msra.mxu1 %v7829_v27  ;;  %5258 = vmatprep.subr.bf16.mxu0 %v7832_v31  ;;  %v7844_v41 = vpack.c.bf16 %v922_v39, %v918_v38  ;;  %v7847_v45 = vpack.c.bf16 %v924_v43, %v920_v42  ;;  %v921_v46 = vld [vmem:[#allocation15 + $0xa0] sm:$0xff]  ;;  %v919_v47 = vld [vmem:[#allocation15 + $0x90] sm:$0xff]  ;;  %v926_v49 = vld [vmem:[#allocation15 + $0xc8] sm:$0xff] }
 0x12a   : > { %5290 = vmatprep.subr.bf16.mxu1 %v7834_v32  ;;  %v923_v48 = vld [vmem:[#allocation15 + $0xb0] sm:$0xff]  ;;  %777 = vmatprep.mubr.f32.mxu0 %v7380_v8  ;;  %v930_v50 = vld [vmem:[#allocation15 + $0xe8] sm:$0xff]  ;;  %v928_v51 = vld [vmem:[#allocation15 + $0xd8] sm:$0xff]  ;;  %v7852_v52 = vpack.c.bf16 %v921_v46, %v917_v44 }
 0x12b   : > { %866 = vmatprep.mubr.f32.mxu1 %v7380_v8  ;;  %v932_v53 = vld [vmem:[#allocation15 + $0xf8] sm:$0xff]  ;;  %v7856_v54 = vpack.c.bf16 %v923_v48, %v919_v47  ;;  %v7858_v55 = vpack.c.bf16 %v930_v50, %v926_v49  ;;  %v925_v56 = vld [vmem:[#allocation15 + $0xc0] sm:$0xff]  ;;  %v927_v58 = vld [vmem:[#allocation15 + $0xd0] sm:$0xff] }
 0x12c   : > { %5260 = vmatpush1.bf16.msra.mxu0 %v7838_v36  ;;  %v929_v57 = vld [vmem:[#allocation15 + $0xe0] sm:$0xff]  ;;  %v7861_v59 = vpack.c.bf16 %v932_v53, %v928_v51  ;;  %v931_v60 = vld [vmem:[#allocation15 + $0xf0] sm:$0xff]  ;;  %v934_v61 = vld [vmem:[#allocation15 + $0x108] sm:$0xff] }
 0x12d   : > { %5292 = vmatpush1.bf16.msra.mxu1 %v7842_v40  ;;  %5262 = vmatprep.subr.bf16.mxu0 %v7844_v41  ;;  %v938_v62 = vld [vmem:[#allocation15 + $0x128] sm:$0xff]  ;;  %v936_v63 = vld [vmem:[#allocation15 + $0x118] sm:$0xff]  ;;  %v7864_v1 = vpack.c.bf16 %v929_v57, %v925_v56  ;;  %v7869_v3 = vpack.c.bf16 %v931_v60, %v927_v58  ;;  %v933_v5 = vld [vmem:[#allocation15 + $0x100] sm:$0xff] }
 0x12e   : > { %5294 = vmatprep.subr.bf16.mxu1 %v7847_v45  ;;  %v940_v0 = vld [vmem:[#allocation15 + $0x138] sm:$0xff]  ;;  %v661_v2 = vld [vmem:[%s7793_s12 + $0x8] sm:$0xff]  ;;  %v7871_v4 = vpack.c.bf16 %v938_v62, %v934_v61  ;;  %v937_v6 = vld [vmem:[#allocation15 + $0x120] sm:$0xff] }
 0x12f   : > { %v935_v7 = vld [vmem:[#allocation15 + $0x110] sm:$0xff]  ;;  %v7874_v9 = vpack.c.bf16 %v940_v0, %v936_v63  ;;  %5180 = vmatmul.mubr.msk.f32.gmra.mrb[2].mxu0 %vm694_vm0, %v661_v2  ;;  %v942_v11 = vld [vmem:[#allocation15 + $0x148] sm:$0xff]  ;;  %5184 = vmatmul.mubr.msk.f32.gmra.mrb[2].mxu1 %vm694_vm0, %v661_v2  ;;  %v944_v13 = vld [vmem:[#allocation15 + $0x158] sm:$0xff]  ;;  %v7881_v16 = vpack.c.bf16 %v937_v6, %v933_v5  ;;  %v674_v5 = vlaneseq }
 0x130   : > { %5264 = vmatpush1.bf16.msra.mxu0 %v7852_v52  ;;  %v939_v10 = vld [vmem:[#allocation15 + $0x130] sm:$0xff]  ;;  %v946_v12 = vld [vmem:[#allocation15 + $0x168] sm:$0xff]  ;;  %v948_v14 = vld [vmem:[#allocation15 + $0x178] sm:$0xff]  ;;  %783 = vmatprep.mubr.f32.mxu0 %v7380_v8 }
 0x131   : > { %5296 = vmatpush1.bf16.msra.mxu1 %v7856_v54  ;;  %5266 = vmatprep.subr.bf16.mxu0 %v7858_v55  ;;  %v662_v15 = vld [vmem:[%s7793_s12 + $0x10] sm:$0xff]  ;;  %v7886_v17 = vpack.c.bf16 %v939_v10, %v935_v7  ;;  %v7888_v20 = vpack.c.bf16 %v946_v12, %v942_v11  ;;  %v941_v21 = vld [vmem:[#allocation15 + $0x140] sm:$0xff]  ;;  %v7891_v25 = vpack.c.bf16 %v948_v14, %v944_v13  ;;  %v950_v28 = vld [vmem:[#allocation15 + $0x188] sm:$0xff]  ;;  %v675_v6 = vshrl.u32 %v674_v5, 7 }
 0x132   : > { %5298 = vmatprep.subr.bf16.mxu1 %v7861_v59  ;;  %872 = vmatprep.mubr.f32.mxu1 %v7380_v8  ;;  %v945_v22 = vld [vmem:[#allocation15 + $0x160] sm:$0xff]  ;;  %v943_v24 = vld [vmem:[#allocation15 + $0x150] sm:$0xff]  ;;  %v954_v29 = vld [vmem:[#allocation15 + $0x1a8] sm:$0xff] }
 0x133   : > { %v947_v26 = vld [vmem:[#allocation15 + $0x170] sm:$0xff]  ;;  %5181 = vmatmul.mubr.msk.f32.gmra.mrb[4].mxu0 %vm694_vm0, %v662_v15  ;;  %5185 = vmatmul.mubr.msk.f32.gmra.mrb[4].mxu1 %vm694_vm0, %v662_v15  ;;  %v952_v30 = vld [vmem:[#allocation15 + $0x198] sm:$0xff]  ;;  %v7898_v35 = vpack.c.bf16 %v945_v22, %v941_v21  ;;  %v7905_v38 = vpack.c.bf16 %v954_v29, %v950_v28  ;;  %v949_v39 = vld [vmem:[#allocation15 + $0x180] sm:$0xff]  ;;  %v7973_v7 = vsub.s32 0, %v675_v6  ;;  %v7978_v11 = vsub.s32 1, %v675_v6 }
 0x134   : > { %5268 = vmatpush1.bf16.msra.mxu0 %v7864_v1  ;;  %v956_v33 = vld [vmem:[#allocation15 + $0x1b8] sm:$0xff]  ;;  %789 = vmatprep.mubr.f32.mxu0 %v7380_v8  ;;  %v7903_v37 = vpack.c.bf16 %v947_v26, %v943_v24  ;;  %v953_v42 = vld [vmem:[#allocation15 + $0x1a0] sm:$0xff]  ;;  %v951_v43 = vld [vmem:[#allocation15 + $0x190] sm:$0xff]  ;;  %v7986_v15 = vsub.s32 3, %v675_v6 }
 0x135   : > { %5300 = vmatpush1.bf16.msra.mxu1 %v7869_v3  ;;  %5270 = vmatprep.subr.bf16.mxu0 %v7871_v4  ;;  %v663_v34 = vld [vmem:[%s7793_s12 + $0x18] sm:$0xff]  ;;  %v7908_v44 = vpack.c.bf16 %v956_v33, %v952_v30  ;;  %v955_v46 = vld [vmem:[#allocation15 + $0x1b0] sm:$0xff]  ;;  %v958_v47 = vld [vmem:[#allocation15 + $0x1c8] sm:$0xff]  ;;  %v7914_v51 = vpack.c.bf16 %v953_v42, %v949_v39 }
 0x136   : > { %5302 = vmatprep.subr.bf16.mxu1 %v7874_v9  ;;  %878 = vmatprep.mubr.f32.mxu1 %v7380_v8  ;;  %v962_v48 = vld [vmem:[#allocation15 + $0x1e8] sm:$0xff]  ;;  %v960_v49 = vld [vmem:[#allocation15 + $0x1d8] sm:$0xff]  ;;  %v7919_v53 = vpack.c.bf16 %v955_v46, %v951_v43  ;;  %v957_v57 = vld [vmem:[#allocation15 + $0x1c0] sm:$0xff] }
 0x137   : > { %5182 = vmatmul.mubr.msk.f32.gmra.mrb[6].mxu0 %vm694_vm0, %v663_v34  ;;  %5186 = vmatmul.mubr.msk.f32.gmra.mrb[6].mxu1 %vm694_vm0, %v663_v34  ;;  %v964_v50 = vld [vmem:[#allocation15 + $0x1f8] sm:$0xff]  ;;  %v7921_v56 = vpack.c.bf16 %v962_v48, %v958_v47  ;;  %v961_v58 = vld [vmem:[#allocation15 + $0x1e0] sm:$0xff]  ;;  %v959_v61 = vld [vmem:[#allocation15 + $0x1d0] sm:$0xff]  ;;  %v7993_v34 = vsub.s32 2, %v675_v6 }
 0x138   : > { %5272 = vmatpush1.bf16.msra.mxu0 %v7881_v16  ;;  %1036 = vmatprep.mubr.f32.mxu0 %v7380_v8  ;;  %v7924_v60 = vpack.c.bf16 %v964_v50, %v960_v49  ;;  %v963_v62 = vld [vmem:[#allocation15 + $0x1f0] sm:$0xff]  ;;  %v7927_v63 = vpack.c.bf16 %v961_v58, %v957_v57  ;;  %v965_v2 = vld [vmem:[#allocation2] sm:$0xff] }
 0x139   : > { %5304 = vmatpush1.bf16.msra.mxu1 %v7886_v17  ;;  %5274 = vmatprep.subr.bf16.mxu0 %v7888_v20  ;;  %v7931_v0 = vpack.c.bf16 %v963_v62, %v959_v61  ;;  %v672_v10 = vld [vmem:[%s9047_s15] sm:$0xf]  ;;  %v967_v61 = vld [vmem:[#allocation2 + $0x8] sm:$0xff]  ;;  %s9051_s15 = sld [smem:[#allocation39_spill]] }
 0x13a   : > { %5306 = vmatprep.subr.bf16.mxu1 %v7891_v25  ;;  %1107 = vmatprep.mubr.f32.mxu1 %v7380_v8  ;;  %v7981_v12 = vrot.slane %v672_v10, %v7973_v7  ;;  %v7984_v13 = vrot.slane %v672_v10, %v7978_v11  ;;  %v7991_v33 = vrot.slane %v672_v10, %v7986_v15 }
 0x13b   : > { %v7997_v42 = vrot.slane %v672_v10, %v7993_v34 }
 0x13c   : > { %5276 = vmatpush1.bf16.msra.mxu0 %v7898_v35 }
 0x13d   : > { %5308 = vmatpush1.bf16.msra.mxu1 %v7903_v37  ;;  %5278 = vmatprep.subr.bf16.mxu0 %v7905_v38 }
 0x13e   : > { %5310 = vmatprep.subr.bf16.mxu1 %v7908_v44 }
 0x140   : > { %5280 = vmatpush1.bf16.msra.mxu0 %v7914_v51 }
 0x141   : > { %5312 = vmatpush1.bf16.msra.mxu1 %v7919_v53  ;;  %5282 = vmatprep.subr.bf16.mxu0 %v7921_v56 }
 0x142   : > { %5314 = vmatprep.subr.bf16.mxu1 %v7924_v60 }
 0x144   : > { %5284 = vmatpush1.bf16.msra.mxu0 %v7927_v63 }
 0x145   : > { %5316 = vmatpush1.bf16.msra.mxu1 %v7931_v0  ;;  %5318 = vmatprep.subr.bf16.mxu0 %v7820_v18 }
 0x146   : > { %5350 = vmatprep.subr.bf16.mxu1 %v7822_v19 }
 0x147   : > { %1037 = vmatmul.mubr.f32.vlgmr.msra.gmra.mrb[0].mxu0 %v965_v2 }
 0x148   : > { %1108 = vmatmul.mubr.f32.vlgmr.msra.gmra.mrb[0].mxu1 %v965_v2  ;;  %5320 = vmatpush1.bf16.msra.mxu0 %v7825_v23 }
 0x149   : > { %5352 = vmatpush1.bf16.msra.mxu1 %v7829_v27  ;;  %5322 = vmatprep.subr.bf16.mxu0 %v7832_v31 }
 0x14a   : > { %5354 = vmatprep.subr.bf16.mxu1 %v7834_v32  ;;  %1216 = vmatprep.mubr.f32.mxu0 %v7380_v8 }
 0x14b   : > { %1287 = vmatprep.mubr.f32.mxu1 %v7380_v8 }
 0x14c   : > { %5324 = vmatpush1.bf16.msra.mxu0 %v7838_v36 }
 0x14d   : > { %5356 = vmatpush1.bf16.msra.mxu1 %v7842_v40  ;;  %5326 = vmatprep.subr.bf16.mxu0 %v7844_v41 }
 0x14e   : > { %5358 = vmatprep.subr.bf16.mxu1 %v7847_v45 }
 0x150   : > { %5328 = vmatpush1.bf16.msra.mxu0 %v7852_v52 }
 0x151   : > { %5360 = vmatpush1.bf16.msra.mxu1 %v7856_v54  ;;  %5330 = vmatprep.subr.bf16.mxu0 %v7858_v55 }
 0x152   : > { %5362 = vmatprep.subr.bf16.mxu1 %v7861_v59 }
 0x154   : > { %5332 = vmatpush1.bf16.msra.mxu0 %v7864_v1 }
 0x155   : > { %5364 = vmatpush1.bf16.msra.mxu1 %v7869_v3  ;;  %5334 = vmatprep.subr.bf16.mxu0 %v7871_v4 }
 0x156   : > { %5366 = vmatprep.subr.bf16.mxu1 %v7874_v9 }
 0x158   : > { %5336 = vmatpush1.bf16.msra.mxu0 %v7881_v16 }
 0x159   : > { %5368 = vmatpush1.bf16.msra.mxu1 %v7886_v17  ;;  %5338 = vmatprep.subr.bf16.mxu0 %v7888_v20 }
 0x15a   : > { %5370 = vmatprep.subr.bf16.mxu1 %v7891_v25 }
 0x15c   : > { %5340 = vmatpush1.bf16.msra.mxu0 %v7898_v35 }
 0x15d   : > { %5372 = vmatpush1.bf16.msra.mxu1 %v7903_v37  ;;  %5342 = vmatprep.subr.bf16.mxu0 %v7905_v38 }
 0x15e   : > { %5374 = vmatprep.subr.bf16.mxu1 %v7908_v44 }
 0x160   : > { %5344 = vmatpush1.bf16.msra.mxu0 %v7914_v51 }
 0x161   : > { %5376 = vmatpush1.bf16.msra.mxu1 %v7919_v53  ;;  %5346 = vmatprep.subr.bf16.mxu0 %v7921_v56 }
 0x162   : > { %5378 = vmatprep.subr.bf16.mxu1 %v7924_v60 }
 0x164   : > { %5348 = vmatpush1.bf16.msra.mxu0 %v7927_v63 }
 0x165   : > { %5380 = vmatpush1.bf16.msra.mxu1 %v7931_v0  ;;  %5382 = vmatprep.subr.bf16.mxu0 %v7820_v18 }
 0x166   : > { %5414 = vmatprep.subr.bf16.mxu1 %v7822_v19 }
 0x21a   : > { %v1038_v14 = vpop.f32.mrb[0].mxu0 }
 0x21b   : > { %v6469_v21 = vadd.f32 %v1038_v14, %v7981_v12  ;;  %v1109_v22 = vpop.f32.mrb[0].mxu1  ;;  %v1040_v24 = vpop.f32.mrb[1].mxu0 }
 0x21c   : > { %v6470_v26 = vadd.f32 %v1040_v24, %v7984_v13  ;;  %v1111_v28 = vpop.f32.mrb[1].mxu1  ;;  %v6477_v46 = vadd.f32 %v1109_v22, %v7997_v42 }
 0x21d   : > { %v5187_v29 = vmul.f32 -1.442695, %v6469_v21  ;;  %v6478_v39 = vadd.f32 %v1111_v28, %v7991_v33 }
 0x21e   : > { %v5188_v30 = vmul.f32 -1.442695, %v6470_v26 }
 0x21f   : > { %6748 = vpow2.f32 %v5187_v29  ;;  %v5189_v43 = vmul.f32 -1.442695, %v6478_v39 }
 0x220   : > { %6750 = vpow2.f32 %v5188_v30 }
 0x221   : > { %6752 = vpow2.f32 %v5189_v43 }
 0x222   : > { %6754 = vtanh.f32 %v6477_v46 }
 0x229   : > { %v6749_v47 = vpop.eup %6748 }
 0x22a   : > { %v6751_v48 = vpop.eup %6750  ;;  %v1121_v49 = vadd.f32 1.0, %v6749_v47 }
 0x22b   : > { %v1127_v50 = vadd.f32 1.0, %v6751_v48  ;;  %v6753_v57 = vpop.eup %6752 }
 0x22c   : > { %6756 = vrcp.f32 %v1121_v49  ;;  %v6755_v58 = vpop.eup %6754  ;;  %v1134_v14 = vadd.f32 1.0, %v6753_v57 }
 0x22d   : > { %6758 = vrcp.f32 %v1127_v50 }
 0x22e   : > { %6760 = vrcp.f32 %v1134_v14 }
 0x236   : > { %v6757_v62 = vpop.eup %6756 }
 0x237   : > { %v6759_v2 = vpop.eup %6758  ;;  %v1138_v6 = vmul.f32 %v6757_v62, %v6755_v58 }
 0x238   : > { %v1137_v10 = vmul.f32 %v6759_v2, %v967_v61  ;;  %v6761_v22 = vpop.eup %6760 }
 0x23a   : > { %v8000_v21 = vadd.f32 %v1138_v6, %v1137_v10 }
 0x23c   : > { %6762 = vtanh.f32 %v8000_v21 }
 0x246   : > { %v6763_v24 = vpop.eup %6762 }
 0x247   : > { %v8003_v26 = vmul.f32 %v6763_v24, %v6761_v22 }
 0x249   : > { %1217 = vmatmul.mubr.f32.vlgmr.msra.gmra.mrb[2].mxu0 %v8003_v26  ;;  %1288 = vmatmul.mubr.f32.vlgmr.msra.gmra.mrb[2].mxu1 %v8003_v26 }
 0x24a   : > { %5384 = vmatpush1.bf16.msra.mxu0 %v7825_v23  ;;  %5416 = vmatpush1.bf16.msra.mxu1 %v7829_v27 }
 0x24b   : > { %5386 = vmatprep.subr.bf16.mxu0 %v7832_v31  ;;  %5418 = vmatprep.subr.bf16.mxu1 %v7834_v32 }
 0x24c   : > { %1397 = vmatprep.mubr.f32.mxu0 %v7380_v8  ;;  %1468 = vmatprep.mubr.f32.mxu1 %v7380_v8 }
 0x24e   : > { %5388 = vmatpush1.bf16.msra.mxu0 %v7838_v36  ;;  %5420 = vmatpush1.bf16.msra.mxu1 %v7842_v40 }
 0x24f   : > { %5390 = vmatprep.subr.bf16.mxu0 %v7844_v41  ;;  %5422 = vmatprep.subr.bf16.mxu1 %v7847_v45 }
 0x252   : > { %5392 = vmatpush1.bf16.msra.mxu0 %v7852_v52  ;;  %5424 = vmatpush1.bf16.msra.mxu1 %v7856_v54 }
 0x253   : > { %5394 = vmatprep.subr.bf16.mxu0 %v7858_v55  ;;  %5426 = vmatprep.subr.bf16.mxu1 %v7861_v59 }
 0x256   : > { %5396 = vmatpush1.bf16.msra.mxu0 %v7864_v1  ;;  %5428 = vmatpush1.bf16.msra.mxu1 %v7869_v3 }
 0x257   : > { %5398 = vmatprep.subr.bf16.mxu0 %v7871_v4  ;;  %5430 = vmatprep.subr.bf16.mxu1 %v7874_v9 }
 0x25a   : > { %5400 = vmatpush1.bf16.msra.mxu0 %v7881_v16  ;;  %5432 = vmatpush1.bf16.msra.mxu1 %v7886_v17 }
 0x25b   : > { %5402 = vmatprep.subr.bf16.mxu0 %v7888_v20  ;;  %5434 = vmatprep.subr.bf16.mxu1 %v7891_v25 }
 0x25e   : > { %5404 = vmatpush1.bf16.msra.mxu0 %v7898_v35  ;;  %5436 = vmatpush1.bf16.msra.mxu1 %v7903_v37 }
 0x25f   : > { %5406 = vmatprep.subr.bf16.mxu0 %v7905_v38  ;;  %5438 = vmatprep.subr.bf16.mxu1 %v7908_v44 }
 0x262   : > { %5408 = vmatpush1.bf16.msra.mxu0 %v7914_v51  ;;  %5440 = vmatpush1.bf16.msra.mxu1 %v7919_v53 }
 0x263   : > { %5410 = vmatprep.subr.bf16.mxu0 %v7921_v56  ;;  %5442 = vmatprep.subr.bf16.mxu1 %v7924_v60 }
 0x266   : > { %5412 = vmatpush1.bf16.msra.mxu0 %v7927_v63  ;;  %5444 = vmatpush1.bf16.msra.mxu1 %v7931_v0 }
 0x267   : > { %5446 = vmatprep.subr.bf16.mxu0 %v7820_v18  ;;  %5478 = vmatprep.subr.bf16.mxu1 %v7822_v19 }
 0x31c   : > { %v1218_v28 = vpop.f32.mrb[2].mxu0  ;;  %v1289_v29 = vpop.f32.mrb[2].mxu1 }
 0x31d   : > { %v6471_v30 = vadd.f32 %v1218_v28, %v7981_v12  ;;  %v1220_v39 = vpop.f32.mrb[3].mxu0  ;;  %v1291_v43 = vpop.f32.mrb[3].mxu1  ;;  %v6479_v57 = vadd.f32 %v1289_v29, %v7997_v42 }
 0x31e   : > { %v6472_v46 = vadd.f32 %v1220_v39, %v7984_v13  ;;  %v6480_v49 = vadd.f32 %v1291_v43, %v7991_v33  ;;  %v1694_v43 = vld [vmem:[#allocation16 + $0x10] sm:$0xff] }
 0x31f   : > { %v5190_v47 = vmul.f32 -1.442695, %v6471_v30 }
 0x320   : > { %v5191_v48 = vmul.f32 -1.442695, %v6472_v46  ;;  %v5192_v50 = vmul.f32 -1.442695, %v6480_v49  ;;  %v1698_v46 = vld [vmem:[#allocation16 + $0x30] sm:$0xff]  ;;  %v1703_v49 = vld [vmem:[#allocation16 + $0x58] sm:$0xff] }
 0x321   : > { %6764 = vpow2.f32 %v5190_v47  ;;  %v1701_v47 = vld [vmem:[#allocation16 + $0x48] sm:$0xff] }
 0x322   : > { %6766 = vpow2.f32 %v5191_v48  ;;  %v1705_v48 = vld [vmem:[#allocation16 + $0x68] sm:$0xff] }
 0x323   : > { %6768 = vpow2.f32 %v5192_v50  ;;  %v1707_v50 = vld [vmem:[#allocation16 + $0x78] sm:$0xff] }
 0x324   : > { %6770 = vtanh.f32 %v6479_v57 }
 0x32b   : > { %v6765_v18 = vpop.eup %6764 }
 0x32c   : > { %v6767_v58 = vpop.eup %6766  ;;  %v1301_v19 = vadd.f32 1.0, %v6765_v18 }
 0x32d   : > { %v1307_v61 = vadd.f32 1.0, %v6767_v58  ;;  %v6769_v62 = vpop.eup %6768 }
 0x32e   : > { %6772 = vrcp.f32 %v1301_v19  ;;  %v6771_v2 = vpop.eup %6770  ;;  %v1314_v22 = vadd.f32 1.0, %v6769_v62  ;;  %v5543_v19 = vpack.c.bf16 %v1698_v46, %v1694_v43  ;;  %v1704_v62 = vld [vmem:[#allocation16 + $0x60] sm:$0xff]  ;;  %v1726_v43 = vld [vmem:[#allocation16 + $0x110] sm:$0xff] }
 0x32f   : > { %6774 = vrcp.f32 %v1307_v61  ;;  %v1700_v61 = vld [vmem:[#allocation16 + $0x40] sm:$0xff]  ;;  %v1730_v46 = vld [vmem:[#allocation16 + $0x130] sm:$0xff] }
 0x330   : > { %6776 = vrcp.f32 %v1314_v22  ;;  %v1706_v22 = vld [vmem:[#allocation16 + $0x70] sm:$0xff] }
 0x338   : > { %v6773_v6 = vpop.eup %6772 }
 0x339   : > { %v6775_v14 = vpop.eup %6774  ;;  %v1318_v10 = vmul.f32 %v6773_v6, %v6771_v2  ;;  %v5513_v6 = vpack.c.bf16 %v1705_v48, %v1701_v47  ;;  %v1733_v47 = vld [vmem:[#allocation16 + $0x148] sm:$0xff] }
 0x33a   : > { %v1317_v24 = vmul.f32 %v6775_v14, %v8000_v21  ;;  %v6777_v29 = vpop.eup %6776  ;;  %v1696_v21 = vld [vmem:[#allocation16 + $0x20] sm:$0xff]  ;;  %v5545_v14 = vpack.c.bf16 %v1707_v50, %v1703_v49  ;;  %v1737_v48 = vld [vmem:[#allocation16 + $0x168] sm:$0xff]  ;;  %v1735_v49 = vld [vmem:[#allocation16 + $0x158] sm:$0xff] }
 0x33b   : > { %v1739_v50 = vld [vmem:[#allocation16 + $0x178] sm:$0xff] }
 0x33c   : > { %v8046_v28 = vadd.f32 %v1318_v10, %v1317_v24  ;;  %v1702_v10 = vld [vmem:[#allocation16 + $0x50] sm:$0xff]  ;;  %v1709_v24 = vld [vmem:[#allocation16 + $0x88] sm:$0xff] }
 0x33e   : > { %6778 = vtanh.f32 %v8046_v28 }
 0x348   : > { %v6779_v30 = vpop.eup %6778 }
 0x349   : > { %v8049_v39 = vmul.f32 %v6779_v30, %v6777_v29  ;;  %v1711_v29 = vld [vmem:[#allocation16 + $0x98] sm:$0xff] }
 0x34a   : > { %v1715_v30 = vld [vmem:[#allocation16 + $0xb8] sm:$0xff] }
 0x34b   : > { %1398 = vmatmul.mubr.f32.vlgmr.msra.gmra.mrb[4].mxu0 %v8049_v39  ;;  %1469 = vmatmul.mubr.f32.vlgmr.msra.gmra.mrb[4].mxu1 %v8049_v39 }
 0x34c   : > { %5448 = vmatpush1.bf16.msra.mxu0 %v7825_v23  ;;  %5480 = vmatpush1.bf16.msra.mxu1 %v7829_v27  ;;  %v1693_v23 = vld [vmem:[#allocation16 + $0x8] sm:$0xff] }
 0x34d   : > { %5450 = vmatprep.subr.bf16.mxu0 %v7832_v31  ;;  %5482 = vmatprep.subr.bf16.mxu1 %v7834_v32  ;;  %v1697_v27 = vld [vmem:[#allocation16 + $0x28] sm:$0xff]  ;;  %v1695_v31 = vld [vmem:[#allocation16 + $0x18] sm:$0xff] }
 0x34e   : > { %1578 = vmatprep.mubr.f32.mxu0 %v7380_v8  ;;  %1649 = vmatprep.mubr.f32.mxu1 %v7380_v8  ;;  %v5509_v32 = vpack.c.bf16 %v1697_v27, %v1693_v23  ;;  %v5515_v23 = vpack.c.bf16 %v1704_v62, %v1700_v61  ;;  %v5547_v27 = vpack.c.bf16 %v1706_v22, %v1702_v10  ;;  %v1741_v10 = vld [vmem:[#allocation16 + $0x188] sm:$0xff] }
 0x34f   : > { %v5529_v61 = vpack.c.bf16 %v1737_v48, %v1733_v47  ;;  %v5561_v62 = vpack.c.bf16 %v1739_v50, %v1735_v49  ;;  %v1745_v22 = vld [vmem:[#allocation16 + $0x1a8] sm:$0xff]  ;;  %v1987_v48 = vld [vmem:[#allocation18 + $0x78] sm:$0xff]  ;;  %v1980_v49 = vld [vmem:[#allocation18 + $0x40] sm:$0xff] }
 0x350   : > { %5452 = vmatpush1.bf16.msra.mxu0 %v7838_v36  ;;  %5484 = vmatpush1.bf16.msra.mxu1 %v7842_v40  ;;  %v1699_v36 = vld [vmem:[#allocation16 + $0x38] sm:$0xff]  ;;  %v1984_v50 = vld [vmem:[#allocation18 + $0x60] sm:$0xff] }
 0x351   : > { %5454 = vmatprep.subr.bf16.mxu0 %v7844_v41  ;;  %5486 = vmatprep.subr.bf16.mxu1 %v7847_v45  ;;  %v5541_v40 = vpack.c.bf16 %v1699_v36, %v1695_v31  ;;  %v1708_v31 = vld [vmem:[#allocation16 + $0x80] sm:$0xff] }
 0x354   : > { %5456 = vmatpush1.bf16.msra.mxu0 %v7852_v52  ;;  %5488 = vmatpush1.bf16.msra.mxu1 %v7856_v54 }
 0x355   : > { %5458 = vmatprep.subr.bf16.mxu0 %v7858_v55  ;;  %5490 = vmatprep.subr.bf16.mxu1 %v7861_v59 }
 0x358   : > { %5460 = vmatpush1.bf16.msra.mxu0 %v7864_v1  ;;  %5492 = vmatpush1.bf16.msra.mxu1 %v7869_v3 }
 0x359   : > { %5462 = vmatprep.subr.bf16.mxu0 %v7871_v4  ;;  %5494 = vmatprep.subr.bf16.mxu1 %v7874_v9 }
 0x35c   : > { %5464 = vmatpush1.bf16.msra.mxu0 %v7881_v16  ;;  %5496 = vmatpush1.bf16.msra.mxu1 %v7886_v17 }
 0x35d   : > { %5466 = vmatprep.subr.bf16.mxu0 %v7888_v20  ;;  %5498 = vmatprep.subr.bf16.mxu1 %v7891_v25 }
 0x360   : > { %5468 = vmatpush1.bf16.msra.mxu0 %v7898_v35  ;;  %5500 = vmatpush1.bf16.msra.mxu1 %v7903_v37 }
 0x361   : > { %5470 = vmatprep.subr.bf16.mxu0 %v7905_v38  ;;  %5502 = vmatprep.subr.bf16.mxu1 %v7908_v44 }
 0x364   : > { %5472 = vmatpush1.bf16.msra.mxu0 %v7914_v51  ;;  %5504 = vmatpush1.bf16.msra.mxu1 %v7919_v53 }
 0x365   : > { %5474 = vmatprep.subr.bf16.mxu0 %v7921_v56  ;;  %5506 = vmatprep.subr.bf16.mxu1 %v7924_v60 }
 0x368   : > { %5476 = vmatpush1.bf16.msra.mxu0 %v7927_v63  ;;  %5508 = vmatpush1.bf16.msra.mxu1 %v7931_v0  ;;  %v1692_v0 = vld [vmem:[#allocation16] sm:$0xff] }
 0x369   : > { %5510 = vmatprep.subr.bf16.mxu0 %v5509_v32  ;;  %5542 = vmatprep.subr.bf16.mxu1 %v5541_v40  ;;  %v5511_v58 = vpack.c.bf16 %v1696_v21, %v1692_v0  ;;  %v1712_v32 = vld [vmem:[#allocation16 + $0xa0] sm:$0xff]  ;;  %v5549_v40 = vpack.c.bf16 %v1715_v30, %v1711_v29 }
 0x41e   : > { %v1399_v41 = vpop.f32.mrb[4].mxu0  ;;  %v1470_v45 = vpop.f32.mrb[4].mxu1 }
 0x41f   : > { %v6473_v52 = vadd.f32 %v1399_v41, %v7981_v12  ;;  %v1401_v54 = vpop.f32.mrb[5].mxu0  ;;  %v1472_v55 = vpop.f32.mrb[5].mxu1  ;;  %v6481_v16 = vadd.f32 %v1470_v45, %v7997_v42  ;;  %v1710_v41 = vld [vmem:[#allocation16 + $0x90] sm:$0xff] }
 0x420   : > { %v6474_v59 = vadd.f32 %v1401_v54, %v7984_v13  ;;  %v6482_v4 = vadd.f32 %v1472_v55, %v7991_v33  ;;  %v1714_v45 = vld [vmem:[#allocation16 + $0xb0] sm:$0xff]  ;;  %v1721_v54 = vld [vmem:[#allocation16 + $0xe8] sm:$0xff]  ;;  %v1719_v55 = vld [vmem:[#allocation16 + $0xd8] sm:$0xff] }
 0x421   : > { %v5193_v1 = vmul.f32 -1.442695, %v6473_v52  ;;  %v1717_v52 = vld [vmem:[#allocation16 + $0xc8] sm:$0xff] }
 0x422   : > { %v5194_v3 = vmul.f32 -1.442695, %v6474_v59  ;;  %v5195_v9 = vmul.f32 -1.442695, %v6482_v4  ;;  %v1723_v59 = vld [vmem:[#allocation16 + $0xf8] sm:$0xff]  ;;  %v1716_v4 = vld [vmem:[#allocation16 + $0xc0] sm:$0xff] }
 0x423   : > { %6780 = vpow2.f32 %v5193_v1  ;;  %v5519_v1 = vpack.c.bf16 %v1712_v32, %v1708_v31  ;;  %v5533_v31 = vpack.c.bf16 %v1745_v22, %v1741_v10  ;;  %v1995_v22 = vld [vmem:[#allocation18 + $0xb8] sm:$0xff] }
 0x424   : > { %6782 = vpow2.f32 %v5194_v3  ;;  %v5551_v3 = vpack.c.bf16 %v1714_v45, %v1710_v41  ;;  %v1749_v41 = vld [vmem:[#allocation16 + $0x1c8] sm:$0xff] }
 0x425   : > { %6784 = vpow2.f32 %v5195_v9  ;;  %v1720_v9 = vld [vmem:[#allocation16 + $0xe0] sm:$0xff]  ;;  %v1753_v45 = vld [vmem:[#allocation16 + $0x1e8] sm:$0xff] }
 0x426   : > { %6786 = vtanh.f32 %v6481_v16  ;;  %v5521_v16 = vpack.c.bf16 %v1721_v54, %v1717_v52  ;;  %v1751_v52 = vld [vmem:[#allocation16 + $0x1d8] sm:$0xff] }
 0x427   : > { %v1755_v54 = vld [vmem:[#allocation16 + $0x1f8] sm:$0xff] }
 0x42d   : > { %v6781_v17 = vpop.eup %6780 }
 0x42e   : > { %v6783_v20 = vpop.eup %6782  ;;  %v1482_v25 = vadd.f32 1.0, %v6781_v17  ;;  %v5553_v17 = vpack.c.bf16 %v1723_v59, %v1719_v55 }
 0x42f   : > { %v1488_v35 = vadd.f32 1.0, %v6783_v20  ;;  %v6785_v37 = vpop.eup %6784  ;;  %v1718_v20 = vld [vmem:[#allocation16 + $0xd0] sm:$0xff] }
 0x430   : > { %6788 = vrcp.f32 %v1482_v25  ;;  %v6787_v38 = vpop.eup %6786  ;;  %v1495_v56 = vadd.f32 1.0, %v6785_v37  ;;  %v1722_v25 = vld [vmem:[#allocation16 + $0xf0] sm:$0xff]  ;;  %v1729_v37 = vld [vmem:[#allocation16 + $0x128] sm:$0xff] }
 0x431   : > { %6790 = vrcp.f32 %v1488_v35  ;;  %v1725_v35 = vld [vmem:[#allocation16 + $0x108] sm:$0xff] }
 0x432   : > { %6792 = vrcp.f32 %v1495_v56  ;;  %v1724_v56 = vld [vmem:[#allocation16 + $0x100] sm:$0xff]  ;;  %v5525_v0 = vpack.c.bf16 %v1729_v37, %v1725_v35  ;;  %v1977_v35 = vld [vmem:[#allocation18 + $0x28] sm:$0xff]  ;;  %v1975_v37 = vld [vmem:[#allocation18 + $0x18] sm:$0xff] }
 0x43a   : > { %v6789_v44 = vpop.eup %6788 }
 0x43b   : > { %v6791_v51 = vpop.eup %6790  ;;  %v1499_v53 = vmul.f32 %v6789_v44, %v6787_v38  ;;  %v1727_v38 = vld [vmem:[#allocation16 + $0x118] sm:$0xff] }
 0x43c   : > { %v1498_v60 = vmul.f32 %v6791_v51, %v8046_v28  ;;  %v6793_v57 = vpop.eup %6792  ;;  %v1713_v28 = vld [vmem:[#allocation16 + $0xa8] sm:$0xff]  ;;  %v1731_v44 = vld [vmem:[#allocation16 + $0x138] sm:$0xff]  ;;  %v5523_v51 = vpack.c.bf16 %v1720_v9, %v1716_v4  ;;  %v5569_v4 = vpack.c.bf16 %v1755_v54, %v1751_v52  ;;  %v1752_v9 = vld [vmem:[#allocation16 + $0x1e0] sm:$0xff] }
 0x43d   : > { %v5517_v36 = vpack.c.bf16 %v1713_v28, %v1709_v24  ;;  %v5557_v21 = vpack.c.bf16 %v1731_v44, %v1727_v38  ;;  %v1743_v24 = vld [vmem:[#allocation16 + $0x198] sm:$0xff]  ;;  %v1996_v52 = vld [vmem:[#allocation18 + $0xc0] sm:$0xff] }
 0x43e   : > { %v8090_v63 = vadd.f32 %v1499_v53, %v1498_v60  ;;  %v5555_v53 = vpack.c.bf16 %v1722_v25, %v1718_v20  ;;  %v1728_v60 = vld [vmem:[#allocation16 + $0x120] sm:$0xff]  ;;  %v1747_v28 = vld [vmem:[#allocation16 + $0x1b8] sm:$0xff] }
 0x43f   : > { %v5565_v32 = vpack.c.bf16 %v1747_v28, %v1743_v24  ;;  %v1979_v44 = vld [vmem:[#allocation18 + $0x38] sm:$0xff]  ;;  %v1988_v24 = vld [vmem:[#allocation18 + $0x80] sm:$0xff] }
 0x440   : > { %6794 = vtanh.f32 %v8090_v63  ;;  %v1992_v28 = vld [vmem:[#allocation18 + $0xa0] sm:$0xff] }
 0x441   : > { %v2000_v54 = vld [vmem:[#allocation18 + $0xe0] sm:$0xff] }
 0x44a   : > { %v6795_v18 = vpop.eup %6794 }
 0x44b   : > { %v8093_v2 = vmul.f32 %v6795_v18, %v6793_v57  ;;  %v5527_v57 = vpack.c.bf16 %v1728_v60, %v1724_v56  ;;  %v5559_v18 = vpack.c.bf16 %v1730_v46, %v1726_v43  ;;  %v1974_v60 = vld [vmem:[#allocation18 + $0x10] sm:$0xff]  ;;  %v1985_v43 = vld [vmem:[#allocation18 + $0x68] sm:$0xff]  ;;  %v1983_v46 = vld [vmem:[#allocation18 + $0x58] sm:$0xff] }
 0x44d   : > { %1579 = vmatmul.mubr.f32.vlgmr.msra.gmra.mrb[6].mxu0 %v8093_v2  ;;  %1650 = vmatmul.mubr.f32.vlgmr.msra.gmra.mrb[6].mxu1 %v8093_v2 }
 0x44e   : > { %5512 = vmatpush1.bf16.msra.mxu0 %v5511_v58  ;;  %5544 = vmatpush1.bf16.msra.mxu1 %v5543_v19  ;;  %v1732_v58 = vld [vmem:[#allocation16 + $0x140] sm:$0xff] }
 0x44f   : > { %5514 = vmatprep.subr.bf16.mxu0 %v5513_v6  ;;  %5546 = vmatprep.subr.bf16.mxu1 %v5545_v14  ;;  %v1736_v19 = vld [vmem:[#allocation16 + $0x160] sm:$0xff]  ;;  %v1734_v6 = vld [vmem:[#allocation16 + $0x150] sm:$0xff] }
 0x450   : > { %1842 = vmatprep.mubr.f32.mxu0 %v7380_v8  ;;  %1931 = vmatprep.mubr.f32.mxu1 %v7380_v8  ;;  %v1738_v14 = vld [vmem:[#allocation16 + $0x170] sm:$0xff]  ;;  %v5531_v29 = vpack.c.bf16 %v1736_v19, %v1732_v58 }
 0x451   : > { %v5563_v30 = vpack.c.bf16 %v1738_v14, %v1734_v6  ;;  %v1982_v58 = vld [vmem:[#allocation18 + $0x50] sm:$0xff]  ;;  %v1993_v6 = vld [vmem:[#allocation18 + $0xa8] sm:$0xff]  ;;  %v1991_v14 = vld [vmem:[#allocation18 + $0x98] sm:$0xff] }
 0x452   : > { %5516 = vmatpush1.bf16.msra.mxu0 %v5515_v23  ;;  %5548 = vmatpush1.bf16.msra.mxu1 %v5547_v27  ;;  %v1740_v23 = vld [vmem:[#allocation16 + $0x180] sm:$0xff]  ;;  %v1986_v19 = vld [vmem:[#allocation18 + $0x70] sm:$0xff] }
 0x453   : > { %5518 = vmatprep.subr.bf16.mxu0 %v5517_v36  ;;  %5550 = vmatprep.subr.bf16.mxu1 %v5549_v40  ;;  %v1744_v27 = vld [vmem:[#allocation16 + $0x1a0] sm:$0xff]  ;;  %v1742_v36 = vld [vmem:[#allocation16 + $0x190] sm:$0xff] }
 0x454   : > { %v1746_v40 = vld [vmem:[#allocation16 + $0x1b0] sm:$0xff]  ;;  %v5535_v55 = vpack.c.bf16 %v1744_v27, %v1740_v23 }
 0x455   : > { %v5567_v59 = vpack.c.bf16 %v1746_v40, %v1742_v36  ;;  %v1990_v23 = vld [vmem:[#allocation18 + $0x90] sm:$0xff]  ;;  %v2001_v36 = vld [vmem:[#allocation18 + $0xe8] sm:$0xff]  ;;  %v1999_v40 = vld [vmem:[#allocation18 + $0xd8] sm:$0xff] }
 0x456   : > { %5520 = vmatpush1.bf16.msra.mxu0 %v5519_v1  ;;  %5552 = vmatpush1.bf16.msra.mxu1 %v5551_v3  ;;  %v1748_v1 = vld [vmem:[#allocation16 + $0x1c0] sm:$0xff]  ;;  %v5537_v3 = vpack.c.bf16 %v1753_v45, %v1749_v41  ;;  %v1994_v27 = vld [vmem:[#allocation18 + $0xb0] sm:$0xff]  ;;  %v2003_v45 = vld [vmem:[#allocation18 + $0xf8] sm:$0xff] }
 0x457   : > { %5522 = vmatprep.subr.bf16.mxu0 %v5521_v16  ;;  %5554 = vmatprep.subr.bf16.mxu1 %v5553_v17  ;;  %v1750_v16 = vld [vmem:[#allocation16 + $0x1d0] sm:$0xff]  ;;  %v5539_v20 = vpack.c.bf16 %v1752_v9, %v1748_v1 }
 0x458   : > { %v1754_v17 = vld [vmem:[#allocation16 + $0x1f0] sm:$0xff] }
 0x459   : > { %v5571_v25 = vpack.c.bf16 %v1754_v17, %v1750_v16  ;;  %v1998_v1 = vld [vmem:[#allocation18 + $0xd0] sm:$0xff]  ;;  %v2009_v16 = vld [vmem:[#allocation18 + $0x128] sm:$0xff]  ;;  %v2007_v17 = vld [vmem:[#allocation18 + $0x118] sm:$0xff] }
 0x45a   : > { %5524 = vmatpush1.bf16.msra.mxu0 %v5523_v51  ;;  %5556 = vmatpush1.bf16.msra.mxu1 %v5555_v53  ;;  %v1972_v51 = vld [vmem:[#allocation18] sm:$0xff]  ;;  %v8113_v53 = vpack.c.bf16 %v1979_v44, %v1975_v37  ;;  %v2006_v44 = vld [vmem:[#allocation18 + $0x110] sm:$0xff] }
 0x45b   : > { %5526 = vmatprep.subr.bf16.mxu0 %v5525_v0  ;;  %5558 = vmatprep.subr.bf16.mxu1 %v5557_v21  ;;  %v1978_v0 = vld [vmem:[#allocation18 + $0x30] sm:$0xff]  ;;  %v1981_v21 = vld [vmem:[#allocation18 + $0x48] sm:$0xff]  ;;  %v2008_v37 = vld [vmem:[#allocation18 + $0x120] sm:$0xff] }
 0x45c   : > { %v8123_v47 = vpack.c.bf16 %v1985_v43, %v1981_v21 }
 0x45e   : > { %5528 = vmatpush1.bf16.msra.mxu0 %v5527_v57  ;;  %5560 = vmatpush1.bf16.msra.mxu1 %v5559_v18  ;;  %v8125_v57 = vpack.c.bf16 %v1987_v48, %v1983_v46  ;;  %v8127_v18 = vpack.c.bf16 %v1984_v50, %v1980_v49  ;;  %v2015_v46 = vld [vmem:[#allocation18 + $0x158] sm:$0xff]  ;;  %v2012_v49 = vld [vmem:[#allocation18 + $0x140] sm:$0xff] }
 0x45f   : > { %5530 = vmatprep.subr.bf16.mxu0 %v5529_v61  ;;  %5562 = vmatprep.subr.bf16.mxu1 %v5561_v62  ;;  %v8130_v61 = vpack.c.bf16 %v1986_v19, %v1982_v58  ;;  %v1989_v62 = vld [vmem:[#allocation18 + $0x88] sm:$0xff]  ;;  %v2019_v48 = vld [vmem:[#allocation18 + $0x178] sm:$0xff]  ;;  %v2016_v58 = vld [vmem:[#allocation18 + $0x160] sm:$0xff] }
 0x460   : > { %v8135_v10 = vpack.c.bf16 %v1993_v6, %v1989_v62  ;;  %v8171_v50 = vpack.c.bf16 %v2019_v48, %v2015_v46  ;;  %v2014_v19 = vld [vmem:[#allocation18 + $0x150] sm:$0xff]  ;;  %v8174_v6 = vpack.c.bf16 %v2016_v58, %v2012_v49 }
 0x461   : > { %v2018_v62 = vld [vmem:[#allocation18 + $0x170] sm:$0xff] }
 0x462   : > { %5532 = vmatpush1.bf16.msra.mxu0 %v5531_v29  ;;  %5564 = vmatpush1.bf16.msra.mxu1 %v5563_v30  ;;  %v8137_v29 = vpack.c.bf16 %v1995_v22, %v1991_v14  ;;  %v8139_v30 = vpack.c.bf16 %v1992_v28, %v1988_v24  ;;  %v2021_v14 = vld [vmem:[#allocation18 + $0x188] sm:$0xff]  ;;  %v2023_v24 = vld [vmem:[#allocation18 + $0x198] sm:$0xff]  ;;  %v8178_v28 = vpack.c.bf16 %v2018_v62, %v2014_v19 }
 0x463   : > { %5534 = vmatprep.subr.bf16.mxu0 %v5533_v31  ;;  %5566 = vmatprep.subr.bf16.mxu1 %v5565_v32  ;;  %v8142_v31 = vpack.c.bf16 %v1994_v27, %v1990_v23  ;;  %v1997_v32 = vld [vmem:[#allocation18 + $0xc8] sm:$0xff]  ;;  %v2027_v27 = vld [vmem:[#allocation18 + $0x1b8] sm:$0xff] }
 0x464   : > { %v8147_v41 = vpack.c.bf16 %v2001_v36, %v1997_v32  ;;  %v2025_v22 = vld [vmem:[#allocation18 + $0x1a8] sm:$0xff]  ;;  %v2020_v32 = vld [vmem:[#allocation18 + $0x180] sm:$0xff] }
 0x465   : > { %v8180_v23 = vpack.c.bf16 %v2025_v22, %v2021_v14  ;;  %v2024_v36 = vld [vmem:[#allocation18 + $0x1a0] sm:$0xff] }
 0x466   : > { %5536 = vmatpush1.bf16.msra.mxu0 %v5535_v55  ;;  %5568 = vmatpush1.bf16.msra.mxu1 %v5567_v59  ;;  %v8149_v55 = vpack.c.bf16 %v2003_v45, %v1999_v40  ;;  %v8151_v59 = vpack.c.bf16 %v2000_v54, %v1996_v52  ;;  %v8183_v40 = vpack.c.bf16 %v2027_v27, %v2023_v24  ;;  %v2022_v45 = vld [vmem:[#allocation18 + $0x190] sm:$0xff] }
 0x467   : > { %5538 = vmatprep.subr.bf16.mxu0 %v5537_v3  ;;  %5570 = vmatprep.subr.bf16.mxu1 %v5569_v4  ;;  %v2002_v3 = vld [vmem:[#allocation18 + $0xf0] sm:$0xff]  ;;  %v2005_v4 = vld [vmem:[#allocation18 + $0x108] sm:$0xff]  ;;  %v8186_v54 = vpack.c.bf16 %v2024_v36, %v2020_v32 }
 0x468   : > { %v8154_v9 = vpack.c.bf16 %v2002_v3, %v1998_v1  ;;  %v2026_v52 = vld [vmem:[#allocation18 + $0x1b0] sm:$0xff]  ;;  %v2029_v3 = vld [vmem:[#allocation18 + $0x1c8] sm:$0xff] }
 0x469   : > { %v8190_v1 = vpack.c.bf16 %v2026_v52, %v2022_v45 }
 0x46a   : > { %5540 = vmatpush1.bf16.msra.mxu0 %v5539_v20  ;;  %5572 = vmatpush1.bf16.msra.mxu1 %v5571_v25  ;;  %v2011_v20 = vld [vmem:[#allocation18 + $0x138] sm:$0xff]  ;;  %v8158_v25 = vpack.c.bf16 %v2009_v16, %v2005_v4  ;;  %v2033_v4 = vld [vmem:[#allocation18 + $0x1e8] sm:$0xff] }
 0x46b   : > { %5606 = vmatprep.subr.bf16.mxu1 %v8113_v53  ;;  %v2031_v16 = vld [vmem:[#allocation18 + $0x1d8] sm:$0xff] }
 0x46d   : > { %1843 = vmatmul.mubr.f32.vlgmr.msra.gmra.mrb[8].mxu0 %v8003_v26  ;;  %1932 = vmatmul.mubr.f32.vlgmr.msra.gmra.mrb[8].mxu1 %v8003_v26  ;;  %v1973_v26 = vld [vmem:[#allocation18 + $0x8] sm:$0xff] }
 0x46e   : > { %1848 = vmatprep.mubr.f32.mxu0 %v7380_v8  ;;  %1937 = vmatprep.mubr.f32.mxu1 %v7380_v8  ;;  %v8111_v38 = vpack.c.bf16 %v1977_v35, %v1973_v26  ;;  %v8160_v26 = vpack.c.bf16 %v2011_v20, %v2007_v17  ;;  %v2004_v35 = vld [vmem:[#allocation18 + $0x100] sm:$0xff]  ;;  %v8195_v17 = vpack.c.bf16 %v2033_v4, %v2029_v3  ;;  %v2035_v20 = vld [vmem:[#allocation18 + $0x1f8] sm:$0xff] }
 0x470   : > { %5574 = vmatprep.subr.bf16.mxu0 %v8111_v38 }
 0x471   : > { %1849 = vmatmul.mubr.f32.gmra.mrb[10].mxu0 %v8049_v39  ;;  %1938 = vmatmul.mubr.f32.gmra.mrb[10].mxu1 %v8049_v39  ;;  %v1976_v39 = vld [vmem:[#allocation18 + $0x20] sm:$0xff] }
 0x472   : > { %1854 = vmatprep.mubr.f32.mxu0 %v7380_v8  ;;  %1943 = vmatprep.mubr.f32.mxu1 %v7380_v8  ;;  %v8115_v56 = vpack.c.bf16 %v1976_v39, %v1972_v51  ;;  %v8163_v51 = vpack.c.bf16 %v2008_v37, %v2004_v35  ;;  %v2010_v39 = vld [vmem:[#allocation18 + $0x130] sm:$0xff]  ;;  %v2028_v35 = vld [vmem:[#allocation18 + $0x1c0] sm:$0xff] }
 0x473   : > { %v8167_v21 = vpack.c.bf16 %v2010_v39, %v2006_v44  ;;  %v2032_v37 = vld [vmem:[#allocation18 + $0x1e0] sm:$0xff]  ;;  %v8197_v44 = vpack.c.bf16 %v2035_v20, %v2031_v16 }
 0x474   : > { %5576 = vmatpush1.bf16.msra.mxu0 %v8115_v56  ;;  %v8199_v39 = vpack.c.bf16 %v2032_v37, %v2028_v35 }
 0x475   : > { %1855 = vmatmul.mubr.f32.gmra.mrb[12].mxu0 %v8093_v2  ;;  %1944 = vmatmul.mubr.f32.gmra.mrb[12].mxu1 %v8093_v2  ;;  %v8118_v2 = vpack.c.bf16 %v1978_v0, %v1974_v60  ;;  %v2013_v60 = vld [vmem:[#allocation18 + $0x148] sm:$0xff] }
 0x476   : > { %1860 = vmatprep.mubr.f32.mxu0 %v7380_v8  ;;  %1949 = vmatprep.mubr.f32.mxu1 %v7380_v8  ;;  %v2017_v0 = vld [vmem:[#allocation18 + $0x168] sm:$0xff] }
 0x477   : > { %5608 = vmatpush1.bf16.msra.mxu1 %v8118_v2  ;;  %5578 = vmatprep.subr.bf16.mxu0 %v8123_v47  ;;  %v8169_v43 = vpack.c.bf16 %v2017_v0, %v2013_v60  ;;  %v2030_v60 = vld [vmem:[#allocation18 + $0x1d0] sm:$0xff] }
 0x478   : > { %5610 = vmatprep.subr.bf16.mxu1 %v8125_v57  ;;  %5580 = vmatpush1.bf16.msra.mxu0 %v8127_v18  ;;  %v2034_v0 = vld [vmem:[#allocation18 + $0x1f0] sm:$0xff] }
 0x479   : > { %5582 = vmatprep.subr.bf16.mxu0 %v8135_v10  ;;  %v8202_v46 = vpack.c.bf16 %v2034_v0, %v2030_v60 }
 0x47b   : > { %5612 = vmatpush1.bf16.msra.mxu1 %v8130_v61 }
 0x47c   : > { %5614 = vmatprep.subr.bf16.mxu1 %v8137_v29  ;;  %5584 = vmatpush1.bf16.msra.mxu0 %v8139_v30 }
 0x47d   : > { %5586 = vmatprep.subr.bf16.mxu0 %v8147_v41 }
 0x47f   : > { %5616 = vmatpush1.bf16.msra.mxu1 %v8142_v31 }
 0x480   : > { %5618 = vmatprep.subr.bf16.mxu1 %v8149_v55  ;;  %5588 = vmatpush1.bf16.msra.mxu0 %v8151_v59 }
 0x481   : > { %5590 = vmatprep.subr.bf16.mxu0 %v8158_v25 }
 0x483   : > { %5620 = vmatpush1.bf16.msra.mxu1 %v8154_v9 }
 0x484   : > { %5622 = vmatprep.subr.bf16.mxu1 %v8160_v26  ;;  %5592 = vmatpush1.bf16.msra.mxu0 %v8163_v51 }
 0x485   : > { %5594 = vmatprep.subr.bf16.mxu0 %v8169_v43 }
 0x487   : > { %5624 = vmatpush1.bf16.msra.mxu1 %v8167_v21 }
 0x488   : > { %5626 = vmatprep.subr.bf16.mxu1 %v8171_v50  ;;  %5596 = vmatpush1.bf16.msra.mxu0 %v8174_v6 }
 0x489   : > { %5598 = vmatprep.subr.bf16.mxu0 %v8180_v23 }
 0x48b   : > { %5628 = vmatpush1.bf16.msra.mxu1 %v8178_v28 }
 0x48c   : > { %5630 = vmatprep.subr.bf16.mxu1 %v8183_v40  ;;  %5600 = vmatpush1.bf16.msra.mxu0 %v8186_v54 }
 0x48d   : > { %5602 = vmatprep.subr.bf16.mxu0 %v8195_v17 }
 0x48f   : > { %5632 = vmatpush1.bf16.msra.mxu1 %v8190_v1 }
 0x490   : > { %5634 = vmatprep.subr.bf16.mxu1 %v8197_v44  ;;  %5604 = vmatpush1.bf16.msra.mxu0 %v8199_v39 }
 0x491   : > { %5638 = vmatprep.subr.bf16.mxu0 %v8111_v38 }
 0x493   : > { %5636 = vmatpush1.bf16.msra.mxu1 %v8202_v46 }
 0x494   : > { %5670 = vmatprep.subr.bf16.mxu1 %v8113_v53 }
 0x520   : > { %v1580_v48 = vpop.f32.mrb[6].mxu0  ;;  %v1651_v49 = vpop.f32.mrb[6].mxu1 }
 0x521   : > { %v6475_v58 = vadd.f32 %v1580_v48, %v7981_v12  ;;  %v1582_v19 = vpop.f32.mrb[7].mxu0  ;;  %v1653_v62 = vpop.f32.mrb[7].mxu1  ;;  %v6483_v36 = vadd.f32 %v1651_v49, %v7997_v42  ;;  %v2036_v49 = vld [vmem:[#allocation3] sm:$0xff] }
 0x522   : > { %v6476_v14 = vadd.f32 %v1582_v19, %v7984_v13  ;;  %v6484_v27 = vadd.f32 %v1653_v62, %v7991_v33 }
 0x523   : > { %v5196_v22 = vmul.f32 -1.442695, %v6475_v58 }
 0x524   : > { %v5197_v24 = vmul.f32 -1.442695, %v6476_v14  ;;  %v5198_v32 = vmul.f32 -1.442695, %v6484_v27 }
 0x525   : > { %6796 = vpow2.f32 %v5196_v22 }
 0x526   : > { %6798 = vpow2.f32 %v5197_v24 }
 0x527   : > { %6800 = vpow2.f32 %v5198_v32 }
 0x528   : > { %6802 = vtanh.f32 %v6483_v36 }
 0x52f   : > { %v6797_v45 = vpop.eup %6796 }
 0x530   : > { %v6799_v52 = vpop.eup %6798  ;;  %v1663_v3 = vadd.f32 1.0, %v6797_v45 }
 0x531   : > { %v1669_v4 = vadd.f32 1.0, %v6799_v52  ;;  %v6801_v12 = vpop.eup %6800 }
 0x532   : > { %6804 = vrcp.f32 %v1663_v3  ;;  %v6803_v16 = vpop.eup %6802  ;;  %v1676_v37 = vadd.f32 1.0, %v6801_v12 }
 0x533   : > { %6806 = vrcp.f32 %v1669_v4 }
 0x534   : > { %6808 = vrcp.f32 %v1676_v37 }
 0x53c   : > { %v6805_v13 = vpop.eup %6804 }
 0x53d   : > { %v6807_v20 = vpop.eup %6806  ;;  %v1680_v35 = vmul.f32 %v6805_v13, %v6803_v16 }
 0x53e   : > { %v1679_v60 = vmul.f32 %v6807_v20, %v8090_v63  ;;  %v6809_v42 = vpop.eup %6808  ;;  %v1756_v63 = vld [vmem:[%s9048_s14] sm:$0xf]  ;;  %s9052_s14 = sld [smem:[#allocation40_spill]] }
 0x53f   : > { %v8254_v58 = vrot.slane %v1756_v63, %v7973_v7  ;;  %v8257_v19 = vrot.slane %v1756_v63, %v7978_v11  ;;  %v8262_v52 = vrot.slane %v1756_v63, %v7986_v15  ;;  %v8266_v4 = vrot.slane %v1756_v63, %v7993_v34 }
 0x540   : > { %v1681_v33 = vadd.f32 %v1680_v35, %v1679_v60 }
 0x542   : > { %6810 = vtanh.f32 %v1681_v33  ;;  %1685 = vst [vmem:[#allocation2 + $0x8] sm:$0xff] %v1681_v33 }
 0x54c   : > { %v6811_v0 = vpop.eup %6810 }
 0x54d   : > { %v1683_v48 = vmul.f32 %v6811_v0, %v6809_v42  ;;  %v2038_v42 = vld [vmem:[#allocation3 + $0x8] sm:$0xff] }
 0x54f   : > { %1684 = vst [vmem:[#allocation2] sm:$0xff] %v1683_v48  ;;  %1861 = vmatmul.mubr.f32.gmra.mrb[14].mxu0 %v1683_v48  ;;  %1950 = vmatmul.mubr.f32.gmra.mrb[14].mxu1 %v1683_v48 }
 0x550   : > { %2107 = vmatprep.mubr.f32.mxu0 %v7380_v8  ;;  %2178 = vmatprep.mubr.f32.mxu1 %v7380_v8 }
 0x553   : > { %2108 = vmatmul.mubr.f32.vlgmr.msra.gmra.mrb[8].mxu0 %v2036_v49  ;;  %2179 = vmatmul.mubr.f32.vlgmr.msra.gmra.mrb[8].mxu1 %v2036_v49 }
 0x554   : > { %5640 = vmatpush1.bf16.msra.mxu0 %v8115_v56  ;;  %5672 = vmatpush1.bf16.msra.mxu1 %v8118_v2 }
 0x555   : > { %5642 = vmatprep.subr.bf16.mxu0 %v8123_v47  ;;  %5674 = vmatprep.subr.bf16.mxu1 %v8125_v57 }
 0x556   : > { %2286 = vmatprep.mubr.f32.mxu0 %v7380_v8  ;;  %2357 = vmatprep.mubr.f32.mxu1 %v7380_v8 }
 0x558   : > { %5644 = vmatpush1.bf16.msra.mxu0 %v8127_v18  ;;  %5676 = vmatpush1.bf16.msra.mxu1 %v8130_v61 }
 0x559   : > { %5646 = vmatprep.subr.bf16.mxu0 %v8135_v10  ;;  %5678 = vmatprep.subr.bf16.mxu1 %v8137_v29 }
 0x55c   : > { %5648 = vmatpush1.bf16.msra.mxu0 %v8139_v30  ;;  %5680 = vmatpush1.bf16.msra.mxu1 %v8142_v31 }
 0x55d   : > { %5650 = vmatprep.subr.bf16.mxu0 %v8147_v41  ;;  %5682 = vmatprep.subr.bf16.mxu1 %v8149_v55 }
 0x560   : > { %5652 = vmatpush1.bf16.msra.mxu0 %v8151_v59  ;;  %5684 = vmatpush1.bf16.msra.mxu1 %v8154_v9 }
 0x561   : > { %5654 = vmatprep.subr.bf16.mxu0 %v8158_v25  ;;  %5686 = vmatprep.subr.bf16.mxu1 %v8160_v26 }
 0x564   : > { %5656 = vmatpush1.bf16.msra.mxu0 %v8163_v51  ;;  %5688 = vmatpush1.bf16.msra.mxu1 %v8167_v21 }
 0x565   : > { %5658 = vmatprep.subr.bf16.mxu0 %v8169_v43  ;;  %5690 = vmatprep.subr.bf16.mxu1 %v8171_v50 }
 0x568   : > { %5660 = vmatpush1.bf16.msra.mxu0 %v8174_v6  ;;  %5692 = vmatpush1.bf16.msra.mxu1 %v8178_v28 }
 0x569   : > { %5662 = vmatprep.subr.bf16.mxu0 %v8180_v23  ;;  %5694 = vmatprep.subr.bf16.mxu1 %v8183_v40 }
 0x56c   : > { %5664 = vmatpush1.bf16.msra.mxu0 %v8186_v54  ;;  %5696 = vmatpush1.bf16.msra.mxu1 %v8190_v1 }
 0x56d   : > { %5666 = vmatprep.subr.bf16.mxu0 %v8195_v17  ;;  %5698 = vmatprep.subr.bf16.mxu1 %v8197_v44 }
 0x570   : > { %5668 = vmatpush1.bf16.msra.mxu0 %v8199_v39  ;;  %5700 = vmatpush1.bf16.msra.mxu1 %v8202_v46 }
 0x571   : > { %5702 = vmatprep.subr.bf16.mxu0 %v8111_v38  ;;  %5734 = vmatprep.subr.bf16.mxu1 %v8113_v53 }
 0x626   : > { %v2109_v62 = vpop.f32.mrb[8].mxu0  ;;  %v2180_v14 = vpop.f32.mrb[8].mxu1 }
 0x627   : > { %v6485_v22 = vadd.f32 %v2109_v62, %v8254_v58  ;;  %v2111_v24 = vpop.f32.mrb[9].mxu0  ;;  %v2182_v27 = vpop.f32.mrb[9].mxu1  ;;  %v6493_v16 = vadd.f32 %v2180_v14, %v8266_v4 }
 0x628   : > { %v6486_v32 = vadd.f32 %v2111_v24, %v8257_v19  ;;  %v6494_v3 = vadd.f32 %v2182_v27, %v8262_v52 }
 0x629   : > { %v5199_v36 = vmul.f32 -1.442695, %v6485_v22 }
 0x62a   : > { %v5200_v45 = vmul.f32 -1.442695, %v6486_v32  ;;  %v5201_v12 = vmul.f32 -1.442695, %v6494_v3 }
 0x62b   : > { %6812 = vpow2.f32 %v5199_v36 }
 0x62c   : > { %6814 = vpow2.f32 %v5200_v45 }
 0x62d   : > { %6816 = vpow2.f32 %v5201_v12 }
 0x62e   : > { %6818 = vtanh.f32 %v6493_v16 }
 0x635   : > { %v6813_v13 = vpop.eup %6812 }
 0x636   : > { %v6815_v20 = vpop.eup %6814  ;;  %v2192_v35 = vadd.f32 1.0, %v6813_v13 }
 0x637   : > { %v2198_v37 = vadd.f32 1.0, %v6815_v20  ;;  %v6817_v60 = vpop.eup %6816 }
 0x638   : > { %6820 = vrcp.f32 %v2192_v35  ;;  %v6819_v33 = vpop.eup %6818  ;;  %v2205_v62 = vadd.f32 1.0, %v6817_v60 }
 0x639   : > { %6822 = vrcp.f32 %v2198_v37 }
 0x63a   : > { %6824 = vrcp.f32 %v2205_v62 }
 0x642   : > { %v6821_v0 = vpop.eup %6820 }
 0x643   : > { %v6823_v48 = vpop.eup %6822  ;;  %v2209_v49 = vmul.f32 %v6821_v0, %v6819_v33 }
 0x644   : > { %v2208_v63 = vmul.f32 %v6823_v48, %v2038_v42  ;;  %v6825_v14 = vpop.eup %6824 }
 0x646   : > { %v8269_v22 = vadd.f32 %v2209_v49, %v2208_v63 }
 0x648   : > { %6826 = vtanh.f32 %v8269_v22 }
 0x652   : > { %v6827_v24 = vpop.eup %6826 }
 0x653   : > { %v8272_v27 = vmul.f32 %v6827_v24, %v6825_v14 }
 0x655   : > { %2287 = vmatmul.mubr.f32.vlgmr.msra.gmra.mrb[10].mxu0 %v8272_v27  ;;  %2358 = vmatmul.mubr.f32.vlgmr.msra.gmra.mrb[10].mxu1 %v8272_v27 }
 0x656   : > { %5704 = vmatpush1.bf16.msra.mxu0 %v8115_v56  ;;  %5736 = vmatpush1.bf16.msra.mxu1 %v8118_v2 }
 0x657   : > { %5706 = vmatprep.subr.bf16.mxu0 %v8123_v47  ;;  %5738 = vmatprep.subr.bf16.mxu1 %v8125_v57 }
 0x658   : > { %2465 = vmatprep.mubr.f32.mxu0 %v7380_v8  ;;  %2536 = vmatprep.mubr.f32.mxu1 %v7380_v8 }
 0x65a   : > { %5708 = vmatpush1.bf16.msra.mxu0 %v8127_v18  ;;  %5740 = vmatpush1.bf16.msra.mxu1 %v8130_v61 }
 0x65b   : > { %5710 = vmatprep.subr.bf16.mxu0 %v8135_v10  ;;  %5742 = vmatprep.subr.bf16.mxu1 %v8137_v29 }
 0x65e   : > { %5712 = vmatpush1.bf16.msra.mxu0 %v8139_v30  ;;  %5744 = vmatpush1.bf16.msra.mxu1 %v8142_v31 }
 0x65f   : > { %5714 = vmatprep.subr.bf16.mxu0 %v8147_v41  ;;  %5746 = vmatprep.subr.bf16.mxu1 %v8149_v55 }
 0x662   : > { %5716 = vmatpush1.bf16.msra.mxu0 %v8151_v59  ;;  %5748 = vmatpush1.bf16.msra.mxu1 %v8154_v9 }
 0x663   : > { %5718 = vmatprep.subr.bf16.mxu0 %v8158_v25  ;;  %5750 = vmatprep.subr.bf16.mxu1 %v8160_v26 }
 0x666   : > { %5720 = vmatpush1.bf16.msra.mxu0 %v8163_v51  ;;  %5752 = vmatpush1.bf16.msra.mxu1 %v8167_v21 }
 0x667   : > { %5722 = vmatprep.subr.bf16.mxu0 %v8169_v43  ;;  %5754 = vmatprep.subr.bf16.mxu1 %v8171_v50 }
 0x66a   : > { %5724 = vmatpush1.bf16.msra.mxu0 %v8174_v6  ;;  %5756 = vmatpush1.bf16.msra.mxu1 %v8178_v28 }
 0x66b   : > { %5726 = vmatprep.subr.bf16.mxu0 %v8180_v23  ;;  %5758 = vmatprep.subr.bf16.mxu1 %v8183_v40 }
 0x66e   : > { %5728 = vmatpush1.bf16.msra.mxu0 %v8186_v54  ;;  %5760 = vmatpush1.bf16.msra.mxu1 %v8190_v1 }
 0x66f   : > { %5730 = vmatprep.subr.bf16.mxu0 %v8195_v17  ;;  %5762 = vmatprep.subr.bf16.mxu1 %v8197_v44 }
 0x672   : > { %5732 = vmatpush1.bf16.msra.mxu0 %v8199_v39  ;;  %5764 = vmatpush1.bf16.msra.mxu1 %v8202_v46 }
 0x673   : > { %5766 = vmatprep.subr.bf16.mxu0 %v8111_v38  ;;  %5798 = vmatprep.subr.bf16.mxu1 %v8113_v53 }
 0x728   : > { %v2288_v32 = vpop.f32.mrb[10].mxu0  ;;  %v2359_v36 = vpop.f32.mrb[10].mxu1 }
 0x729   : > { %v6487_v45 = vadd.f32 %v2288_v32, %v8254_v58  ;;  %v2290_v3 = vpop.f32.mrb[11].mxu0  ;;  %v2361_v12 = vpop.f32.mrb[11].mxu1  ;;  %v6495_v60 = vadd.f32 %v2359_v36, %v8266_v4 }
 0x72a   : > { %v6488_v16 = vadd.f32 %v2290_v3, %v8257_v19  ;;  %v6496_v35 = vadd.f32 %v2361_v12, %v8262_v52  ;;  %v2759_v12 = vld [vmem:[#allocation19 + $0x10] sm:$0xff] }
 0x72b   : > { %v5202_v13 = vmul.f32 -1.442695, %v6487_v45 }
 0x72c   : > { %v5203_v20 = vmul.f32 -1.442695, %v6488_v16  ;;  %v5204_v37 = vmul.f32 -1.442695, %v6496_v35  ;;  %v2763_v16 = vld [vmem:[#allocation19 + $0x30] sm:$0xff]  ;;  %v2768_v35 = vld [vmem:[#allocation19 + $0x58] sm:$0xff] }
 0x72d   : > { %6828 = vpow2.f32 %v5202_v13  ;;  %v2766_v13 = vld [vmem:[#allocation19 + $0x48] sm:$0xff] }
 0x72e   : > { %6830 = vpow2.f32 %v5203_v20  ;;  %v2770_v20 = vld [vmem:[#allocation19 + $0x68] sm:$0xff] }
 0x72f   : > { %6832 = vpow2.f32 %v5204_v37  ;;  %v2772_v37 = vld [vmem:[#allocation19 + $0x78] sm:$0xff] }
 0x730   : > { %6834 = vtanh.f32 %v6495_v60 }
 0x737   : > { %v6829_v38 = vpop.eup %6828 }
 0x738   : > { %v6831_v33 = vpop.eup %6830  ;;  %v2371_v53 = vadd.f32 1.0, %v6829_v38 }
 0x739   : > { %v2377_v42 = vadd.f32 1.0, %v6831_v33  ;;  %v6833_v0 = vpop.eup %6832 }
 0x73a   : > { %6836 = vrcp.f32 %v2371_v53  ;;  %v6835_v48 = vpop.eup %6834  ;;  %v2384_v14 = vadd.f32 1.0, %v6833_v0  ;;  %v5863_v53 = vpack.c.bf16 %v2763_v16, %v2759_v12  ;;  %v2769_v0 = vld [vmem:[#allocation19 + $0x60] sm:$0xff]  ;;  %v2791_v12 = vld [vmem:[#allocation19 + $0x110] sm:$0xff] }
 0x73b   : > { %6838 = vrcp.f32 %v2377_v42  ;;  %v2765_v42 = vld [vmem:[#allocation19 + $0x40] sm:$0xff]  ;;  %v2795_v16 = vld [vmem:[#allocation19 + $0x130] sm:$0xff] }
 0x73c   : > { %6840 = vrcp.f32 %v2384_v14  ;;  %v2771_v14 = vld [vmem:[#allocation19 + $0x70] sm:$0xff] }
 0x744   : > { %v6837_v49 = vpop.eup %6836 }
 0x745   : > { %v6839_v62 = vpop.eup %6838  ;;  %v2388_v63 = vmul.f32 %v6837_v49, %v6835_v48  ;;  %v5833_v49 = vpack.c.bf16 %v2770_v20, %v2766_v13  ;;  %v2798_v13 = vld [vmem:[#allocation19 + $0x148] sm:$0xff] }
 0x746   : > { %v2387_v24 = vmul.f32 %v6839_v62, %v8269_v22  ;;  %v6841_v36 = vpop.eup %6840  ;;  %v2761_v22 = vld [vmem:[#allocation19 + $0x20] sm:$0xff]  ;;  %v5865_v62 = vpack.c.bf16 %v2772_v37, %v2768_v35  ;;  %v2802_v20 = vld [vmem:[#allocation19 + $0x168] sm:$0xff]  ;;  %v2800_v35 = vld [vmem:[#allocation19 + $0x158] sm:$0xff] }
 0x747   : > { %v2804_v37 = vld [vmem:[#allocation19 + $0x178] sm:$0xff] }
 0x748   : > { %v8315_v32 = vadd.f32 %v2388_v63, %v2387_v24  ;;  %v2767_v63 = vld [vmem:[#allocation19 + $0x50] sm:$0xff]  ;;  %v2774_v24 = vld [vmem:[#allocation19 + $0x88] sm:$0xff] }
 0x74a   : > { %6842 = vtanh.f32 %v8315_v32 }
 0x754   : > { %v6843_v45 = vpop.eup %6842 }
 0x755   : > { %v8318_v3 = vmul.f32 %v6843_v45, %v6841_v36  ;;  %v2776_v36 = vld [vmem:[#allocation19 + $0x98] sm:$0xff] }
 0x756   : > { %v2780_v45 = vld [vmem:[#allocation19 + $0xb8] sm:$0xff] }
 0x757   : > { %2466 = vmatmul.mubr.f32.vlgmr.msra.gmra.mrb[12].mxu0 %v8318_v3  ;;  %2537 = vmatmul.mubr.f32.vlgmr.msra.gmra.mrb[12].mxu1 %v8318_v3 }
 0x758   : > { %5768 = vmatpush1.bf16.msra.mxu0 %v8115_v56  ;;  %5800 = vmatpush1.bf16.msra.mxu1 %v8118_v2  ;;  %v2758_v56 = vld [vmem:[#allocation19 + $0x8] sm:$0xff] }
 0x759   : > { %5770 = vmatprep.subr.bf16.mxu0 %v8123_v47  ;;  %5802 = vmatprep.subr.bf16.mxu1 %v8125_v57  ;;  %v2762_v2 = vld [vmem:[#allocation19 + $0x28] sm:$0xff]  ;;  %v2760_v47 = vld [vmem:[#allocation19 + $0x18] sm:$0xff] }
 0x75a   : > { %2644 = vmatprep.mubr.f32.mxu0 %v7380_v8  ;;  %2715 = vmatprep.mubr.f32.mxu1 %v7380_v8  ;;  %v5829_v57 = vpack.c.bf16 %v2762_v2, %v2758_v56  ;;  %v5835_v56 = vpack.c.bf16 %v2769_v0, %v2765_v42  ;;  %v5867_v2 = vpack.c.bf16 %v2771_v14, %v2767_v63  ;;  %v2806_v63 = vld [vmem:[#allocation19 + $0x188] sm:$0xff] }
 0x75b   : > { %v5849_v42 = vpack.c.bf16 %v2802_v20, %v2798_v13  ;;  %v5881_v0 = vpack.c.bf16 %v2804_v37, %v2800_v35  ;;  %v2810_v14 = vld [vmem:[#allocation19 + $0x1a8] sm:$0xff]  ;;  %v3052_v20 = vld [vmem:[#allocation21 + $0x78] sm:$0xff]  ;;  %v3045_v35 = vld [vmem:[#allocation21 + $0x40] sm:$0xff] }
 0x75c   : > { %5772 = vmatpush1.bf16.msra.mxu0 %v8127_v18  ;;  %5804 = vmatpush1.bf16.msra.mxu1 %v8130_v61  ;;  %v2764_v18 = vld [vmem:[#allocation19 + $0x38] sm:$0xff]  ;;  %v3049_v37 = vld [vmem:[#allocation21 + $0x60] sm:$0xff] }
 0x75d   : > { %5774 = vmatprep.subr.bf16.mxu0 %v8135_v10  ;;  %5806 = vmatprep.subr.bf16.mxu1 %v8137_v29  ;;  %v5861_v61 = vpack.c.bf16 %v2764_v18, %v2760_v47  ;;  %v2773_v47 = vld [vmem:[#allocation19 + $0x80] sm:$0xff] }
 0x760   : > { %5776 = vmatpush1.bf16.msra.mxu0 %v8139_v30  ;;  %5808 = vmatpush1.bf16.msra.mxu1 %v8142_v31 }
 0x761   : > { %5778 = vmatprep.subr.bf16.mxu0 %v8147_v41  ;;  %5810 = vmatprep.subr.bf16.mxu1 %v8149_v55 }
 0x764   : > { %5780 = vmatpush1.bf16.msra.mxu0 %v8151_v59  ;;  %5812 = vmatpush1.bf16.msra.mxu1 %v8154_v9 }
 0x765   : > { %5782 = vmatprep.subr.bf16.mxu0 %v8158_v25  ;;  %5814 = vmatprep.subr.bf16.mxu1 %v8160_v26 }
 0x768   : > { %5784 = vmatpush1.bf16.msra.mxu0 %v8163_v51  ;;  %5816 = vmatpush1.bf16.msra.mxu1 %v8167_v21 }
 0x769   : > { %5786 = vmatprep.subr.bf16.mxu0 %v8169_v43  ;;  %5818 = vmatprep.subr.bf16.mxu1 %v8171_v50 }
 0x76c   : > { %5788 = vmatpush1.bf16.msra.mxu0 %v8174_v6  ;;  %5820 = vmatpush1.bf16.msra.mxu1 %v8178_v28 }
 0x76d   : > { %5790 = vmatprep.subr.bf16.mxu0 %v8180_v23  ;;  %5822 = vmatprep.subr.bf16.mxu1 %v8183_v40 }
 0x770   : > { %5792 = vmatpush1.bf16.msra.mxu0 %v8186_v54  ;;  %5824 = vmatpush1.bf16.msra.mxu1 %v8190_v1 }
 0x771   : > { %5794 = vmatprep.subr.bf16.mxu0 %v8195_v17  ;;  %5826 = vmatprep.subr.bf16.mxu1 %v8197_v44 }
 0x774   : > { %5796 = vmatpush1.bf16.msra.mxu0 %v8199_v39  ;;  %5828 = vmatpush1.bf16.msra.mxu1 %v8202_v46  ;;  %v2757_v46 = vld [vmem:[#allocation19] sm:$0xff] }
 0x775   : > { %5830 = vmatprep.subr.bf16.mxu0 %v5829_v57  ;;  %5862 = vmatprep.subr.bf16.mxu1 %v5861_v61  ;;  %v5831_v33 = vpack.c.bf16 %v2761_v22, %v2757_v46  ;;  %v2777_v57 = vld [vmem:[#allocation19 + $0xa0] sm:$0xff]  ;;  %v5869_v61 = vpack.c.bf16 %v2780_v45, %v2776_v36 }
 0x82a   : > { %v2467_v10 = vpop.f32.mrb[12].mxu0  ;;  %v2538_v29 = vpop.f32.mrb[12].mxu1 }
 0x82b   : > { %v6489_v30 = vadd.f32 %v2467_v10, %v8254_v58  ;;  %v2469_v31 = vpop.f32.mrb[13].mxu0  ;;  %v2540_v41 = vpop.f32.mrb[13].mxu1  ;;  %v6497_v51 = vadd.f32 %v2538_v29, %v8266_v4  ;;  %v2775_v10 = vld [vmem:[#allocation19 + $0x90] sm:$0xff] }
 0x82c   : > { %v6490_v55 = vadd.f32 %v2469_v31, %v8257_v19  ;;  %v6498_v25 = vadd.f32 %v2540_v41, %v8262_v52  ;;  %v2779_v29 = vld [vmem:[#allocation19 + $0xb0] sm:$0xff]  ;;  %v2786_v31 = vld [vmem:[#allocation19 + $0xe8] sm:$0xff]  ;;  %v2784_v41 = vld [vmem:[#allocation19 + $0xd8] sm:$0xff] }
 0x82d   : > { %v5205_v59 = vmul.f32 -1.442695, %v6489_v30  ;;  %v2782_v30 = vld [vmem:[#allocation19 + $0xc8] sm:$0xff] }
 0x82e   : > { %v5206_v9 = vmul.f32 -1.442695, %v6490_v55  ;;  %v5207_v26 = vmul.f32 -1.442695, %v6498_v25  ;;  %v2788_v55 = vld [vmem:[#allocation19 + $0xf8] sm:$0xff]  ;;  %v2781_v25 = vld [vmem:[#allocation19 + $0xc0] sm:$0xff] }
 0x82f   : > { %6844 = vpow2.f32 %v5205_v59  ;;  %v5839_v59 = vpack.c.bf16 %v2777_v57, %v2773_v47  ;;  %v5853_v47 = vpack.c.bf16 %v2810_v14, %v2806_v63  ;;  %v3060_v14 = vld [vmem:[#allocation21 + $0xb8] sm:$0xff] }
 0x830   : > { %6846 = vpow2.f32 %v5206_v9  ;;  %v5871_v9 = vpack.c.bf16 %v2779_v29, %v2775_v10  ;;  %v2814_v10 = vld [vmem:[#allocation19 + $0x1c8] sm:$0xff] }
 0x831   : > { %6848 = vpow2.f32 %v5207_v26  ;;  %v2785_v26 = vld [vmem:[#allocation19 + $0xe0] sm:$0xff]  ;;  %v2818_v29 = vld [vmem:[#allocation19 + $0x1e8] sm:$0xff] }
 0x832   : > { %6850 = vtanh.f32 %v6497_v51  ;;  %v5841_v51 = vpack.c.bf16 %v2786_v31, %v2782_v30  ;;  %v2816_v30 = vld [vmem:[#allocation19 + $0x1d8] sm:$0xff] }
 0x833   : > { %v2820_v31 = vld [vmem:[#allocation19 + $0x1f8] sm:$0xff] }
 0x839   : > { %v6845_v21 = vpop.eup %6844 }
 0x83a   : > { %v6847_v43 = vpop.eup %6846  ;;  %v2550_v50 = vadd.f32 1.0, %v6845_v21  ;;  %v5873_v21 = vpack.c.bf16 %v2788_v55, %v2784_v41 }
 0x83b   : > { %v2556_v6 = vadd.f32 1.0, %v6847_v43  ;;  %v6849_v28 = vpop.eup %6848  ;;  %v2783_v43 = vld [vmem:[#allocation19 + $0xd0] sm:$0xff] }
 0x83c   : > { %6852 = vrcp.f32 %v2550_v50  ;;  %v6851_v23 = vpop.eup %6850  ;;  %v2563_v17 = vadd.f32 1.0, %v6849_v28  ;;  %v2787_v50 = vld [vmem:[#allocation19 + $0xf0] sm:$0xff]  ;;  %v2794_v28 = vld [vmem:[#allocation19 + $0x128] sm:$0xff] }
 0x83d   : > { %6854 = vrcp.f32 %v2556_v6  ;;  %v2790_v6 = vld [vmem:[#allocation19 + $0x108] sm:$0xff] }
 0x83e   : > { %6856 = vrcp.f32 %v2563_v17  ;;  %v2789_v17 = vld [vmem:[#allocation19 + $0x100] sm:$0xff]  ;;  %v5845_v46 = vpack.c.bf16 %v2794_v28, %v2790_v6  ;;  %v3042_v6 = vld [vmem:[#allocation21 + $0x28] sm:$0xff]  ;;  %v3040_v28 = vld [vmem:[#allocation21 + $0x18] sm:$0xff] }
 0x846   : > { %v6853_v40 = vpop.eup %6852 }
 0x847   : > { %v6855_v54 = vpop.eup %6854  ;;  %v2567_v1 = vmul.f32 %v6853_v40, %v6851_v23  ;;  %v2792_v23 = vld [vmem:[#allocation19 + $0x118] sm:$0xff] }
 0x848   : > { %v2566_v44 = vmul.f32 %v6855_v54, %v8315_v32  ;;  %v6857_v60 = vpop.eup %6856  ;;  %v2778_v32 = vld [vmem:[#allocation19 + $0xa8] sm:$0xff]  ;;  %v2796_v40 = vld [vmem:[#allocation19 + $0x138] sm:$0xff]  ;;  %v5843_v54 = vpack.c.bf16 %v2785_v26, %v2781_v25  ;;  %v5889_v25 = vpack.c.bf16 %v2820_v31, %v2816_v30  ;;  %v2817_v26 = vld [vmem:[#allocation19 + $0x1e0] sm:$0xff] }
 0x849   : > { %v5837_v18 = vpack.c.bf16 %v2778_v32, %v2774_v24  ;;  %v5877_v22 = vpack.c.bf16 %v2796_v40, %v2792_v23  ;;  %v2808_v24 = vld [vmem:[#allocation19 + $0x198] sm:$0xff]  ;;  %v3061_v30 = vld [vmem:[#allocation21 + $0xc0] sm:$0xff] }
 0x84a   : > { %v8359_v39 = vadd.f32 %v2567_v1, %v2566_v44  ;;  %v5875_v1 = vpack.c.bf16 %v2787_v50, %v2783_v43  ;;  %v2793_v44 = vld [vmem:[#allocation19 + $0x120] sm:$0xff]  ;;  %v2812_v32 = vld [vmem:[#allocation19 + $0x1b8] sm:$0xff] }
 0x84b   : > { %v5885_v57 = vpack.c.bf16 %v2812_v32, %v2808_v24  ;;  %v3044_v40 = vld [vmem:[#allocation21 + $0x38] sm:$0xff]  ;;  %v3053_v24 = vld [vmem:[#allocation21 + $0x80] sm:$0xff] }
 0x84c   : > { %6858 = vtanh.f32 %v8359_v39  ;;  %v3057_v32 = vld [vmem:[#allocation21 + $0xa0] sm:$0xff] }
 0x84d   : > { %v3065_v31 = vld [vmem:[#allocation21 + $0xe0] sm:$0xff] }
 0x856   : > { %v6859_v38 = vpop.eup %6858 }
 0x857   : > { %v8362_v48 = vmul.f32 %v6859_v38, %v6857_v60  ;;  %v5847_v60 = vpack.c.bf16 %v2793_v44, %v2789_v17  ;;  %v5879_v38 = vpack.c.bf16 %v2795_v16, %v2791_v12  ;;  %v3039_v44 = vld [vmem:[#allocation21 + $0x10] sm:$0xff]  ;;  %v3050_v12 = vld [vmem:[#allocation21 + $0x68] sm:$0xff]  ;;  %v3048_v16 = vld [vmem:[#allocation21 + $0x58] sm:$0xff] }
 0x859   : > { %2645 = vmatmul.mubr.f32.vlgmr.msra.gmra.mrb[14].mxu0 %v8362_v48  ;;  %2716 = vmatmul.mubr.f32.vlgmr.msra.gmra.mrb[14].mxu1 %v8362_v48 }
 0x85a   : > { %5832 = vmatpush1.bf16.msra.mxu0 %v5831_v33  ;;  %5864 = vmatpush1.bf16.msra.mxu1 %v5863_v53  ;;  %v2797_v33 = vld [vmem:[#allocation19 + $0x140] sm:$0xff] }
 0x85b   : > { %5834 = vmatprep.subr.bf16.mxu0 %v5833_v49  ;;  %5866 = vmatprep.subr.bf16.mxu1 %v5865_v62  ;;  %v2801_v53 = vld [vmem:[#allocation19 + $0x160] sm:$0xff]  ;;  %v2799_v49 = vld [vmem:[#allocation19 + $0x150] sm:$0xff] }
 0x85c   : > { %2907 = vmatprep.mubr.f32.mxu0 %v7380_v8  ;;  %2996 = vmatprep.mubr.f32.mxu1 %v7380_v8  ;;  %v2803_v62 = vld [vmem:[#allocation19 + $0x170] sm:$0xff]  ;;  %v5851_v36 = vpack.c.bf16 %v2801_v53, %v2797_v33 }
 0x85d   : > { %v5883_v45 = vpack.c.bf16 %v2803_v62, %v2799_v49  ;;  %v3047_v33 = vld [vmem:[#allocation21 + $0x50] sm:$0xff]  ;;  %v3058_v49 = vld [vmem:[#allocation21 + $0xa8] sm:$0xff]  ;;  %v3056_v62 = vld [vmem:[#allocation21 + $0x98] sm:$0xff] }
 0x85e   : > { %5836 = vmatpush1.bf16.msra.mxu0 %v5835_v56  ;;  %5868 = vmatpush1.bf16.msra.mxu1 %v5867_v2  ;;  %v2805_v56 = vld [vmem:[#allocation19 + $0x180] sm:$0xff]  ;;  %v3051_v53 = vld [vmem:[#allocation21 + $0x70] sm:$0xff] }
 0x85f   : > { %5838 = vmatprep.subr.bf16.mxu0 %v5837_v18  ;;  %5870 = vmatprep.subr.bf16.mxu1 %v5869_v61  ;;  %v2809_v2 = vld [vmem:[#allocation19 + $0x1a0] sm:$0xff]  ;;  %v2807_v18 = vld [vmem:[#allocation19 + $0x190] sm:$0xff] }
 0x860   : > { %v2811_v61 = vld [vmem:[#allocation19 + $0x1b0] sm:$0xff]  ;;  %v5855_v41 = vpack.c.bf16 %v2809_v2, %v2805_v56 }
 0x861   : > { %v5887_v55 = vpack.c.bf16 %v2811_v61, %v2807_v18  ;;  %v3055_v56 = vld [vmem:[#allocation21 + $0x90] sm:$0xff]  ;;  %v3066_v18 = vld [vmem:[#allocation21 + $0xe8] sm:$0xff]  ;;  %v3064_v61 = vld [vmem:[#allocation21 + $0xd8] sm:$0xff] }
 0x862   : > { %5840 = vmatpush1.bf16.msra.mxu0 %v5839_v59  ;;  %5872 = vmatpush1.bf16.msra.mxu1 %v5871_v9  ;;  %v2813_v59 = vld [vmem:[#allocation19 + $0x1c0] sm:$0xff]  ;;  %v5857_v9 = vpack.c.bf16 %v2818_v29, %v2814_v10  ;;  %v3059_v2 = vld [vmem:[#allocation21 + $0xb0] sm:$0xff]  ;;  %v3068_v29 = vld [vmem:[#allocation21 + $0xf8] sm:$0xff] }
 0x863   : > { %5842 = vmatprep.subr.bf16.mxu0 %v5841_v51  ;;  %5874 = vmatprep.subr.bf16.mxu1 %v5873_v21  ;;  %v2815_v51 = vld [vmem:[#allocation19 + $0x1d0] sm:$0xff]  ;;  %v5859_v43 = vpack.c.bf16 %v2817_v26, %v2813_v59 }
 0x864   : > { %v2819_v21 = vld [vmem:[#allocation19 + $0x1f0] sm:$0xff] }
 0x865   : > { %v5891_v50 = vpack.c.bf16 %v2819_v21, %v2815_v51  ;;  %v3063_v59 = vld [vmem:[#allocation21 + $0xd0] sm:$0xff]  ;;  %v3074_v51 = vld [vmem:[#allocation21 + $0x128] sm:$0xff]  ;;  %v3072_v21 = vld [vmem:[#allocation21 + $0x118] sm:$0xff] }
 0x866   : > { %5844 = vmatpush1.bf16.msra.mxu0 %v5843_v54  ;;  %5876 = vmatpush1.bf16.msra.mxu1 %v5875_v1  ;;  %v3037_v54 = vld [vmem:[#allocation21] sm:$0xff]  ;;  %v8382_v1 = vpack.c.bf16 %v3044_v40, %v3040_v28  ;;  %v3071_v40 = vld [vmem:[#allocation21 + $0x110] sm:$0xff] }
 0x867   : > { %5846 = vmatprep.subr.bf16.mxu0 %v5845_v46  ;;  %5878 = vmatprep.subr.bf16.mxu1 %v5877_v22  ;;  %v3043_v46 = vld [vmem:[#allocation21 + $0x30] sm:$0xff]  ;;  %v3046_v22 = vld [vmem:[#allocation21 + $0x48] sm:$0xff]  ;;  %v3073_v28 = vld [vmem:[#allocation21 + $0x120] sm:$0xff] }
 0x868   : > { %v8392_v13 = vpack.c.bf16 %v3050_v12, %v3046_v22 }
 0x86a   : > { %5848 = vmatpush1.bf16.msra.mxu0 %v5847_v60  ;;  %5880 = vmatpush1.bf16.msra.mxu1 %v5879_v38  ;;  %v8394_v60 = vpack.c.bf16 %v3052_v20, %v3048_v16  ;;  %v8396_v38 = vpack.c.bf16 %v3049_v37, %v3045_v35  ;;  %v3080_v16 = vld [vmem:[#allocation21 + $0x158] sm:$0xff]  ;;  %v3077_v35 = vld [vmem:[#allocation21 + $0x140] sm:$0xff] }
 0x86b   : > { %5850 = vmatprep.subr.bf16.mxu0 %v5849_v42  ;;  %5882 = vmatprep.subr.bf16.mxu1 %v5881_v0  ;;  %v8399_v42 = vpack.c.bf16 %v3051_v53, %v3047_v33  ;;  %v3054_v0 = vld [vmem:[#allocation21 + $0x88] sm:$0xff]  ;;  %v3084_v20 = vld [vmem:[#allocation21 + $0x178] sm:$0xff]  ;;  %v3081_v33 = vld [vmem:[#allocation21 + $0x160] sm:$0xff] }
 0x86c   : > { %v8404_v63 = vpack.c.bf16 %v3058_v49, %v3054_v0  ;;  %v8440_v37 = vpack.c.bf16 %v3084_v20, %v3080_v16  ;;  %v3079_v53 = vld [vmem:[#allocation21 + $0x150] sm:$0xff]  ;;  %v8443_v49 = vpack.c.bf16 %v3081_v33, %v3077_v35 }
 0x86d   : > { %v3083_v0 = vld [vmem:[#allocation21 + $0x170] sm:$0xff] }
 0x86e   : > { %5852 = vmatpush1.bf16.msra.mxu0 %v5851_v36  ;;  %5884 = vmatpush1.bf16.msra.mxu1 %v5883_v45  ;;  %v8406_v36 = vpack.c.bf16 %v3060_v14, %v3056_v62  ;;  %v8408_v45 = vpack.c.bf16 %v3057_v32, %v3053_v24  ;;  %v3086_v62 = vld [vmem:[#allocation21 + $0x188] sm:$0xff]  ;;  %v3088_v24 = vld [vmem:[#allocation21 + $0x198] sm:$0xff]  ;;  %v8447_v32 = vpack.c.bf16 %v3083_v0, %v3079_v53 }
 0x86f   : > { %5854 = vmatprep.subr.bf16.mxu0 %v5853_v47  ;;  %5886 = vmatprep.subr.bf16.mxu1 %v5885_v57  ;;  %v8411_v47 = vpack.c.bf16 %v3059_v2, %v3055_v56  ;;  %v3062_v57 = vld [vmem:[#allocation21 + $0xc8] sm:$0xff]  ;;  %v3092_v2 = vld [vmem:[#allocation21 + $0x1b8] sm:$0xff] }
 0x870   : > { %v8416_v10 = vpack.c.bf16 %v3066_v18, %v3062_v57  ;;  %v3090_v14 = vld [vmem:[#allocation21 + $0x1a8] sm:$0xff]  ;;  %v3085_v57 = vld [vmem:[#allocation21 + $0x180] sm:$0xff] }
 0x871   : > { %v8449_v56 = vpack.c.bf16 %v3090_v14, %v3086_v62  ;;  %v3089_v18 = vld [vmem:[#allocation21 + $0x1a0] sm:$0xff] }
 0x872   : > { %5856 = vmatpush1.bf16.msra.mxu0 %v5855_v41  ;;  %5888 = vmatpush1.bf16.msra.mxu1 %v5887_v55  ;;  %v8418_v41 = vpack.c.bf16 %v3068_v29, %v3064_v61  ;;  %v8420_v55 = vpack.c.bf16 %v3065_v31, %v3061_v30  ;;  %v8452_v61 = vpack.c.bf16 %v3092_v2, %v3088_v24  ;;  %v3087_v29 = vld [vmem:[#allocation21 + $0x190] sm:$0xff] }
 0x873   : > { %5858 = vmatprep.subr.bf16.mxu0 %v5857_v9  ;;  %5890 = vmatprep.subr.bf16.mxu1 %v5889_v25  ;;  %v3067_v9 = vld [vmem:[#allocation21 + $0xf0] sm:$0xff]  ;;  %v3070_v25 = vld [vmem:[#allocation21 + $0x108] sm:$0xff]  ;;  %v8455_v31 = vpack.c.bf16 %v3089_v18, %v3085_v57 }
 0x874   : > { %v8423_v26 = vpack.c.bf16 %v3067_v9, %v3063_v59  ;;  %v3091_v30 = vld [vmem:[#allocation21 + $0x1b0] sm:$0xff]  ;;  %v3094_v9 = vld [vmem:[#allocation21 + $0x1c8] sm:$0xff] }
 0x875   : > { %v8459_v59 = vpack.c.bf16 %v3091_v30, %v3087_v29 }
 0x876   : > { %5860 = vmatpush1.bf16.msra.mxu0 %v5859_v43  ;;  %5892 = vmatpush1.bf16.msra.mxu1 %v5891_v50  ;;  %v3076_v43 = vld [vmem:[#allocation21 + $0x138] sm:$0xff]  ;;  %v8427_v50 = vpack.c.bf16 %v3074_v51, %v3070_v25  ;;  %v3098_v25 = vld [vmem:[#allocation21 + $0x1e8] sm:$0xff] }
 0x877   : > { %5926 = vmatprep.subr.bf16.mxu1 %v8382_v1  ;;  %v3096_v51 = vld [vmem:[#allocation21 + $0x1d8] sm:$0xff] }
 0x879   : > { %2908 = vmatmul.mubr.f32.vlgmr.msra.gmra.mrb[16].mxu0 %v8272_v27  ;;  %2997 = vmatmul.mubr.f32.vlgmr.msra.gmra.mrb[16].mxu1 %v8272_v27  ;;  %v3038_v27 = vld [vmem:[#allocation21 + $0x8] sm:$0xff] }
 0x87a   : > { %2913 = vmatprep.mubr.f32.mxu0 %v7380_v8  ;;  %3002 = vmatprep.mubr.f32.mxu1 %v7380_v8  ;;  %v8380_v23 = vpack.c.bf16 %v3042_v6, %v3038_v27  ;;  %v8429_v27 = vpack.c.bf16 %v3076_v43, %v3072_v21  ;;  %v3069_v6 = vld [vmem:[#allocation21 + $0x100] sm:$0xff]  ;;  %v8464_v21 = vpack.c.bf16 %v3098_v25, %v3094_v9  ;;  %v3100_v43 = vld [vmem:[#allocation21 + $0x1f8] sm:$0xff] }
 0x87c   : > { %5894 = vmatprep.subr.bf16.mxu0 %v8380_v23 }
 0x87d   : > { %2914 = vmatmul.mubr.f32.gmra.mrb[18].mxu0 %v8318_v3  ;;  %3003 = vmatmul.mubr.f32.gmra.mrb[18].mxu1 %v8318_v3  ;;  %v3041_v3 = vld [vmem:[#allocation21 + $0x20] sm:$0xff] }
 0x87e   : > { %2919 = vmatprep.mubr.f32.mxu0 %v7380_v8  ;;  %3008 = vmatprep.mubr.f32.mxu1 %v7380_v8  ;;  %v8384_v17 = vpack.c.bf16 %v3041_v3, %v3037_v54  ;;  %v8432_v54 = vpack.c.bf16 %v3073_v28, %v3069_v6  ;;  %v3075_v3 = vld [vmem:[#allocation21 + $0x130] sm:$0xff]  ;;  %v3093_v6 = vld [vmem:[#allocation21 + $0x1c0] sm:$0xff] }
 0x87f   : > { %v8436_v22 = vpack.c.bf16 %v3075_v3, %v3071_v40  ;;  %v3097_v28 = vld [vmem:[#allocation21 + $0x1e0] sm:$0xff]  ;;  %v8466_v40 = vpack.c.bf16 %v3100_v43, %v3096_v51 }
 0x880   : > { %5896 = vmatpush1.bf16.msra.mxu0 %v8384_v17  ;;  %v8468_v3 = vpack.c.bf16 %v3097_v28, %v3093_v6 }
 0x881   : > { %2920 = vmatmul.mubr.f32.gmra.mrb[20].mxu0 %v8362_v48  ;;  %3009 = vmatmul.mubr.f32.gmra.mrb[20].mxu1 %v8362_v48  ;;  %v8387_v48 = vpack.c.bf16 %v3043_v46, %v3039_v44  ;;  %v3078_v44 = vld [vmem:[#allocation21 + $0x148] sm:$0xff] }
 0x882   : > { %2925 = vmatprep.mubr.f32.mxu0 %v7380_v8  ;;  %3014 = vmatprep.mubr.f32.mxu1 %v7380_v8  ;;  %v3082_v46 = vld [vmem:[#allocation21 + $0x168] sm:$0xff] }
 0x883   : > { %5928 = vmatpush1.bf16.msra.mxu1 %v8387_v48  ;;  %5898 = vmatprep.subr.bf16.mxu0 %v8392_v13  ;;  %v8438_v12 = vpack.c.bf16 %v3082_v46, %v3078_v44  ;;  %v3095_v44 = vld [vmem:[#allocation21 + $0x1d0] sm:$0xff] }
 0x884   : > { %5930 = vmatprep.subr.bf16.mxu1 %v8394_v60  ;;  %5900 = vmatpush1.bf16.msra.mxu0 %v8396_v38  ;;  %v3099_v46 = vld [vmem:[#allocation21 + $0x1f0] sm:$0xff] }
 0x885   : > { %5902 = vmatprep.subr.bf16.mxu0 %v8404_v63  ;;  %v8471_v16 = vpack.c.bf16 %v3099_v46, %v3095_v44 }
 0x887   : > { %5932 = vmatpush1.bf16.msra.mxu1 %v8399_v42 }
 0x888   : > { %5934 = vmatprep.subr.bf16.mxu1 %v8406_v36  ;;  %5904 = vmatpush1.bf16.msra.mxu0 %v8408_v45 }
 0x889   : > { %5906 = vmatprep.subr.bf16.mxu0 %v8416_v10 }
 0x88b   : > { %5936 = vmatpush1.bf16.msra.mxu1 %v8411_v47 }
 0x88c   : > { %5938 = vmatprep.subr.bf16.mxu1 %v8418_v41  ;;  %5908 = vmatpush1.bf16.msra.mxu0 %v8420_v55 }
 0x88d   : > { %5910 = vmatprep.subr.bf16.mxu0 %v8427_v50 }
 0x88f   : > { %5940 = vmatpush1.bf16.msra.mxu1 %v8423_v26 }
 0x890   : > { %5942 = vmatprep.subr.bf16.mxu1 %v8429_v27  ;;  %5912 = vmatpush1.bf16.msra.mxu0 %v8432_v54 }
 0x891   : > { %5914 = vmatprep.subr.bf16.mxu0 %v8438_v12 }
 0x893   : > { %5944 = vmatpush1.bf16.msra.mxu1 %v8436_v22 }
 0x894   : > { %5946 = vmatprep.subr.bf16.mxu1 %v8440_v37  ;;  %5916 = vmatpush1.bf16.msra.mxu0 %v8443_v49 }
 0x895   : > { %5918 = vmatprep.subr.bf16.mxu0 %v8449_v56 }
 0x897   : > { %5948 = vmatpush1.bf16.msra.mxu1 %v8447_v32 }
 0x898   : > { %5950 = vmatprep.subr.bf16.mxu1 %v8452_v61  ;;  %5920 = vmatpush1.bf16.msra.mxu0 %v8455_v31 }
 0x899   : > { %5922 = vmatprep.subr.bf16.mxu0 %v8464_v21 }
 0x89b   : > { %5952 = vmatpush1.bf16.msra.mxu1 %v8459_v59 }
 0x89c   : > { %5954 = vmatprep.subr.bf16.mxu1 %v8466_v40  ;;  %5924 = vmatpush1.bf16.msra.mxu0 %v8468_v3 }
 0x89d   : > { %5958 = vmatprep.subr.bf16.mxu0 %v8380_v23 }
 0x89f   : > { %5956 = vmatpush1.bf16.msra.mxu1 %v8471_v16 }
 0x8a0   : > { %5990 = vmatprep.subr.bf16.mxu1 %v8382_v1 }
 0x92c   : > { %v2646_v20 = vpop.f32.mrb[14].mxu0  ;;  %v2717_v35 = vpop.f32.mrb[14].mxu1 }
 0x92d   : > { %v6491_v33 = vadd.f32 %v2646_v20, %v8254_v58  ;;  %v2648_v53 = vpop.f32.mrb[15].mxu0  ;;  %v2719_v0 = vpop.f32.mrb[15].mxu1  ;;  %v6499_v18 = vadd.f32 %v2717_v35, %v8266_v4  ;;  %v3101_v35 = vld [vmem:[#allocation4] sm:$0xff] }
 0x92e   : > { %v6492_v62 = vadd.f32 %v2648_v53, %v8257_v19  ;;  %v6500_v2 = vadd.f32 %v2719_v0, %v8262_v52 }
 0x92f   : > { %v5208_v14 = vmul.f32 -1.442695, %v6491_v33 }
 0x930   : > { %v5209_v24 = vmul.f32 -1.442695, %v6492_v62  ;;  %v5210_v57 = vmul.f32 -1.442695, %v6500_v2 }
 0x931   : > { %6860 = vpow2.f32 %v5208_v14 }
 0x932   : > { %6862 = vpow2.f32 %v5209_v24 }
 0x933   : > { %6864 = vpow2.f32 %v5210_v57 }
 0x934   : > { %6866 = vtanh.f32 %v6499_v18 }
 0x93b   : > { %v6861_v29 = vpop.eup %6860 }
 0x93c   : > { %v6863_v30 = vpop.eup %6862  ;;  %v2729_v9 = vadd.f32 1.0, %v6861_v29 }
 0x93d   : > { %v2735_v25 = vadd.f32 1.0, %v6863_v30  ;;  %v6865_v58 = vpop.eup %6864 }
 0x93e   : > { %6868 = vrcp.f32 %v2729_v9  ;;  %v6867_v51 = vpop.eup %6866  ;;  %v2742_v28 = vadd.f32 1.0, %v6865_v58 }
 0x93f   : > { %6870 = vrcp.f32 %v2735_v25 }
 0x940   : > { %6872 = vrcp.f32 %v2742_v28 }
 0x948   : > { %v6869_v19 = vpop.eup %6868 }
 0x949   : > { %v6871_v43 = vpop.eup %6870  ;;  %v2746_v6 = vmul.f32 %v6869_v19, %v6867_v51 }
 0x94a   : > { %v2745_v44 = vmul.f32 %v6871_v43, %v8359_v39  ;;  %v6873_v4 = vpop.eup %6872  ;;  %v2821_v39 = vld [vmem:[%s9049_s17] sm:$0xf]  ;;  %s4991_s17 = sshll.u32 %s7815_s1, 4  ;;  %s8947_s17 = int_to_ptr.vmem [resolvable:$true] %s4991_s17 }
 0x94b   : > { %v8523_v33 = vrot.slane %v2821_v39, %v7973_v7  ;;  %v8526_v53 = vrot.slane %v2821_v39, %v7978_v11  ;;  %v8531_v30 = vrot.slane %v2821_v39, %v7986_v15  ;;  %v8535_v25 = vrot.slane %v2821_v39, %v7993_v34  ;;  %s7266_s13 = scalar_lea.vmem %s8947_s17, 512 }
 0x94c   : > { %v2747_v52 = vadd.f32 %v2746_v6, %v2745_v44  ;;  %p7267_p9 = scmp.ne.s32.totalorder %s8947_s17, %s7266_s13 }
 0x94e   : > { %6874 = vtanh.f32 %v2747_v52  ;;  %2751 = vst [vmem:[#allocation3 + $0x8] sm:$0xff] %v2747_v52  ;;  %p7268_p12 = pnand %p7267_p9, %p9056_p10 }
 0x950   : > { %p7269_p0 = pneg %p7268_p12 }
 0x958   : > { %v6875_v46 = vpop.eup %6874 }
 0x959   : > { %v2749_v20 = vmul.f32 %v6875_v46, %v6873_v4  ;;  %v3103_v4 = vld [vmem:[#allocation4 + $0x8] sm:$0xff] }
 0x95b   : > { %2750 = vst [vmem:[#allocation3] sm:$0xff] %v2749_v20  ;;  %2926 = vmatmul.mubr.f32.gmra.mrb[22].mxu0 %v2749_v20  ;;  %3015 = vmatmul.mubr.f32.gmra.mrb[22].mxu1 %v2749_v20 }
 0x95c   : > { %3172 = vmatprep.mubr.f32.mxu0 %v7380_v8  ;;  %3243 = vmatprep.mubr.f32.mxu1 %v7380_v8 }
 0x95f   : > { %3173 = vmatmul.mubr.f32.vlgmr.msra.gmra.mrb[16].mxu0 %v3101_v35  ;;  %3244 = vmatmul.mubr.f32.vlgmr.msra.gmra.mrb[16].mxu1 %v3101_v35 }
 0x960   : > { %5960 = vmatpush1.bf16.msra.mxu0 %v8384_v17  ;;  %5992 = vmatpush1.bf16.msra.mxu1 %v8387_v48 }
 0x961   : > { %5962 = vmatprep.subr.bf16.mxu0 %v8392_v13  ;;  %5994 = vmatprep.subr.bf16.mxu1 %v8394_v60 }
 0x962   : > { %3352 = vmatprep.mubr.f32.mxu0 %v7380_v8  ;;  %3423 = vmatprep.mubr.f32.mxu1 %v7380_v8 }
 0x964   : > { %5964 = vmatpush1.bf16.msra.mxu0 %v8396_v38  ;;  %5996 = vmatpush1.bf16.msra.mxu1 %v8399_v42 }
 0x965   : > { %5966 = vmatprep.subr.bf16.mxu0 %v8404_v63  ;;  %5998 = vmatprep.subr.bf16.mxu1 %v8406_v36 }
 0x968   : > { %5968 = vmatpush1.bf16.msra.mxu0 %v8408_v45  ;;  %6000 = vmatpush1.bf16.msra.mxu1 %v8411_v47 }
 0x969   : > { %5970 = vmatprep.subr.bf16.mxu0 %v8416_v10  ;;  %6002 = vmatprep.subr.bf16.mxu1 %v8418_v41 }
 0x96c   : > { %5972 = vmatpush1.bf16.msra.mxu0 %v8420_v55  ;;  %6004 = vmatpush1.bf16.msra.mxu1 %v8423_v26 }
 0x96d   : > { %5974 = vmatprep.subr.bf16.mxu0 %v8427_v50  ;;  %6006 = vmatprep.subr.bf16.mxu1 %v8429_v27 }
 0x970   : > { %5976 = vmatpush1.bf16.msra.mxu0 %v8432_v54  ;;  %6008 = vmatpush1.bf16.msra.mxu1 %v8436_v22 }
 0x971   : > { %5978 = vmatprep.subr.bf16.mxu0 %v8438_v12  ;;  %6010 = vmatprep.subr.bf16.mxu1 %v8440_v37 }
 0x974   : > { %5980 = vmatpush1.bf16.msra.mxu0 %v8443_v49  ;;  %6012 = vmatpush1.bf16.msra.mxu1 %v8447_v32 }
 0x975   : > { %5982 = vmatprep.subr.bf16.mxu0 %v8449_v56  ;;  %6014 = vmatprep.subr.bf16.mxu1 %v8452_v61 }
 0x978   : > { %5984 = vmatpush1.bf16.msra.mxu0 %v8455_v31  ;;  %6016 = vmatpush1.bf16.msra.mxu1 %v8459_v59 }
 0x979   : > { %5986 = vmatprep.subr.bf16.mxu0 %v8464_v21  ;;  %6018 = vmatprep.subr.bf16.mxu1 %v8466_v40 }
 0x97c   : > { %5988 = vmatpush1.bf16.msra.mxu0 %v8468_v3  ;;  %6020 = vmatpush1.bf16.msra.mxu1 %v8471_v16 }
 0x97d   : > { %6022 = vmatprep.subr.bf16.mxu0 %v8380_v23  ;;  %6054 = vmatprep.subr.bf16.mxu1 %v8382_v1 }
 0xa32   : > { %v3174_v0 = vpop.f32.mrb[16].mxu0  ;;  %v3245_v62 = vpop.f32.mrb[16].mxu1 }
 0xa33   : > { %v6501_v14 = vadd.f32 %v3174_v0, %v8523_v33  ;;  %v3176_v24 = vpop.f32.mrb[17].mxu0  ;;  %v3247_v2 = vpop.f32.mrb[17].mxu1  ;;  %v6509_v51 = vadd.f32 %v3245_v62, %v8535_v25 }
 0xa34   : > { %v6502_v57 = vadd.f32 %v3176_v24, %v8526_v53  ;;  %v6510_v9 = vadd.f32 %v3247_v2, %v8531_v30 }
 0xa35   : > { %v5211_v18 = vmul.f32 -1.442695, %v6501_v14 }
 0xa36   : > { %v5212_v29 = vmul.f32 -1.442695, %v6502_v57  ;;  %v5213_v58 = vmul.f32 -1.442695, %v6510_v9 }
 0xa37   : > { %6876 = vpow2.f32 %v5211_v18 }
 0xa38   : > { %6878 = vpow2.f32 %v5212_v29 }
 0xa39   : > { %6880 = vpow2.f32 %v5213_v58 }
 0xa3a   : > { %6882 = vtanh.f32 %v6509_v51 }
 0xa41   : > { %v6877_v19 = vpop.eup %6876 }
 0xa42   : > { %v6879_v43 = vpop.eup %6878  ;;  %v3257_v6 = vadd.f32 1.0, %v6877_v19 }
 0xa43   : > { %v3263_v28 = vadd.f32 1.0, %v6879_v43  ;;  %v6881_v44 = vpop.eup %6880 }
 0xa44   : > { %6884 = vrcp.f32 %v3257_v6  ;;  %v6883_v52 = vpop.eup %6882  ;;  %v3270_v0 = vadd.f32 1.0, %v6881_v44 }
 0xa45   : > { %6886 = vrcp.f32 %v3263_v28 }
 0xa46   : > { %6888 = vrcp.f32 %v3270_v0 }
 0xa4e   : > { %v6885_v46 = vpop.eup %6884 }
 0xa4f   : > { %v6887_v20 = vpop.eup %6886  ;;  %v3274_v35 = vmul.f32 %v6885_v46, %v6883_v52 }
 0xa50   : > { %v3273_v39 = vmul.f32 %v6887_v20, %v3103_v4  ;;  %v6889_v62 = vpop.eup %6888 }
 0xa52   : > { %v8538_v14 = vadd.f32 %v3274_v35, %v3273_v39 }
 0xa54   : > { %6890 = vtanh.f32 %v8538_v14 }
 0xa5e   : > { %v6891_v24 = vpop.eup %6890 }
 0xa5f   : > { %v8541_v2 = vmul.f32 %v6891_v24, %v6889_v62 }
 0xa61   : > { %3353 = vmatmul.mubr.f32.vlgmr.msra.gmra.mrb[18].mxu0 %v8541_v2  ;;  %3424 = vmatmul.mubr.f32.vlgmr.msra.gmra.mrb[18].mxu1 %v8541_v2 }
 0xa62   : > { %6024 = vmatpush1.bf16.msra.mxu0 %v8384_v17  ;;  %6056 = vmatpush1.bf16.msra.mxu1 %v8387_v48 }
 0xa63   : > { %6026 = vmatprep.subr.bf16.mxu0 %v8392_v13  ;;  %6058 = vmatprep.subr.bf16.mxu1 %v8394_v60 }
 0xa64   : > { %3533 = vmatprep.mubr.f32.mxu0 %v7380_v8  ;;  %3604 = vmatprep.mubr.f32.mxu1 %v7380_v8 }
 0xa66   : > { %6028 = vmatpush1.bf16.msra.mxu0 %v8396_v38  ;;  %6060 = vmatpush1.bf16.msra.mxu1 %v8399_v42 }
 0xa67   : > { %6030 = vmatprep.subr.bf16.mxu0 %v8404_v63  ;;  %6062 = vmatprep.subr.bf16.mxu1 %v8406_v36 }
 0xa6a   : > { %6032 = vmatpush1.bf16.msra.mxu0 %v8408_v45  ;;  %6064 = vmatpush1.bf16.msra.mxu1 %v8411_v47 }
 0xa6b   : > { %6034 = vmatprep.subr.bf16.mxu0 %v8416_v10  ;;  %6066 = vmatprep.subr.bf16.mxu1 %v8418_v41 }
 0xa6e   : > { %6036 = vmatpush1.bf16.msra.mxu0 %v8420_v55  ;;  %6068 = vmatpush1.bf16.msra.mxu1 %v8423_v26 }
 0xa6f   : > { %6038 = vmatprep.subr.bf16.mxu0 %v8427_v50  ;;  %6070 = vmatprep.subr.bf16.mxu1 %v8429_v27 }
 0xa72   : > { %6040 = vmatpush1.bf16.msra.mxu0 %v8432_v54  ;;  %6072 = vmatpush1.bf16.msra.mxu1 %v8436_v22 }
 0xa73   : > { %6042 = vmatprep.subr.bf16.mxu0 %v8438_v12  ;;  %6074 = vmatprep.subr.bf16.mxu1 %v8440_v37 }
 0xa76   : > { %6044 = vmatpush1.bf16.msra.mxu0 %v8443_v49  ;;  %6076 = vmatpush1.bf16.msra.mxu1 %v8447_v32 }
 0xa77   : > { %6046 = vmatprep.subr.bf16.mxu0 %v8449_v56  ;;  %6078 = vmatprep.subr.bf16.mxu1 %v8452_v61 }
 0xa7a   : > { %6048 = vmatpush1.bf16.msra.mxu0 %v8455_v31  ;;  %6080 = vmatpush1.bf16.msra.mxu1 %v8459_v59 }
 0xa7b   : > { %6050 = vmatprep.subr.bf16.mxu0 %v8464_v21  ;;  %6082 = vmatprep.subr.bf16.mxu1 %v8466_v40 }
 0xa7e   : > { %6052 = vmatpush1.bf16.msra.mxu0 %v8468_v3  ;;  %6084 = vmatpush1.bf16.msra.mxu1 %v8471_v16 }
 0xa7f   : > { %6086 = vmatprep.subr.bf16.mxu0 %v8380_v23  ;;  %6118 = vmatprep.subr.bf16.mxu1 %v8382_v1 }
 0xb34   : > { %v3354_v57 = vpop.f32.mrb[18].mxu0  ;;  %v3425_v18 = vpop.f32.mrb[18].mxu1 }
 0xb35   : > { %v6503_v29 = vadd.f32 %v3354_v57, %v8523_v33  ;;  %v3356_v9 = vpop.f32.mrb[19].mxu0  ;;  %v3427_v58 = vpop.f32.mrb[19].mxu1  ;;  %v6511_v44 = vadd.f32 %v3425_v18, %v8535_v25 }
 0xb36   : > { %v6504_v51 = vadd.f32 %v3356_v9, %v8526_v53  ;;  %v6512_v6 = vadd.f32 %v3427_v58, %v8531_v30  ;;  %v3830_v58 = vld [vmem:[#allocation22 + $0x10] sm:$0xff] }
 0xb37   : > { %v5214_v19 = vmul.f32 -1.442695, %v6503_v29 }
 0xb38   : > { %v5215_v43 = vmul.f32 -1.442695, %v6504_v51  ;;  %v5216_v28 = vmul.f32 -1.442695, %v6512_v6  ;;  %v3834_v51 = vld [vmem:[#allocation22 + $0x30] sm:$0xff]  ;;  %v3839_v6 = vld [vmem:[#allocation22 + $0x58] sm:$0xff] }
 0xb39   : > { %6892 = vpow2.f32 %v5214_v19  ;;  %v3837_v19 = vld [vmem:[#allocation22 + $0x48] sm:$0xff] }
 0xb3a   : > { %6894 = vpow2.f32 %v5215_v43  ;;  %v3841_v43 = vld [vmem:[#allocation22 + $0x68] sm:$0xff] }
 0xb3b   : > { %6896 = vpow2.f32 %v5216_v28  ;;  %v3843_v28 = vld [vmem:[#allocation22 + $0x78] sm:$0xff] }
 0xb3c   : > { %6898 = vtanh.f32 %v6511_v44 }
 0xb43   : > { %v6893_v23 = vpop.eup %6892 }
 0xb44   : > { %v6895_v52 = vpop.eup %6894  ;;  %v3437_v1 = vadd.f32 1.0, %v6893_v23 }
 0xb45   : > { %v3443_v4 = vadd.f32 1.0, %v6895_v52  ;;  %v6897_v46 = vpop.eup %6896 }
 0xb46   : > { %6900 = vrcp.f32 %v3437_v1  ;;  %v6899_v20 = vpop.eup %6898  ;;  %v3450_v62 = vadd.f32 1.0, %v6897_v46  ;;  %v6183_v1 = vpack.c.bf16 %v3834_v51, %v3830_v58  ;;  %v3840_v46 = vld [vmem:[#allocation22 + $0x60] sm:$0xff]  ;;  %v3862_v58 = vld [vmem:[#allocation22 + $0x110] sm:$0xff] }
 0xb47   : > { %6902 = vrcp.f32 %v3443_v4  ;;  %v3836_v4 = vld [vmem:[#allocation22 + $0x40] sm:$0xff]  ;;  %v3866_v51 = vld [vmem:[#allocation22 + $0x130] sm:$0xff] }
 0xb48   : > { %6904 = vrcp.f32 %v3450_v62  ;;  %v3842_v62 = vld [vmem:[#allocation22 + $0x70] sm:$0xff] }
 0xb50   : > { %v6901_v35 = vpop.eup %6900 }
 0xb51   : > { %v6903_v0 = vpop.eup %6902  ;;  %v3454_v39 = vmul.f32 %v6901_v35, %v6899_v20  ;;  %v6153_v35 = vpack.c.bf16 %v3841_v43, %v3837_v19  ;;  %v3869_v19 = vld [vmem:[#allocation22 + $0x148] sm:$0xff] }
 0xb52   : > { %v3453_v24 = vmul.f32 %v6903_v0, %v8538_v14  ;;  %v6905_v18 = vpop.eup %6904  ;;  %v3832_v14 = vld [vmem:[#allocation22 + $0x20] sm:$0xff]  ;;  %v6185_v0 = vpack.c.bf16 %v3843_v28, %v3839_v6  ;;  %v3873_v43 = vld [vmem:[#allocation22 + $0x168] sm:$0xff]  ;;  %v3871_v6 = vld [vmem:[#allocation22 + $0x158] sm:$0xff] }
 0xb53   : > { %v3875_v28 = vld [vmem:[#allocation22 + $0x178] sm:$0xff] }
 0xb54   : > { %v8584_v57 = vadd.f32 %v3454_v39, %v3453_v24  ;;  %v3838_v39 = vld [vmem:[#allocation22 + $0x50] sm:$0xff]  ;;  %v3845_v24 = vld [vmem:[#allocation22 + $0x88] sm:$0xff] }
 0xb56   : > { %6906 = vtanh.f32 %v8584_v57 }
 0xb60   : > { %v6907_v29 = vpop.eup %6906 }
 0xb61   : > { %v8587_v9 = vmul.f32 %v6907_v29, %v6905_v18  ;;  %v3847_v18 = vld [vmem:[#allocation22 + $0x98] sm:$0xff] }
 0xb62   : > { %v3851_v29 = vld [vmem:[#allocation22 + $0xb8] sm:$0xff] }
 0xb63   : > { %3534 = vmatmul.mubr.f32.vlgmr.msra.gmra.mrb[20].mxu0 %v8587_v9  ;;  %3605 = vmatmul.mubr.f32.vlgmr.msra.gmra.mrb[20].mxu1 %v8587_v9 }
 0xb64   : > { %6088 = vmatpush1.bf16.msra.mxu0 %v8384_v17  ;;  %6120 = vmatpush1.bf16.msra.mxu1 %v8387_v48  ;;  %v3829_v17 = vld [vmem:[#allocation22 + $0x8] sm:$0xff] }
 0xb65   : > { %6090 = vmatprep.subr.bf16.mxu0 %v8392_v13  ;;  %6122 = vmatprep.subr.bf16.mxu1 %v8394_v60  ;;  %v3833_v48 = vld [vmem:[#allocation22 + $0x28] sm:$0xff]  ;;  %v3831_v13 = vld [vmem:[#allocation22 + $0x18] sm:$0xff] }
 0xb66   : > { %3714 = vmatprep.mubr.f32.mxu0 %v7380_v8  ;;  %3785 = vmatprep.mubr.f32.mxu1 %v7380_v8  ;;  %v6149_v60 = vpack.c.bf16 %v3833_v48, %v3829_v17  ;;  %v6155_v17 = vpack.c.bf16 %v3840_v46, %v3836_v4  ;;  %v6187_v48 = vpack.c.bf16 %v3842_v62, %v3838_v39  ;;  %v3877_v39 = vld [vmem:[#allocation22 + $0x188] sm:$0xff] }
 0xb67   : > { %v6169_v4 = vpack.c.bf16 %v3873_v43, %v3869_v19  ;;  %v6201_v46 = vpack.c.bf16 %v3875_v28, %v3871_v6  ;;  %v3881_v62 = vld [vmem:[#allocation22 + $0x1a8] sm:$0xff]  ;;  %v4123_v43 = vld [vmem:[#allocation24 + $0x78] sm:$0xff]  ;;  %v4116_v6 = vld [vmem:[#allocation24 + $0x40] sm:$0xff] }
 0xb68   : > { %6092 = vmatpush1.bf16.msra.mxu0 %v8396_v38  ;;  %6124 = vmatpush1.bf16.msra.mxu1 %v8399_v42  ;;  %v3835_v38 = vld [vmem:[#allocation22 + $0x38] sm:$0xff]  ;;  %v4120_v28 = vld [vmem:[#allocation24 + $0x60] sm:$0xff] }
 0xb69   : > { %6094 = vmatprep.subr.bf16.mxu0 %v8404_v63  ;;  %6126 = vmatprep.subr.bf16.mxu1 %v8406_v36  ;;  %v6181_v42 = vpack.c.bf16 %v3835_v38, %v3831_v13  ;;  %v3844_v13 = vld [vmem:[#allocation22 + $0x80] sm:$0xff] }
 0xb6c   : > { %6096 = vmatpush1.bf16.msra.mxu0 %v8408_v45  ;;  %6128 = vmatpush1.bf16.msra.mxu1 %v8411_v47 }
 0xb6d   : > { %6098 = vmatprep.subr.bf16.mxu0 %v8416_v10  ;;  %6130 = vmatprep.subr.bf16.mxu1 %v8418_v41 }
 0xb70   : > { %6100 = vmatpush1.bf16.msra.mxu0 %v8420_v55  ;;  %6132 = vmatpush1.bf16.msra.mxu1 %v8423_v26 }
 0xb71   : > { %6102 = vmatprep.subr.bf16.mxu0 %v8427_v50  ;;  %6134 = vmatprep.subr.bf16.mxu1 %v8429_v27 }
 0xb74   : > { %6104 = vmatpush1.bf16.msra.mxu0 %v8432_v54  ;;  %6136 = vmatpush1.bf16.msra.mxu1 %v8436_v22 }
 0xb75   : > { %6106 = vmatprep.subr.bf16.mxu0 %v8438_v12  ;;  %6138 = vmatprep.subr.bf16.mxu1 %v8440_v37 }
 0xb78   : > { %6108 = vmatpush1.bf16.msra.mxu0 %v8443_v49  ;;  %6140 = vmatpush1.bf16.msra.mxu1 %v8447_v32 }
 0xb79   : > { %6110 = vmatprep.subr.bf16.mxu0 %v8449_v56  ;;  %6142 = vmatprep.subr.bf16.mxu1 %v8452_v61 }
 0xb7c   : > { %6112 = vmatpush1.bf16.msra.mxu0 %v8455_v31  ;;  %6144 = vmatpush1.bf16.msra.mxu1 %v8459_v59 }
 0xb7d   : > { %6114 = vmatprep.subr.bf16.mxu0 %v8464_v21  ;;  %6146 = vmatprep.subr.bf16.mxu1 %v8466_v40 }
 0xb80   : > { %6116 = vmatpush1.bf16.msra.mxu0 %v8468_v3  ;;  %6148 = vmatpush1.bf16.msra.mxu1 %v8471_v16  ;;  %v3828_v16 = vld [vmem:[#allocation22] sm:$0xff] }
 0xb81   : > { %6150 = vmatprep.subr.bf16.mxu0 %v6149_v60  ;;  %6182 = vmatprep.subr.bf16.mxu1 %v6181_v42  ;;  %v6151_v52 = vpack.c.bf16 %v3832_v14, %v3828_v16  ;;  %v3848_v60 = vld [vmem:[#allocation22 + $0xa0] sm:$0xff]  ;;  %v6189_v42 = vpack.c.bf16 %v3851_v29, %v3847_v18 }
 0xc36   : > { %v3535_v63 = vpop.f32.mrb[20].mxu0  ;;  %v3606_v36 = vpop.f32.mrb[20].mxu1 }
 0xc37   : > { %v6505_v45 = vadd.f32 %v3535_v63, %v8523_v33  ;;  %v3537_v47 = vpop.f32.mrb[21].mxu0  ;;  %v3608_v10 = vpop.f32.mrb[21].mxu1  ;;  %v6513_v54 = vadd.f32 %v3606_v36, %v8535_v25  ;;  %v3846_v63 = vld [vmem:[#allocation22 + $0x90] sm:$0xff] }
 0xc38   : > { %v6506_v41 = vadd.f32 %v3537_v47, %v8526_v53  ;;  %v6514_v50 = vadd.f32 %v3608_v10, %v8531_v30  ;;  %v3850_v36 = vld [vmem:[#allocation22 + $0xb0] sm:$0xff]  ;;  %v3857_v47 = vld [vmem:[#allocation22 + $0xe8] sm:$0xff]  ;;  %v3855_v10 = vld [vmem:[#allocation22 + $0xd8] sm:$0xff] }
 0xc39   : > { %v5217_v55 = vmul.f32 -1.442695, %v6505_v45  ;;  %v3853_v45 = vld [vmem:[#allocation22 + $0xc8] sm:$0xff] }
 0xc3a   : > { %v5218_v26 = vmul.f32 -1.442695, %v6506_v41  ;;  %v5219_v27 = vmul.f32 -1.442695, %v6514_v50  ;;  %v3859_v41 = vld [vmem:[#allocation22 + $0xf8] sm:$0xff]  ;;  %v3852_v50 = vld [vmem:[#allocation22 + $0xc0] sm:$0xff] }
 0xc3b   : > { %6908 = vpow2.f32 %v5217_v55  ;;  %v6159_v55 = vpack.c.bf16 %v3848_v60, %v3844_v13  ;;  %v6173_v13 = vpack.c.bf16 %v3881_v62, %v3877_v39  ;;  %v4131_v62 = vld [vmem:[#allocation24 + $0xb8] sm:$0xff] }
 0xc3c   : > { %6910 = vpow2.f32 %v5218_v26  ;;  %v6191_v26 = vpack.c.bf16 %v3850_v36, %v3846_v63  ;;  %v3885_v63 = vld [vmem:[#allocation22 + $0x1c8] sm:$0xff] }
 0xc3d   : > { %6912 = vpow2.f32 %v5219_v27  ;;  %v3856_v27 = vld [vmem:[#allocation22 + $0xe0] sm:$0xff]  ;;  %v3889_v36 = vld [vmem:[#allocation22 + $0x1e8] sm:$0xff] }
 0xc3e   : > { %6914 = vtanh.f32 %v6513_v54  ;;  %v6161_v54 = vpack.c.bf16 %v3857_v47, %v3853_v45  ;;  %v3887_v45 = vld [vmem:[#allocation22 + $0x1d8] sm:$0xff] }
 0xc3f   : > { %v3891_v47 = vld [vmem:[#allocation22 + $0x1f8] sm:$0xff] }
 0xc45   : > { %v6909_v22 = vpop.eup %6908 }
 0xc46   : > { %v6911_v12 = vpop.eup %6910  ;;  %v3618_v37 = vadd.f32 1.0, %v6909_v22  ;;  %v6193_v22 = vpack.c.bf16 %v3859_v41, %v3855_v10 }
 0xc47   : > { %v3624_v49 = vadd.f32 1.0, %v6911_v12  ;;  %v6913_v32 = vpop.eup %6912  ;;  %v3854_v12 = vld [vmem:[#allocation22 + $0xd0] sm:$0xff] }
 0xc48   : > { %6916 = vrcp.f32 %v3618_v37  ;;  %v6915_v56 = vpop.eup %6914  ;;  %v3631_v21 = vadd.f32 1.0, %v6913_v32  ;;  %v3858_v37 = vld [vmem:[#allocation22 + $0xf0] sm:$0xff]  ;;  %v3865_v32 = vld [vmem:[#allocation22 + $0x128] sm:$0xff] }
 0xc49   : > { %6918 = vrcp.f32 %v3624_v49  ;;  %v3861_v49 = vld [vmem:[#allocation22 + $0x108] sm:$0xff] }
 0xc4a   : > { %6920 = vrcp.f32 %v3631_v21  ;;  %v3860_v21 = vld [vmem:[#allocation22 + $0x100] sm:$0xff]  ;;  %v6165_v16 = vpack.c.bf16 %v3865_v32, %v3861_v49  ;;  %v4113_v49 = vld [vmem:[#allocation24 + $0x28] sm:$0xff]  ;;  %v4111_v32 = vld [vmem:[#allocation24 + $0x18] sm:$0xff] }
 0xc52   : > { %v6917_v61 = vpop.eup %6916 }
 0xc53   : > { %v6919_v31 = vpop.eup %6918  ;;  %v3635_v59 = vmul.f32 %v6917_v61, %v6915_v56  ;;  %v3863_v56 = vld [vmem:[#allocation22 + $0x118] sm:$0xff] }
 0xc54   : > { %v3634_v40 = vmul.f32 %v6919_v31, %v8584_v57  ;;  %v6921_v44 = vpop.eup %6920  ;;  %v3849_v57 = vld [vmem:[#allocation22 + $0xa8] sm:$0xff]  ;;  %v3867_v61 = vld [vmem:[#allocation22 + $0x138] sm:$0xff]  ;;  %v6163_v31 = vpack.c.bf16 %v3856_v27, %v3852_v50  ;;  %v6209_v50 = vpack.c.bf16 %v3891_v47, %v3887_v45  ;;  %v3888_v27 = vld [vmem:[#allocation22 + $0x1e0] sm:$0xff] }
 0xc55   : > { %v6157_v38 = vpack.c.bf16 %v3849_v57, %v3845_v24  ;;  %v6197_v14 = vpack.c.bf16 %v3867_v61, %v3863_v56  ;;  %v3879_v24 = vld [vmem:[#allocation22 + $0x198] sm:$0xff]  ;;  %v4132_v45 = vld [vmem:[#allocation24 + $0xc0] sm:$0xff] }
 0xc56   : > { %v8628_v3 = vadd.f32 %v3635_v59, %v3634_v40  ;;  %v6195_v59 = vpack.c.bf16 %v3858_v37, %v3854_v12  ;;  %v3864_v40 = vld [vmem:[#allocation22 + $0x120] sm:$0xff]  ;;  %v3883_v57 = vld [vmem:[#allocation22 + $0x1b8] sm:$0xff] }
 0xc57   : > { %v6205_v60 = vpack.c.bf16 %v3883_v57, %v3879_v24  ;;  %v4115_v61 = vld [vmem:[#allocation24 + $0x38] sm:$0xff]  ;;  %v4124_v24 = vld [vmem:[#allocation24 + $0x80] sm:$0xff] }
 0xc58   : > { %6922 = vtanh.f32 %v8628_v3  ;;  %v4128_v57 = vld [vmem:[#allocation24 + $0xa0] sm:$0xff] }
 0xc59   : > { %v4136_v47 = vld [vmem:[#allocation24 + $0xe0] sm:$0xff] }
 0xc62   : > { %v6923_v23 = vpop.eup %6922 }
 0xc63   : > { %v8631_v20 = vmul.f32 %v6923_v23, %v6921_v44  ;;  %v6167_v44 = vpack.c.bf16 %v3864_v40, %v3860_v21  ;;  %v6199_v23 = vpack.c.bf16 %v3866_v51, %v3862_v58  ;;  %v4110_v40 = vld [vmem:[#allocation24 + $0x10] sm:$0xff]  ;;  %v4121_v58 = vld [vmem:[#allocation24 + $0x68] sm:$0xff]  ;;  %v4119_v51 = vld [vmem:[#allocation24 + $0x58] sm:$0xff] }
 0xc65   : > { %3715 = vmatmul.mubr.f32.vlgmr.msra.gmra.mrb[22].mxu0 %v8631_v20  ;;  %3786 = vmatmul.mubr.f32.vlgmr.msra.gmra.mrb[22].mxu1 %v8631_v20 }
 0xc66   : > { %6152 = vmatpush1.bf16.msra.mxu0 %v6151_v52  ;;  %6184 = vmatpush1.bf16.msra.mxu1 %v6183_v1  ;;  %v3868_v52 = vld [vmem:[#allocation22 + $0x140] sm:$0xff] }
 0xc67   : > { %6154 = vmatprep.subr.bf16.mxu0 %v6153_v35  ;;  %6186 = vmatprep.subr.bf16.mxu1 %v6185_v0  ;;  %v3872_v1 = vld [vmem:[#allocation22 + $0x160] sm:$0xff]  ;;  %v3870_v35 = vld [vmem:[#allocation22 + $0x150] sm:$0xff] }
 0xc68   : > { %3978 = vmatprep.mubr.f32.mxu0 %v7380_v8  ;;  %4067 = vmatprep.mubr.f32.mxu1 %v7380_v8  ;;  %v3874_v0 = vld [vmem:[#allocation22 + $0x170] sm:$0xff]  ;;  %v6171_v18 = vpack.c.bf16 %v3872_v1, %v3868_v52 }
 0xc69   : > { %v6203_v29 = vpack.c.bf16 %v3874_v0, %v3870_v35  ;;  %v4118_v52 = vld [vmem:[#allocation24 + $0x50] sm:$0xff]  ;;  %v4129_v35 = vld [vmem:[#allocation24 + $0xa8] sm:$0xff]  ;;  %v4127_v0 = vld [vmem:[#allocation24 + $0x98] sm:$0xff] }
 0xc6a   : > { %6156 = vmatpush1.bf16.msra.mxu0 %v6155_v17  ;;  %6188 = vmatpush1.bf16.msra.mxu1 %v6187_v48  ;;  %v3876_v17 = vld [vmem:[#allocation22 + $0x180] sm:$0xff]  ;;  %v4122_v1 = vld [vmem:[#allocation24 + $0x70] sm:$0xff] }
 0xc6b   : > { %6158 = vmatprep.subr.bf16.mxu0 %v6157_v38  ;;  %6190 = vmatprep.subr.bf16.mxu1 %v6189_v42  ;;  %v3880_v48 = vld [vmem:[#allocation22 + $0x1a0] sm:$0xff]  ;;  %v3878_v38 = vld [vmem:[#allocation22 + $0x190] sm:$0xff] }
 0xc6c   : > { %v3882_v42 = vld [vmem:[#allocation22 + $0x1b0] sm:$0xff]  ;;  %v6175_v10 = vpack.c.bf16 %v3880_v48, %v3876_v17 }
 0xc6d   : > { %v6207_v41 = vpack.c.bf16 %v3882_v42, %v3878_v38  ;;  %v4126_v17 = vld [vmem:[#allocation24 + $0x90] sm:$0xff]  ;;  %v4137_v38 = vld [vmem:[#allocation24 + $0xe8] sm:$0xff]  ;;  %v4135_v42 = vld [vmem:[#allocation24 + $0xd8] sm:$0xff] }
 0xc6e   : > { %6160 = vmatpush1.bf16.msra.mxu0 %v6159_v55  ;;  %6192 = vmatpush1.bf16.msra.mxu1 %v6191_v26  ;;  %v3884_v55 = vld [vmem:[#allocation22 + $0x1c0] sm:$0xff]  ;;  %v6177_v26 = vpack.c.bf16 %v3889_v36, %v3885_v63  ;;  %v4130_v48 = vld [vmem:[#allocation24 + $0xb0] sm:$0xff]  ;;  %v4139_v36 = vld [vmem:[#allocation24 + $0xf8] sm:$0xff] }
 0xc6f   : > { %6162 = vmatprep.subr.bf16.mxu0 %v6161_v54  ;;  %6194 = vmatprep.subr.bf16.mxu1 %v6193_v22  ;;  %v3886_v54 = vld [vmem:[#allocation22 + $0x1d0] sm:$0xff]  ;;  %v6179_v12 = vpack.c.bf16 %v3888_v27, %v3884_v55 }
 0xc70   : > { %v3890_v22 = vld [vmem:[#allocation22 + $0x1f0] sm:$0xff] }
 0xc71   : > { %v6211_v37 = vpack.c.bf16 %v3890_v22, %v3886_v54  ;;  %v4134_v55 = vld [vmem:[#allocation24 + $0xd0] sm:$0xff]  ;;  %v4145_v54 = vld [vmem:[#allocation24 + $0x128] sm:$0xff]  ;;  %v4143_v22 = vld [vmem:[#allocation24 + $0x118] sm:$0xff] }
 0xc72   : > { %6164 = vmatpush1.bf16.msra.mxu0 %v6163_v31  ;;  %6196 = vmatpush1.bf16.msra.mxu1 %v6195_v59  ;;  %v4108_v31 = vld [vmem:[#allocation24] sm:$0xff]  ;;  %v8651_v59 = vpack.c.bf16 %v4115_v61, %v4111_v32  ;;  %v4142_v61 = vld [vmem:[#allocation24 + $0x110] sm:$0xff] }
 0xc73   : > { %6166 = vmatprep.subr.bf16.mxu0 %v6165_v16  ;;  %6198 = vmatprep.subr.bf16.mxu1 %v6197_v14  ;;  %v4114_v16 = vld [vmem:[#allocation24 + $0x30] sm:$0xff]  ;;  %v4117_v14 = vld [vmem:[#allocation24 + $0x48] sm:$0xff]  ;;  %v4144_v32 = vld [vmem:[#allocation24 + $0x120] sm:$0xff] }
 0xc74   : > { %v8661_v19 = vpack.c.bf16 %v4121_v58, %v4117_v14 }
 0xc76   : > { %6168 = vmatpush1.bf16.msra.mxu0 %v6167_v44  ;;  %6200 = vmatpush1.bf16.msra.mxu1 %v6199_v23  ;;  %v8663_v44 = vpack.c.bf16 %v4123_v43, %v4119_v51  ;;  %v8665_v23 = vpack.c.bf16 %v4120_v28, %v4116_v6  ;;  %v4151_v51 = vld [vmem:[#allocation24 + $0x158] sm:$0xff]  ;;  %v4148_v6 = vld [vmem:[#allocation24 + $0x140] sm:$0xff] }
 0xc77   : > { %6170 = vmatprep.subr.bf16.mxu0 %v6169_v4  ;;  %6202 = vmatprep.subr.bf16.mxu1 %v6201_v46  ;;  %v8668_v4 = vpack.c.bf16 %v4122_v1, %v4118_v52  ;;  %v4125_v46 = vld [vmem:[#allocation24 + $0x88] sm:$0xff]  ;;  %v4155_v43 = vld [vmem:[#allocation24 + $0x178] sm:$0xff]  ;;  %v4152_v52 = vld [vmem:[#allocation24 + $0x160] sm:$0xff] }
 0xc78   : > { %v8673_v39 = vpack.c.bf16 %v4129_v35, %v4125_v46  ;;  %v8709_v28 = vpack.c.bf16 %v4155_v43, %v4151_v51  ;;  %v4150_v1 = vld [vmem:[#allocation24 + $0x150] sm:$0xff]  ;;  %v8712_v35 = vpack.c.bf16 %v4152_v52, %v4148_v6 }
 0xc79   : > { %v4154_v46 = vld [vmem:[#allocation24 + $0x170] sm:$0xff] }
 0xc7a   : > { %6172 = vmatpush1.bf16.msra.mxu0 %v6171_v18  ;;  %6204 = vmatpush1.bf16.msra.mxu1 %v6203_v29  ;;  %v8675_v18 = vpack.c.bf16 %v4131_v62, %v4127_v0  ;;  %v8677_v29 = vpack.c.bf16 %v4128_v57, %v4124_v24  ;;  %v4157_v0 = vld [vmem:[#allocation24 + $0x188] sm:$0xff]  ;;  %v4159_v24 = vld [vmem:[#allocation24 + $0x198] sm:$0xff]  ;;  %v8716_v57 = vpack.c.bf16 %v4154_v46, %v4150_v1 }
 0xc7b   : > { %6174 = vmatprep.subr.bf16.mxu0 %v6173_v13  ;;  %6206 = vmatprep.subr.bf16.mxu1 %v6205_v60  ;;  %v8680_v13 = vpack.c.bf16 %v4130_v48, %v4126_v17  ;;  %v4133_v60 = vld [vmem:[#allocation24 + $0xc8] sm:$0xff]  ;;  %v4163_v48 = vld [vmem:[#allocation24 + $0x1b8] sm:$0xff] }
 0xc7c   : > { %v8685_v63 = vpack.c.bf16 %v4137_v38, %v4133_v60  ;;  %v4161_v62 = vld [vmem:[#allocation24 + $0x1a8] sm:$0xff]  ;;  %v4156_v60 = vld [vmem:[#allocation24 + $0x180] sm:$0xff] }
 0xc7d   : > { %v8718_v17 = vpack.c.bf16 %v4161_v62, %v4157_v0  ;;  %v4160_v38 = vld [vmem:[#allocation24 + $0x1a0] sm:$0xff] }
 0xc7e   : > { %6176 = vmatpush1.bf16.msra.mxu0 %v6175_v10  ;;  %6208 = vmatpush1.bf16.msra.mxu1 %v6207_v41  ;;  %v8687_v10 = vpack.c.bf16 %v4139_v36, %v4135_v42  ;;  %v8689_v41 = vpack.c.bf16 %v4136_v47, %v4132_v45  ;;  %v8721_v42 = vpack.c.bf16 %v4163_v48, %v4159_v24  ;;  %v4158_v36 = vld [vmem:[#allocation24 + $0x190] sm:$0xff] }
 0xc7f   : > { %6178 = vmatprep.subr.bf16.mxu0 %v6177_v26  ;;  %6210 = vmatprep.subr.bf16.mxu1 %v6209_v50  ;;  %v4138_v26 = vld [vmem:[#allocation24 + $0xf0] sm:$0xff]  ;;  %v4141_v50 = vld [vmem:[#allocation24 + $0x108] sm:$0xff]  ;;  %v8724_v47 = vpack.c.bf16 %v4160_v38, %v4156_v60 }
 0xc80   : > { %v8692_v27 = vpack.c.bf16 %v4138_v26, %v4134_v55  ;;  %v4162_v45 = vld [vmem:[#allocation24 + $0x1b0] sm:$0xff]  ;;  %v4165_v26 = vld [vmem:[#allocation24 + $0x1c8] sm:$0xff] }
 0xc81   : > { %v8728_v55 = vpack.c.bf16 %v4162_v45, %v4158_v36 }
 0xc82   : > { %6180 = vmatpush1.bf16.msra.mxu0 %v6179_v12  ;;  %6212 = vmatpush1.bf16.msra.mxu1 %v6211_v37  ;;  %v4147_v12 = vld [vmem:[#allocation24 + $0x138] sm:$0xff]  ;;  %v8696_v37 = vpack.c.bf16 %v4145_v54, %v4141_v50  ;;  %v4169_v50 = vld [vmem:[#allocation24 + $0x1e8] sm:$0xff] }
 0xc83   : > { %6246 = vmatprep.subr.bf16.mxu1 %v8651_v59  ;;  %v4167_v54 = vld [vmem:[#allocation24 + $0x1d8] sm:$0xff] }
 0xc85   : > { %3979 = vmatmul.mubr.f32.vlgmr.msra.gmra.mrb[24].mxu0 %v8541_v2  ;;  %4068 = vmatmul.mubr.f32.vlgmr.msra.gmra.mrb[24].mxu1 %v8541_v2  ;;  %v4109_v2 = vld [vmem:[#allocation24 + $0x8] sm:$0xff] }
 0xc86   : > { %3984 = vmatprep.mubr.f32.mxu0 %v7380_v8  ;;  %4073 = vmatprep.mubr.f32.mxu1 %v7380_v8  ;;  %v8649_v56 = vpack.c.bf16 %v4113_v49, %v4109_v2  ;;  %v8698_v2 = vpack.c.bf16 %v4147_v12, %v4143_v22  ;;  %v4140_v49 = vld [vmem:[#allocation24 + $0x100] sm:$0xff]  ;;  %v8733_v22 = vpack.c.bf16 %v4169_v50, %v4165_v26  ;;  %v4171_v12 = vld [vmem:[#allocation24 + $0x1f8] sm:$0xff] }
 0xc88   : > { %6214 = vmatprep.subr.bf16.mxu0 %v8649_v56 }
 0xc89   : > { %3985 = vmatmul.mubr.f32.gmra.mrb[26].mxu0 %v8587_v9  ;;  %4074 = vmatmul.mubr.f32.gmra.mrb[26].mxu1 %v8587_v9  ;;  %v4112_v9 = vld [vmem:[#allocation24 + $0x20] sm:$0xff] }
 0xc8a   : > { %3990 = vmatprep.mubr.f32.mxu0 %v7380_v8  ;;  %4079 = vmatprep.mubr.f32.mxu1 %v7380_v8  ;;  %v8653_v21 = vpack.c.bf16 %v4112_v9, %v4108_v31  ;;  %v8701_v31 = vpack.c.bf16 %v4144_v32, %v4140_v49  ;;  %v4146_v9 = vld [vmem:[#allocation24 + $0x130] sm:$0xff]  ;;  %v4164_v49 = vld [vmem:[#allocation24 + $0x1c0] sm:$0xff] }
 0xc8b   : > { %v8705_v14 = vpack.c.bf16 %v4146_v9, %v4142_v61  ;;  %v4168_v32 = vld [vmem:[#allocation24 + $0x1e0] sm:$0xff]  ;;  %v8735_v61 = vpack.c.bf16 %v4171_v12, %v4167_v54 }
 0xc8c   : > { %6216 = vmatpush1.bf16.msra.mxu0 %v8653_v21  ;;  %v8737_v9 = vpack.c.bf16 %v4168_v32, %v4164_v49 }
 0xc8d   : > { %3991 = vmatmul.mubr.f32.gmra.mrb[28].mxu0 %v8631_v20  ;;  %4080 = vmatmul.mubr.f32.gmra.mrb[28].mxu1 %v8631_v20  ;;  %v8656_v20 = vpack.c.bf16 %v4114_v16, %v4110_v40  ;;  %v4149_v40 = vld [vmem:[#allocation24 + $0x148] sm:$0xff] }
 0xc8e   : > { %3996 = vmatprep.mubr.f32.mxu0 %v7380_v8  ;;  %4085 = vmatprep.mubr.f32.mxu1 %v7380_v8  ;;  %v4153_v16 = vld [vmem:[#allocation24 + $0x168] sm:$0xff] }
 0xc8f   : > { %6248 = vmatpush1.bf16.msra.mxu1 %v8656_v20  ;;  %6218 = vmatprep.subr.bf16.mxu0 %v8661_v19  ;;  %v8707_v58 = vpack.c.bf16 %v4153_v16, %v4149_v40  ;;  %v4166_v40 = vld [vmem:[#allocation24 + $0x1d0] sm:$0xff] }
 0xc90   : > { %6250 = vmatprep.subr.bf16.mxu1 %v8663_v44  ;;  %6220 = vmatpush1.bf16.msra.mxu0 %v8665_v23  ;;  %v4170_v16 = vld [vmem:[#allocation24 + $0x1f0] sm:$0xff] }
 0xc91   : > { %6222 = vmatprep.subr.bf16.mxu0 %v8673_v39  ;;  %v8740_v51 = vpack.c.bf16 %v4170_v16, %v4166_v40 }
 0xc93   : > { %6252 = vmatpush1.bf16.msra.mxu1 %v8668_v4 }
 0xc94   : > { %6254 = vmatprep.subr.bf16.mxu1 %v8675_v18  ;;  %6224 = vmatpush1.bf16.msra.mxu0 %v8677_v29 }
 0xc95   : > { %6226 = vmatprep.subr.bf16.mxu0 %v8685_v63 }
 0xc97   : > { %6256 = vmatpush1.bf16.msra.mxu1 %v8680_v13 }
 0xc98   : > { %6258 = vmatprep.subr.bf16.mxu1 %v8687_v10  ;;  %6228 = vmatpush1.bf16.msra.mxu0 %v8689_v41 }
 0xc99   : > { %6230 = vmatprep.subr.bf16.mxu0 %v8696_v37 }
 0xc9b   : > { %6260 = vmatpush1.bf16.msra.mxu1 %v8692_v27 }
 0xc9c   : > { %6262 = vmatprep.subr.bf16.mxu1 %v8698_v2  ;;  %6232 = vmatpush1.bf16.msra.mxu0 %v8701_v31 }
 0xc9d   : > { %6234 = vmatprep.subr.bf16.mxu0 %v8707_v58 }
 0xc9f   : > { %6264 = vmatpush1.bf16.msra.mxu1 %v8705_v14 }
 0xca0   : > { %6266 = vmatprep.subr.bf16.mxu1 %v8709_v28  ;;  %6236 = vmatpush1.bf16.msra.mxu0 %v8712_v35 }
 0xca1   : > { %6238 = vmatprep.subr.bf16.mxu0 %v8718_v17 }
 0xca3   : > { %6268 = vmatpush1.bf16.msra.mxu1 %v8716_v57 }
 0xca4   : > { %6270 = vmatprep.subr.bf16.mxu1 %v8721_v42  ;;  %6240 = vmatpush1.bf16.msra.mxu0 %v8724_v47 }
 0xca5   : > { %6242 = vmatprep.subr.bf16.mxu0 %v8733_v22 }
 0xca7   : > { %6272 = vmatpush1.bf16.msra.mxu1 %v8728_v55 }
 0xca8   : > { %6274 = vmatprep.subr.bf16.mxu1 %v8735_v61  ;;  %6244 = vmatpush1.bf16.msra.mxu0 %v8737_v9 }
 0xca9   : > { %6278 = vmatprep.subr.bf16.mxu0 %v8649_v56 }
 0xcab   : > { %6276 = vmatpush1.bf16.msra.mxu1 %v8740_v51 }
 0xcac   : > { %6310 = vmatprep.subr.bf16.mxu1 %v8651_v59 }
 0xd38   : > { %v3716_v43 = vpop.f32.mrb[22].mxu0  ;;  %v3787_v6 = vpop.f32.mrb[22].mxu1 }
 0xd39   : > { %v6507_v52 = vadd.f32 %v3716_v43, %v8523_v33  ;;  %v3718_v1 = vpop.f32.mrb[23].mxu0  ;;  %v3789_v46 = vpop.f32.mrb[23].mxu1  ;;  %v6515_v38 = vadd.f32 %v3787_v6, %v8535_v25  ;;  %v4172_v6 = vld [vmem:[#allocation5] sm:$0xff] }
 0xd3a   : > { %v6508_v0 = vadd.f32 %v3718_v1, %v8526_v53  ;;  %v6516_v48 = vadd.f32 %v3789_v46, %v8531_v30 }
 0xd3b   : > { %v5220_v62 = vmul.f32 -1.442695, %v6507_v52 }
 0xd3c   : > { %v5221_v24 = vmul.f32 -1.442695, %v6508_v0  ;;  %v5222_v60 = vmul.f32 -1.442695, %v6516_v48 }
 0xd3d   : > { %6924 = vpow2.f32 %v5220_v62 }
 0xd3e   : > { %6926 = vpow2.f32 %v5221_v24 }
 0xd3f   : > { %6928 = vpow2.f32 %v5222_v60 }
 0xd40   : > { %6930 = vtanh.f32 %v6515_v38 }
 0xd47   : > { %v6925_v36 = vpop.eup %6924 }
 0xd48   : > { %v6927_v45 = vpop.eup %6926  ;;  %v3799_v26 = vadd.f32 1.0, %v6925_v36 }
 0xd49   : > { %v3805_v50 = vadd.f32 1.0, %v6927_v45  ;;  %v6929_v33 = vpop.eup %6928 }
 0xd4a   : > { %6932 = vrcp.f32 %v3799_v26  ;;  %v6931_v54 = vpop.eup %6930  ;;  %v3812_v32 = vadd.f32 1.0, %v6929_v33 }
 0xd4b   : > { %6934 = vrcp.f32 %v3805_v50 }
 0xd4c   : > { %6936 = vrcp.f32 %v3812_v32  ;;  %v4174_v32 = vld [vmem:[#allocation5 + $0x8] sm:$0xff] }
 0xd54   : > { %v6933_v53 = vpop.eup %6932 }
 0xd55   : > { %v6935_v12 = vpop.eup %6934  ;;  %v3816_v49 = vmul.f32 %v6933_v53, %v6931_v54 }
 0xd56   : > { %v3815_v40 = vmul.f32 %v6935_v12, %v8628_v3  ;;  %v6937_v25 = vpop.eup %6936  ;;  %v3892_v3 = vld [vmem:[%s9050_s21] sm:$0xf]  ;;  %s9054_s21 = sld [smem:[#allocation41_spill]] }
 0xd57   : > { %v8792_v52 = vrot.slane %v3892_v3, %v7973_v7  ;;  %v8795_v1 = vrot.slane %v3892_v3, %v7978_v11  ;;  %v8800_v45 = vrot.slane %v3892_v3, %v7986_v15  ;;  %v8804_v11 = vrot.slane %v3892_v3, %v7993_v34 }
 0xd58   : > { %v3817_v30 = vadd.f32 %v3816_v49, %v3815_v40 }
 0xd5a   : > { %6938 = vtanh.f32 %v3817_v30  ;;  %3821 = vst [vmem:[#allocation4 + $0x8] sm:$0xff] %v3817_v30 }
 0xd5c   : > { %s9055_s25 = smov %s9054_s21  ;;  %s8945_s9 = scalar_lea.hbm %s9054_s21, %s5244_s16 }
 0xd64   : > { %v6939_v16 = vpop.eup %6938 }
 0xd65   : > { %v3819_v43 = vmul.f32 %v6939_v16, %v6937_v25 }
 0xd67   : > { %3820 = vst [vmem:[#allocation4] sm:$0xff] %v3819_v43  ;;  %3997 = vmatmul.mubr.f32.gmra.mrb[30].mxu0 %v3819_v43  ;;  %4086 = vmatmul.mubr.f32.gmra.mrb[30].mxu1 %v3819_v43 }
 0xd68   : > { %4243 = vmatprep.mubr.f32.mxu0 %v7380_v8  ;;  %4314 = vmatprep.mubr.f32.mxu1 %v7380_v8 }
 0xd6b   : > { %4244 = vmatmul.mubr.f32.vlgmr.msra.gmra.mrb[24].mxu0 %v4172_v6  ;;  %4315 = vmatmul.mubr.f32.vlgmr.msra.gmra.mrb[24].mxu1 %v4172_v6  ;;  %v4894_v6 = vand.u32 127, %v674_v5 }
 0xd6c   : > { %6280 = vmatpush1.bf16.msra.mxu0 %v8653_v21  ;;  %6312 = vmatpush1.bf16.msra.mxu1 %v8656_v20 }
 0xd6d   : > { %6282 = vmatprep.subr.bf16.mxu0 %v8661_v19  ;;  %6314 = vmatprep.subr.bf16.mxu1 %v8663_v44  ;;  %vm4895_vm1 = vcmp.lt.s32.totalorder %v4894_v6, 16 }
 0xd6e   : > { %4422 = vmatprep.mubr.f32.mxu0 %v7380_v8  ;;  %4493 = vmatprep.mubr.f32.mxu1 %v7380_v8 }
 0xd70   : > { %6284 = vmatpush1.bf16.msra.mxu0 %v8665_v23  ;;  %6316 = vmatpush1.bf16.msra.mxu1 %v8668_v4 }
 0xd71   : > { %6286 = vmatprep.subr.bf16.mxu0 %v8673_v39  ;;  %6318 = vmatprep.subr.bf16.mxu1 %v8675_v18 }
 0xd74   : > { %6288 = vmatpush1.bf16.msra.mxu0 %v8677_v29  ;;  %6320 = vmatpush1.bf16.msra.mxu1 %v8680_v13 }
 0xd75   : > { %6290 = vmatprep.subr.bf16.mxu0 %v8685_v63  ;;  %6322 = vmatprep.subr.bf16.mxu1 %v8687_v10 }
 0xd78   : > { %6292 = vmatpush1.bf16.msra.mxu0 %v8689_v41  ;;  %6324 = vmatpush1.bf16.msra.mxu1 %v8692_v27 }
 0xd79   : > { %6294 = vmatprep.subr.bf16.mxu0 %v8696_v37  ;;  %6326 = vmatprep.subr.bf16.mxu1 %v8698_v2 }
 0xd7c   : > { %6296 = vmatpush1.bf16.msra.mxu0 %v8701_v31  ;;  %6328 = vmatpush1.bf16.msra.mxu1 %v8705_v14 }
 0xd7d   : > { %6298 = vmatprep.subr.bf16.mxu0 %v8707_v58  ;;  %6330 = vmatprep.subr.bf16.mxu1 %v8709_v28 }
 0xd80   : > { %6300 = vmatpush1.bf16.msra.mxu0 %v8712_v35  ;;  %6332 = vmatpush1.bf16.msra.mxu1 %v8716_v57 }
 0xd81   : > { %6302 = vmatprep.subr.bf16.mxu0 %v8718_v17  ;;  %6334 = vmatprep.subr.bf16.mxu1 %v8721_v42 }
 0xd84   : > { %6304 = vmatpush1.bf16.msra.mxu0 %v8724_v47  ;;  %6336 = vmatpush1.bf16.msra.mxu1 %v8728_v55 }
 0xd85   : > { %6306 = vmatprep.subr.bf16.mxu0 %v8733_v22  ;;  %6338 = vmatprep.subr.bf16.mxu1 %v8735_v61 }
 0xd88   : > { %6308 = vmatpush1.bf16.msra.mxu0 %v8737_v9  ;;  %6340 = vmatpush1.bf16.msra.mxu1 %v8740_v51 }
 0xd89   : > { %6342 = vmatprep.subr.bf16.mxu0 %v8649_v56  ;;  %6374 = vmatprep.subr.bf16.mxu1 %v8651_v59 }
 0xe3e   : > { %v4245_v46 = vpop.f32.mrb[24].mxu0  ;;  %v4316_v0 = vpop.f32.mrb[24].mxu1 }
 0xe3f   : > { %v6517_v62 = vadd.f32 %v4245_v46, %v8792_v52  ;;  %v4247_v24 = vpop.f32.mrb[25].mxu0  ;;  %v4318_v48 = vpop.f32.mrb[25].mxu1  ;;  %v6525_v50 = vadd.f32 %v4316_v0, %v8804_v11  ;;  %v8812_v0 = vsel %vm4895_vm1, 1.0, %v7380_v8 }
 0xe40   : > { %v6518_v60 = vadd.f32 %v4247_v24, %v8795_v1  ;;  %v6526_v7 = vadd.f32 %v4318_v48, %v8800_v45 }
 0xe41   : > { %v5223_v38 = vmul.f32 -1.442695, %v6517_v62 }
 0xe42   : > { %v5224_v36 = vmul.f32 -1.442695, %v6518_v60  ;;  %v5225_v26 = vmul.f32 -1.442695, %v6526_v7 }
 0xe43   : > { %6940 = vpow2.f32 %v5223_v38 }
 0xe44   : > { %6942 = vpow2.f32 %v5224_v36 }
 0xe45   : > { %6944 = vpow2.f32 %v5225_v26 }
 0xe46   : > { %6946 = vtanh.f32 %v6525_v50 }
 0xe4d   : > { %v6941_v33 = vpop.eup %6940 }
 0xe4e   : > { %v6943_v54 = vpop.eup %6942  ;;  %v4328_v53 = vadd.f32 1.0, %v6941_v33 }
 0xe4f   : > { %v4334_v12 = vadd.f32 1.0, %v6943_v54  ;;  %v6945_v15 = vpop.eup %6944 }
 0xe50   : > { %6948 = vrcp.f32 %v4328_v53  ;;  %v6947_v49 = vpop.eup %6946  ;;  %v4341_v16 = vadd.f32 1.0, %v6945_v15 }
 0xe51   : > { %6950 = vrcp.f32 %v4334_v12 }
 0xe52   : > { %6952 = vrcp.f32 %v4341_v16 }
 0xe5a   : > { %v6949_v40 = vpop.eup %6948 }
 0xe5b   : > { %v6951_v30 = vpop.eup %6950  ;;  %v4345_v25 = vmul.f32 %v6949_v40, %v6947_v49 }
 0xe5c   : > { %v4344_v34 = vmul.f32 %v6951_v30, %v4174_v32  ;;  %v6953_v3 = vpop.eup %6952 }
 0xe5e   : > { %v8807_v43 = vadd.f32 %v4345_v25, %v4344_v34 }
 0xe60   : > { %6954 = vtanh.f32 %v8807_v43 }
 0xe6a   : > { %v6955_v46 = vpop.eup %6954 }
 0xe6b   : > { %v8814_v62 = vmul.f32 %v6955_v46, %v6953_v3 }
 0xe6d   : > { %v4898_v24 = vmul.f32 %v8812_v0, %v8814_v62  ;;  %4423 = vmatmul.mubr.f32.vlgmr.msra.gmra.mrb[26].mxu0 %v8814_v62  ;;  %4494 = vmatmul.mubr.f32.vlgmr.msra.gmra.mrb[26].mxu1 %v8814_v62 }
 0xe6e   : > { %6344 = vmatpush1.bf16.msra.mxu0 %v8653_v21  ;;  %6376 = vmatpush1.bf16.msra.mxu1 %v8656_v20 }
 0xe6f   : > { %4902 = vadd.xlane.f32.xlu0 %v4898_v24  ;;  %6346 = vmatprep.subr.bf16.mxu0 %v8661_v19 }
 0xe70   : > { %6378 = vmatprep.subr.bf16.mxu1 %v8663_v44  ;;  %4601 = vmatprep.mubr.f32.mxu0 %v7380_v8 }
 0xe71   : > { %4672 = vmatprep.mubr.f32.mxu1 %v7380_v8 }
 0xe72   : > { %6348 = vmatpush1.bf16.msra.mxu0 %v8665_v23  ;;  %6380 = vmatpush1.bf16.msra.mxu1 %v8668_v4 }
 0xe73   : > { %6350 = vmatprep.subr.bf16.mxu0 %v8673_v39  ;;  %6382 = vmatprep.subr.bf16.mxu1 %v8675_v18 }
 0xe76   : > { %6352 = vmatpush1.bf16.msra.mxu0 %v8677_v29  ;;  %6384 = vmatpush1.bf16.msra.mxu1 %v8680_v13 }
 0xe77   : > { %6354 = vmatprep.subr.bf16.mxu0 %v8685_v63  ;;  %6386 = vmatprep.subr.bf16.mxu1 %v8687_v10 }
 0xe7a   : > { %6356 = vmatpush1.bf16.msra.mxu0 %v8689_v41  ;;  %6388 = vmatpush1.bf16.msra.mxu1 %v8692_v27 }
 0xe7b   : > { %6358 = vmatprep.subr.bf16.mxu0 %v8696_v37  ;;  %6390 = vmatprep.subr.bf16.mxu1 %v8698_v2 }
 0xe7e   : > { %6360 = vmatpush1.bf16.msra.mxu0 %v8701_v31  ;;  %6392 = vmatpush1.bf16.msra.mxu1 %v8705_v14 }
 0xe7f   : > { %6362 = vmatprep.subr.bf16.mxu0 %v8707_v58  ;;  %6394 = vmatprep.subr.bf16.mxu1 %v8709_v28 }
 0xe82   : > { %6364 = vmatpush1.bf16.msra.mxu0 %v8712_v35  ;;  %6396 = vmatpush1.bf16.msra.mxu1 %v8716_v57 }
 0xe83   : > { %6366 = vmatprep.subr.bf16.mxu0 %v8718_v17  ;;  %6398 = vmatprep.subr.bf16.mxu1 %v8721_v42 }
 0xe86   : > { %6368 = vmatpush1.bf16.msra.mxu0 %v8724_v47  ;;  %6400 = vmatpush1.bf16.msra.mxu1 %v8728_v55 }
 0xe87   : > { %6370 = vmatprep.subr.bf16.mxu0 %v8733_v22  ;;  %6402 = vmatprep.subr.bf16.mxu1 %v8735_v61 }
 0xe8a   : > { %6372 = vmatpush1.bf16.msra.mxu0 %v8737_v9  ;;  %6404 = vmatpush1.bf16.msra.mxu1 %v8740_v51 }
 0xe8b   : > { %6406 = vmatprep.subr.bf16.mxu0 %v8649_v56  ;;  %6438 = vmatprep.subr.bf16.mxu1 %v8651_v59 }
 0xefc   : > { %v4903_v3 = vpop.xlane.xlu0 %4902 }
 0xefd   : > { %v4910_v46 = vmul.f32 0.0625, %v4903_v3 }
 0xf40   : > { %v4424_v5 = vpop.f32.mrb[26].mxu0  ;;  %v4495_v48 = vpop.f32.mrb[26].mxu1 }
 0xf41   : > { %v6519_v60 = vadd.f32 %v4424_v5, %v8792_v52  ;;  %v4426_v38 = vpop.f32.mrb[27].mxu0  ;;  %v4497_v36 = vpop.f32.mrb[27].mxu1  ;;  %v6527_v53 = vadd.f32 %v4495_v48, %v8804_v11  ;;  %v4914_v5 = vsub.f32 %v8814_v62, %v4910_v46 }
 0xf42   : > { %v6520_v7 = vadd.f32 %v4426_v38, %v8795_v1  ;;  %v6528_v33 = vadd.f32 %v4497_v36, %v8800_v45 }
 0xf43   : > { %v5226_v26 = vmul.f32 -1.442695, %v6519_v60  ;;  %v4918_v36 = vmul.f32 %v8812_v0, %v4914_v5 }
 0xf44   : > { %v5227_v50 = vmul.f32 -1.442695, %v6520_v7  ;;  %v5228_v54 = vmul.f32 -1.442695, %v6528_v33 }
 0xf45   : > { %6956 = vpow2.f32 %v5226_v26 }
 0xf46   : > { %6958 = vpow2.f32 %v5227_v50 }
 0xf47   : > { %6960 = vpow2.f32 %v5228_v54 }
 0xf48   : > { %6962 = vtanh.f32 %v6527_v53 }
 0xf4f   : > { %v6957_v56 = vpop.eup %6956 }
 0xf50   : > { %v6959_v12 = vpop.eup %6958  ;;  %v4507_v59 = vadd.f32 1.0, %v6957_v56 }
 0xf51   : > { %v4513_v15 = vadd.f32 1.0, %v6959_v12  ;;  %v6961_v49 = vpop.eup %6960 }
 0xf52   : > { %6964 = vrcp.f32 %v4507_v59  ;;  %v6963_v32 = vpop.eup %6962  ;;  %v4520_v16 = vadd.f32 1.0, %v6961_v49 }
 0xf53   : > { %6966 = vrcp.f32 %v4513_v15 }
 0xf54   : > { %6968 = vrcp.f32 %v4520_v16 }
 0xf5c   : > { %v6965_v40 = vpop.eup %6964 }
 0xf5d   : > { %v6967_v30 = vpop.eup %6966  ;;  %v4524_v25 = vmul.f32 %v6965_v40, %v6963_v32 }
 0xf5e   : > { %v4523_v34 = vmul.f32 %v6967_v30, %v8807_v43  ;;  %v6969_v24 = vpop.eup %6968  ;;  %v4922_v43 = vmul.f32 %v4918_v36, %v4918_v36 }
 0xf60   : > { %v8859_v6 = vadd.f32 %v4524_v25, %v4523_v34 }
 0xf62   : > { %6970 = vtanh.f32 %v8859_v6 }
 0xf6c   : > { %v6971_v48 = vpop.eup %6970 }
 0xf6d   : > { %v8863_v60 = vmul.f32 %v6971_v48, %v6969_v24 }
 0xf6f   : > { %v4899_v38 = vmul.f32 %v8812_v0, %v8863_v60  ;;  %4602 = vmatmul.mubr.f32.vlgmr.msra.gmra.mrb[28].mxu0 %v8863_v60  ;;  %4673 = vmatmul.mubr.f32.vlgmr.msra.gmra.mrb[28].mxu1 %v8863_v60 }
 0xf70   : > { %6408 = vmatpush1.bf16.msra.mxu0 %v8653_v21  ;;  %6440 = vmatpush1.bf16.msra.mxu1 %v8656_v20 }
 0xf71   : > { %4904 = vadd.xlane.f32.xlu0 %v4899_v38  ;;  %6410 = vmatprep.subr.bf16.mxu0 %v8661_v19 }
 0xf72   : > { %6442 = vmatprep.subr.bf16.mxu1 %v8663_v44  ;;  %4780 = vmatprep.mubr.f32.mxu0 %v7380_v8 }
 0xf73   : > { %4851 = vmatprep.mubr.f32.mxu1 %v7380_v8 }
 0xf74   : > { %6412 = vmatpush1.bf16.msra.mxu0 %v8665_v23  ;;  %6444 = vmatpush1.bf16.msra.mxu1 %v8668_v4  ;;  %v8907_v23 = vld [vmem:[%s9051_s15] ss:$0 sm:$0xff]  ;;  %s4977_s15 = scalar_lea.sflag [#allocation12], %s7789_s26 }
 0xf75   : > { %4926 = vadd.xlane.f32.xlu0 %v4922_v43  ;;  %6414 = vmatprep.subr.bf16.mxu0 %v8673_v39  ;;  %v8912_v39 = vld [vmem:[%s9052_s14] ss:$0 sm:$0xff]  ;;  %s7270_s14 = sshll.u32 %s7381_s24, 4  ;;  %s7271_s14 = int_to_ptr.vmem [resolvable:$false] %s7270_s14 }
 0xf76   : > { %6446 = vmatprep.subr.bf16.mxu1 %v8675_v18  ;;  %s7272_s28 = scalar_lea.vmem %s7271_s14, 1024  ;;  %p7273_p7 = scmp.lt.s32.totalorder %s8947_s17, %s7271_s14 }
 0xf77   : > { %p7274_p5 = scmp.lt.s32.totalorder %s7272_s28, %s7266_s13 }
 0xf78   : > { %6416 = vmatpush1.bf16.msra.mxu0 %v8677_v29  ;;  %6448 = vmatpush1.bf16.msra.mxu1 %v8680_v13 }
 0xf79   : > { %6418 = vmatprep.subr.bf16.mxu0 %v8685_v63  ;;  %6450 = vmatprep.subr.bf16.mxu1 %v8687_v10  ;;  %p7275_p8 = por %p7274_p5, %p7273_p7 }
 0xf7b   : > { %p7276_p3 = pnand %p7275_p8, %p7269_p0 }
 0xf7c   : > { %6420 = vmatpush1.bf16.msra.mxu0 %v8689_v41  ;;  %6452 = vmatpush1.bf16.msra.mxu1 %v8692_v27 }
 0xf7d   : > { %6422 = vmatprep.subr.bf16.mxu0 %v8696_v37  ;;  %6454 = vmatprep.subr.bf16.mxu1 %v8698_v2 }
 0xf80   : > { %6424 = vmatpush1.bf16.msra.mxu0 %v8701_v31  ;;  %6456 = vmatpush1.bf16.msra.mxu1 %v8705_v14 }
 0xf81   : > { %6426 = vmatprep.subr.bf16.mxu0 %v8707_v58  ;;  %6458 = vmatprep.subr.bf16.mxu1 %v8709_v28 }
 0xf84   : > { %6428 = vmatpush1.bf16.msra.mxu0 %v8712_v35  ;;  %6460 = vmatpush1.bf16.msra.mxu1 %v8716_v57 }
 0xf85   : > { %6430 = vmatprep.subr.bf16.mxu0 %v8718_v17  ;;  %6462 = vmatprep.subr.bf16.mxu1 %v8721_v42 }
 0xf88   : > { %6432 = vmatpush1.bf16.msra.mxu0 %v8724_v47  ;;  %6464 = vmatpush1.bf16.msra.mxu1 %v8728_v55 }
 0xf89   : > { %6434 = vmatprep.subr.bf16.mxu0 %v8733_v22  ;;  %6466 = vmatprep.subr.bf16.mxu1 %v8735_v61 }
 0xf8c   : > { %6436 = vmatpush1.bf16.msra.mxu0 %v8737_v9  ;;  %6468 = vmatpush1.bf16.msra.mxu1 %v8740_v51 }
 0xffe   : > { %v8902_v8 = vpop.xlane.xlu0 %4904 }
0x1002   : > { %v4927_v21 = vpop.xlane.xlu0 %4926 }
0x1003   : > { %v4934_v20 = vmul.f32 0.0625, %v4927_v21 }
0x1005   : > { %v4938_v19 = vadd.f32 1e-05, %v4934_v20 }
0x1007   : > { %6972 = vrsqrt.f32 %v4938_v19 }
0x1011   : > { %v6973_v44 = vpop.eup %6972 }
0x1012   : > { %v4946_v4 = vmul.f32 %v6973_v44, %v4918_v36 }
0x1014   : > { %v4957_v18 = vmul.f32 %v8907_v23, %v4946_v4 }
0x1016   : > { %v4968_v29 = vadd.f32 %v8912_v39, %v4957_v18 }
0x1018   : > { %4972 = vst [vmem:[%s7815_s1] sm:$0xff] %v4968_v29 }
0x1042   : > { %v4603_v13 = vpop.f32.mrb[28].mxu0  ;;  %v4674_v63 = vpop.f32.mrb[28].mxu1 }
0x1043   : > { %v6521_v10 = vadd.f32 %v4603_v13, %v8792_v52  ;;  %v4605_v41 = vpop.f32.mrb[29].mxu0  ;;  %v4676_v27 = vpop.f32.mrb[29].mxu1  ;;  %v6529_v28 = vadd.f32 %v4674_v63, %v8804_v11 }
0x1044   : > { %v6522_v37 = vadd.f32 %v4605_v41, %v8795_v1  ;;  %v6530_v14 = vadd.f32 %v4676_v27, %v8800_v45 }
0x1045   : > { %v5229_v2 = vmul.f32 -1.442695, %v6521_v10 }
0x1046   : > { %v5230_v31 = vmul.f32 -1.442695, %v6522_v37  ;;  %v5231_v58 = vmul.f32 -1.442695, %v6530_v14 }
0x1047   : > { %6974 = vpow2.f32 %v5229_v2 }
0x1048   : > { %6976 = vpow2.f32 %v5230_v31 }
0x1049   : > { %6978 = vpow2.f32 %v5231_v58 }
0x104a   : > { %6980 = vtanh.f32 %v6529_v28 }
0x1051   : > { %v6975_v35 = vpop.eup %6974 }
0x1052   : > { %v6977_v57 = vpop.eup %6976  ;;  %v4686_v17 = vadd.f32 1.0, %v6975_v35 }
0x1053   : > { %v4692_v42 = vadd.f32 1.0, %v6977_v57  ;;  %v6979_v47 = vpop.eup %6978 }
0x1054   : > { %6982 = vrcp.f32 %v4686_v17  ;;  %v6981_v55 = vpop.eup %6980  ;;  %v4699_v51 = vadd.f32 1.0, %v6979_v47 }
0x1055   : > { %6984 = vrcp.f32 %v4692_v42 }
0x1056   : > { %6986 = vrcp.f32 %v4699_v51 }
0x105e   : > { %v6983_v22 = vpop.eup %6982 }
0x105f   : > { %v6985_v61 = vpop.eup %6984  ;;  %v4703_v9 = vmul.f32 %v6983_v22, %v6981_v55 }
0x1060   : > { %v4702_v62 = vmul.f32 %v6985_v61, %v8859_v6  ;;  %v6987_v26 = vpop.eup %6986 }
0x1062   : > { %v4704_v7 = vadd.f32 %v4703_v9, %v4702_v62 }
0x1064   : > { %6988 = vtanh.f32 %v4704_v7 }
0x106e   : > { %v6989_v50 = vpop.eup %6988 }
0x106f   : > { %v4706_v33 = vmul.f32 %v6989_v50, %v6987_v26 }
0x1071   : > { %v4900_v54 = vmul.f32 %v8812_v0, %v4706_v33  ;;  %4781 = vmatmul.mubr.f32.vlgmr.msra.gmra.mrb[30].mxu0 %v4706_v33  ;;  %4852 = vmatmul.mubr.f32.vlgmr.msra.gmra.mrb[30].mxu1 %v4706_v33 }
0x1073   : > { %4906 = vadd.xlane.f32.xlu1 %v4900_v54 }
0x1100   : > { %v4907_v53 = vpop.xlane.xlu1 %4906 }
0x1101   : > { %v4912_v56 = vmul.f32 0.0625, %v4907_v53 }
0x1103   : > { %v4916_v12 = vsub.f32 %v4706_v33, %v4912_v56 }
0x1105   : > { %v4920_v59 = vmul.f32 %v8812_v0, %v4916_v12 }
0x1107   : > { %v4924_v15 = vmul.f32 %v4920_v59, %v4920_v59 }
0x1109   : > { %4930 = vadd.xlane.f32.xlu0 %v4924_v15 }
0x1144   : > { %v4782_v49 = vpop.f32.mrb[30].mxu0  ;;  %v4853_v32 = vpop.f32.mrb[30].mxu1 }
0x1145   : > { %v6523_v40 = vadd.f32 %v4782_v49, %v8792_v52  ;;  %v4784_v30 = vpop.f32.mrb[31].mxu0  ;;  %v4855_v25 = vpop.f32.mrb[31].mxu1  ;;  %v6531_v24 = vadd.f32 %v4853_v32, %v8804_v11 }
0x1146   : > { %v6524_v16 = vadd.f32 %v4784_v30, %v8795_v1  ;;  %v6532_v3 = vadd.f32 %v4855_v25, %v8800_v45  ;;  %v4911_v45 = vmul.f32 0.0625, %v8902_v8 }
0x1147   : > { %v5232_v34 = vmul.f32 -1.442695, %v6523_v40 }
0x1148   : > { %v5233_v6 = vmul.f32 -1.442695, %v6524_v16  ;;  %v5234_v46 = vmul.f32 -1.442695, %v6532_v3  ;;  %v4915_v18 = vsub.f32 %v8863_v60, %v4911_v45 }
0x1149   : > { %6990 = vpow2.f32 %v5232_v34 }
0x114a   : > { %6992 = vpow2.f32 %v5233_v6  ;;  %v4919_v10 = vmul.f32 %v8812_v0, %v4915_v18 }
0x114b   : > { %6994 = vpow2.f32 %v5234_v46 }
0x114c   : > { %6996 = vtanh.f32 %v6531_v24  ;;  %v4923_v41 = vmul.f32 %v4919_v10, %v4919_v10 }
0x1153   : > { %v6991_v5 = vpop.eup %6990 }
0x1154   : > { %v6993_v48 = vpop.eup %6992  ;;  %v4865_v38 = vadd.f32 1.0, %v6991_v5 }
0x1155   : > { %v4871_v36 = vadd.f32 1.0, %v6993_v48  ;;  %v6995_v52 = vpop.eup %6994 }
0x1156   : > { %6998 = vrcp.f32 %v4865_v38  ;;  %v6997_v43 = vpop.eup %6996  ;;  %v4878_v19 = vadd.f32 1.0, %v6995_v52 }
0x1157   : > { %7000 = vrcp.f32 %v4871_v36 }
0x1158   : > { %7002 = vrcp.f32 %v4878_v19 }
0x1160   : > { %v6999_v1 = vpop.eup %6998 }
0x1161   : > { %v7001_v21 = vpop.eup %7000  ;;  %v4882_v20 = vmul.f32 %v6999_v1, %v6997_v43 }
0x1162   : > { %v4881_v44 = vmul.f32 %v7001_v21, %v4704_v7  ;;  %v7003_v11 = vpop.eup %7002 }
0x1164   : > { %v4883_v4 = vadd.f32 %v4882_v20, %v4881_v44 }
0x1166   : > { %4887 = vst [vmem:[#allocation5 + $0x8] sm:$0xff] %v4883_v4  ;;  %7004 = vtanh.f32 %v4883_v4 }
0x1170   : > { %v7005_v29 = vpop.eup %7004 }
0x1171   : > { %v4885_v13 = vmul.f32 %v7005_v29, %v7003_v11 }
0x1173   : > { %v4901_v63 = vmul.f32 %v8812_v0, %v4885_v13  ;;  %4886 = vst [vmem:[#allocation5] sm:$0xff] %v4885_v13 }
0x1175   : > { %4908 = vadd.xlane.f32.xlu1 %v4901_v63 }
0x1179   : > { %4928 = vadd.xlane.f32.xlu1 %v4923_v41 }
0x1196   : > { %v4931_v27 = vpop.xlane.xlu0 %4930 }
0x1197   : > { %v4936_v37 = vmul.f32 0.0625, %v4931_v27 }
0x1199   : > { %v4940_v2 = vadd.f32 1e-05, %v4936_v37 }
0x119b   : > { %7006 = vrsqrt.f32 %v4940_v2 }
0x11a5   : > { %v7007_v31 = vpop.eup %7006 }
0x11a6   : > { %v4948_v8 = vmul.f32 %v7007_v31, %v4920_v59 }
0x11a8   : > { %v4959_v14 = vmul.f32 %v8907_v23, %v4948_v8 }
0x11aa   : > { %v4970_v60 = vadd.f32 %v8912_v39, %v4959_v14 }
0x11ac   : > { %4974 = vst [vmem:[%s7815_s1 + $0x10] sm:$0xff] %v4970_v60 }
0x1202   : > { %v4909_v58 = vpop.xlane.xlu1 %4908 }
0x1203   : > { %v4913_v28 = vmul.f32 0.0625, %v4909_v58 }
0x1205   : > { %v4917_v35 = vsub.f32 %v4885_v13, %v4913_v28 }
0x1206   : > { %v4929_v57 = vpop.xlane.xlu1 %4928 }
0x1207   : > { %v4935_v17 = vmul.f32 0.0625, %v4929_v57  ;;  %v4921_v42 = vmul.f32 %v8812_v0, %v4917_v35 }
0x1209   : > { %v4939_v47 = vadd.f32 1e-05, %v4935_v17  ;;  %v4925_v55 = vmul.f32 %v4921_v42, %v4921_v42 }
0x120b   : > { %7008 = vrsqrt.f32 %v4939_v47  ;;  %4932 = vadd.xlane.f32.xlu1 %v4925_v55 }
0x1215   : > { %v7009_v22 = vpop.eup %7008 }
0x1216   : > { %v4947_v61 = vmul.f32 %v7009_v22, %v4919_v10 }
0x1218   : > { %v4958_v9 = vmul.f32 %v8907_v23, %v4947_v61 }
0x121a   : > { %v4969_v51 = vadd.f32 %v8912_v39, %v4958_v9 }
0x121c   : > { %4973 = vst [vmem:[%s7815_s1 + $0x8] sm:$0xff] %v4969_v51 }
0x1298   : > { %v4933_v62 = vpop.xlane.xlu1 %4932 }
0x1299   : > { %v4937_v7 = vmul.f32 0.0625, %v4933_v62 }
0x129b   : > { %v4941_v26 = vadd.f32 1e-05, %v4937_v7 }
0x129d   : > { %7010 = vrsqrt.f32 %v4941_v26 }
0x12a7   : > { %v7011_v0 = vpop.eup %7010 }
0x12a8   : > { %v4949_v50 = vmul.f32 %v7011_v0, %v4921_v42 }
0x12aa   : > { %v4960_v33 = vmul.f32 %v8907_v23, %v4949_v50 }
0x12ac   : > { %v4971_v54 = vadd.f32 %v8912_v39, %v4960_v33 }
0x12ae   : > { %4975 = vst [vmem:[%s7815_s1 + $0x18] sm:$0xff] %v4971_v54 }
0x12af   : > { %7279 = shalt.err (!%p7276_p3)
}
0x12b0   : > { %s7280_s1 = scalar_lea.hbm %s8945_s9, 512  ;;  %s7284_s12 = scalar_lea.hbm %s9055_s25, 1024 }
0x12b1   : > { %p7281_p11 = scmp.ne.s32.totalorder %s8945_s9, %s7280_s1  ;;  %p7285_p1 = scmp.lt.u32.totalorder %s8945_s9, %s9055_s25 }
0x12b2   : > { %p7286_p4 = scmp.lt.u32.totalorder %s7284_s12, %s7280_s1  ;;  %p7288_p9 = scmp.lt.u32.totalorder %s7280_s1, %s8945_s9 }
0x12b3   : > { %p7282_p6 = pnand %p7281_p11, %p9056_p10 }
0x12b4   : > { %p7287_p2 = por %p7286_p4, %p7285_p1 }
0x12b5   : > { %p7283_p13 = pneg %p7282_p6 }
0x12b6   : > { %p7289_p12 = por %p7288_p9, %p7287_p2 }
0x12b8   : > { %p7290_p0 = pnand %p7289_p12, %p7283_p13 }
0x12ba   : > { %7293 = shalt.err (!%p7290_p0)
}
0x12bb   : > { %s7382_s13 = smov 128   ;;  %s7383_s14 = smov 8  }
0x12bc   : > { %6631 = dma.vmem_to_hbm [thread:$0]  (%p9056_p10), %s8947_s17, 512, %s8945_s9, %s4977_s15, %s7382_s13, %s7382_s13, %s7383_s14  }
0x12bd PF: > { %s5006_s28 = sand.u32 1, %s7344_s18   ;;  %p9057_p7 = scmp.ne.s32.totalorder %s9041_s30, 0 }
0x12be   : > { %p9058_p5 = scmp.ge.s32.totalorder %s7364_s23, 2  ;;  %s5007_s1 = scalar_lea.sflag [#allocation12], %s5006_s28 }
0x12c0   : > { %p6663_p8 = pnand %p9058_p5, %p9057_p7 }
0x12c2   : > { %7339 = dma.done.wait (!%p6663_p8), %s5007_s1, 512  }
0x12c3   : > { %7341 = vsyncadd (!%p6663_p8), %s5007_s1, 4294966784  ;;  %s35_s23 = sadd.s32 1, %s7364_s23   ;;  %s9059_s18 = smov %s7348_s19 }
0x12c4   : > { %p32_p3 = scmp.ge.s32.totalorder %s35_s23, 4   ;;  %s9060_s19 = smov %s7352_s20 }
0x12c5   : > { %s9061_s20 = smov %s7736_s27  ;;  %s9062_s21 = smov %s7360_s22 }
0x12c6   : > { %s9063_s22 = smov %s9065_s29  ;;  %34 = sbr.rel (!%p32_p3) target bundleno = 19 (0x13), region = 177 }
0x12cd   :  { %5012 = vsyncpa [#allocation11], 1 }
0x12ce   :  { %5014 = vsyncpa [#allocation11 + $0x1], 1 }
0x12cf   :  { %5015 = vsyncpa [#allocation14], 1 }
0x12d0   :  { %5016 = vsyncpa [#allocation17], 1 }
0x12d1   :  { %5017 = vsyncpa [#allocation20], 1 }
0x12d2   :  { %5018 = vsyncpa [#allocation23], 1 }
0x12d3   :  { %5019 = vsyncpa [#allocation12], 1 }
0x12d4   :  { %5021 = vsyncpa [#allocation12 + $0x1], 1 }

</bundles_post_ra>
